<compile_context>
chip_gen: v5e
topology: v5e:2x2
jax: 0.10.0
libtpu: 0.0.40
codegen_flags: <defaults>
</compile_context>

<pallas_src>
import math

import jax
import jax.numpy as jnp
from jax.experimental import pallas as pl
from jax.experimental.pallas import tpu as pltpu


# ----------------------------------------------------------------------------
# helpers
# ----------------------------------------------------------------------------
def _layernorm(x, g, b, eps=1e-5):
    mu = jnp.mean(x, axis=-1, keepdims=True)
    xc = x - mu
    var = jnp.mean(xc * xc, axis=-1, keepdims=True)
    return xc * jax.lax.rsqrt(var + eps) * g + b


# ----------------------------------------------------------------------------
# fused Pallas kernel: embed + L encoder layers + pool + classify
# ----------------------------------------------------------------------------
def _make_fused_kernel(nhead):
    bf16 = jnp.bfloat16

    def kernel(x_ref, mask_ref, emb_ref, inw_ref,
               wqkv_ref, bqkv_ref, woT_ref, bo_ref, g1_ref, be1_ref,
               w1T_ref, bf1_ref, w2T_ref, bf2_ref, g2_ref, be2_ref,
               wp_ref, bp_ref, wcT_ref, bc_ref, out_ref):
        BB, T = x_ref.shape[0], x_ref.shape[1]
        D = inw_ref.shape[1]
        L = wqkv_ref.shape[0]
        hd = D // nhead
        scale = 1.0 / math.sqrt(hd)
        N = BB * T

        # ---- key-padding mask -> additive bias, hoisted once per grid step ----
        mb = mask_ref[...]                           # (BB, T): 1.0 valid, 0.0 pad
        neg_bias = (mb - 1.0) * 1e30                 # 0 valid, -1e30 pad
        bias_tt = [jnp.broadcast_to(neg_bias[b:b + 1, :], (T, T))
                   for b in range(BB)]               # per-row (T, T) additive mask

        # ---- input projection (Linear(1, D)) + positional embedding -----------
        xcol = x_ref[...].reshape(N, 1)              # (N, 1)
        h = xcol * inw_ref[...] + emb_ref[...]       # (N, D) f32   (emb = pos + bias)

        # ---- transformer encoder layers (post-norm, relu) ----------------------
        for l in range(L):
            wqkv = wqkv_ref[l]                       # (D, 3D) bf16
            woT = woT_ref[l]                         # (D, D)  bf16
            w1T = w1T_ref[l]                         # (D, 4D) bf16
            w2T = w2T_ref[l]                         # (4D, D) bf16

            # fused Q/K/V projection: one big matmul, f32 accumulation
            qkv = jnp.dot(h.astype(bf16), wqkv,
                          preferred_element_type=jnp.float32) + bqkv_ref[l]  # (N, 3D)

            att_rows = []
            for b in range(BB):                      # static loop over batch rows
                qkv_b = qkv[b * T:(b + 1) * T, :]    # (T, 3D) - aligned sublane slice
                heads = []
                for hh in range(nhead):              # static loop over heads
                    s0 = hh * hd
                    q_h = qkv_b[:, s0:s0 + hd].astype(bf16)
                    k_h = qkv_b[:, D + s0:D + s0 + hd].astype(bf16)
                    v_h = qkv_b[:, 2 * D + s0:2 * D + s0 + hd].astype(bf16)
                    sc = jax.lax.dot_general(
                        q_h, k_h, (((1,), (1,)), ((), ())),
                        preferred_element_type=jnp.float32) * scale          # (T, T)
                    sc = sc + bias_tt[b]                                     # mask
                    m = jnp.max(sc, axis=-1, keepdims=True)
                    p = jnp.exp(sc - m)
                    p = p * pl.reciprocal(jnp.sum(p, axis=-1, keepdims=True),
                                          approx=True)
                    heads.append(jnp.dot(p.astype(bf16), v_h,
                                         preferred_element_type=jnp.float32))  # (T, hd)
                att_rows.append(jnp.concatenate(heads, axis=-1))             # (T, D)
            o_all = jnp.concatenate(att_rows, axis=0)                        # (N, D)

            # single concatenated output projection for all heads
            attn = jnp.dot(o_all.astype(bf16), woT,
                           preferred_element_type=jnp.float32) + bo_ref[l]
            h = _layernorm(h + attn, g1_ref[l], be1_ref[l])                  # post-norm

            # feed-forward
            mid = jnp.dot(h.astype(bf16), w1T,
                          preferred_element_type=jnp.float32) + bf1_ref[l]
            mid = jnp.maximum(mid, 0.0)                                      # relu
            ff = jnp.dot(mid.astype(bf16), w2T,
                         preferred_element_type=jnp.float32) + bf2_ref[l]
            h = _layernorm(h + ff, g2_ref[l], be2_ref[l])

        # ---- masked attention pooling + classifier (tiny; stays f32) -----------
        pooled_rows = []
        for b in range(BB):
            h_b = h[b * T:(b + 1) * T, :]                                    # (T, D)
            s = jax.lax.dot_general(wp_ref[...], h_b, (((1,), (1,)), ((), ())),
                                    preferred_element_type=jnp.float32) + bp_ref[...]
            s = s + neg_bias[b:b + 1, :]                                     # (1, T)
            m = jnp.max(s, axis=-1, keepdims=True)
            p = jnp.exp(s - m)
            p = p * pl.reciprocal(jnp.sum(p, axis=-1, keepdims=True), approx=True)
            pooled_rows.append(jnp.dot(p, h_b,
                                       preferred_element_type=jnp.float32))  # (1, D)
        pooled = jnp.concatenate(pooled_rows, axis=0)                        # (BB, D)
        out_ref[...] = jnp.dot(pooled, wcT_ref[...],
                               preferred_element_type=jnp.float32) + bc_ref[...]

    return kernel


# ----------------------------------------------------------------------------
# wrapper
# ----------------------------------------------------------------------------
def _full_spec(a):
    idx = (0,) * a.ndim
    return pl.BlockSpec(a.shape, lambda i: idx)


def pallas_forward(x, mask_bool, params, nhead):
    B, T, _ = x.shape
    D = params['in_wT'].shape[1]
    C = params['wcT'].shape[1]
    assert D % nhead == 0
    bf16 = jnp.bfloat16

    # batch rows per grid step (sublane-friendly; full batch when small / odd)
    block_b = min(B, 8) if B % 8 == 0 else B
    grid = (B // block_b,)

    def stack(key, dtype=jnp.float32):
        return jnp.stack([lp[key] for lp in params['layers']]).astype(dtype)

    wqkvT = jnp.stack([jnp.concatenate([lp['wqT'], lp['wkT'], lp['wvT']], axis=1)
                       for lp in params['layers']]).astype(bf16)          # (L, D, 3D)
    bqkv = jnp.stack([jnp.concatenate([lp['bq'], lp['bk'], lp['bv']], axis=1)
                      for lp in params['layers']])                        # (L, 1, 3D)

    weights = [
        jnp.tile(params['pos'][:T] + params['in_b'], (block_b, 1)),       # emb (BB*T, D)
        params['in_wT'],                                                  # (1, D)
        wqkvT, bqkv,
        stack('woT', bf16), stack('bo'),
        stack('g1'), stack('be1'),
        stack('w1T', bf16), stack('bf1'),
        stack('w2T', bf16), stack('bf2'),
        stack('g2'), stack('be2'),
        params['wp'], params['bp'], params['wcT'], params['bc'],
    ]

    maskf = mask_bool.astype(jnp.float32)                                 # (B, T)
    kernel = _make_fused_kernel(nhead)
    return pl.pallas_call(
        kernel,
        out_shape=jax.ShapeDtypeStruct((B, C), jnp.float32),
        grid=grid,
        in_specs=[pl.BlockSpec((block_b, T, 1), lambda i: (i, 0, 0)),
                  pl.BlockSpec((block_b, T), lambda i: (i, 0))]
                 + [_full_spec(w) for w in weights],
        out_specs=pl.BlockSpec((block_b, C), lambda i: (i, 0)),
        compiler_params=pltpu.CompilerParams(
            dimension_semantics=("parallel",)),
    )(x, maskf, *weights)


# ----------------------------------------------------------------------------
# pure-JAX reference (mirrors the kernel's bf16-operand / f32-accum matmuls)
# ----------------------------------------------------------------------------
def reference_forward(x, mask_bool, params, nhead):
    B, T, _ = x.shape
    D = params['in_wT'].shape[1]
    hd = D // nhead
    scale = 1.0 / math.sqrt(hd)
    bf16 = jnp.bfloat16

    def mm(a, b):  # bf16 operands, f32 accumulation (same as kernel)
        return jnp.dot(a.astype(bf16), b.astype(bf16),
                       preferred_element_type=jnp.float32)

    bias = (mask_bool.astype(jnp.float32) - 1.0) * 1e30                   # (B, T)
    h = x * params['in_wT'] + params['in_b'] + params['pos'][:T]          # (B, T, D)
    for lp in params['layers']:
        wqkvT = jnp.concatenate([lp['wqT'], lp['wkT'], lp['wvT']], axis=1)
        bqkv = jnp.concatenate([lp['bq'], lp['bk'], lp['bv']], axis=1)
        qkv = mm(h, wqkvT) + bqkv
        q, k, v = qkv[..., :D], qkv[..., D:2 * D], qkv[..., 2 * D:]
        heads = []
        for i in range(nhead):
            s0 = i * hd
            qh, kh, vh = q[..., s0:s0 + hd], k[..., s0:s0 + hd], v[..., s0:s0 + hd]
            sc = jnp.einsum('bth,bsh->bts', qh.astype(bf16), kh.astype(bf16),
                            preferred_element_type=jnp.float32) * scale
            sc = sc + bias[:, None, :]
            p = jax.nn.softmax(sc, axis=-1)
            heads.append(jnp.einsum('bts,bsh->bth', p.astype(bf16), vh.astype(bf16),
                                    preferred_element_type=jnp.float32))
        attn = mm(jnp.concatenate(heads, axis=-1), lp['woT']) + lp['bo']
        h = _layernorm(h + attn, lp['g1'], lp['be1'])
        ff = mm(jnp.maximum(mm(h, lp['w1T']) + lp['bf1'], 0.0), lp['w2T']) + lp['bf2']
        h = _layernorm(h + ff, lp['g2'], lp['be2'])
    s = jnp.einsum('btd,od->bt', h, params['wp']) + params['bp'][0, 0] + bias
    w = jax.nn.softmax(s, axis=1)
    pooled = jnp.einsum('bt,btd->bd', w, h)
    return pooled @ params['wcT'] + params['bc']


# ----------------------------------------------------------------------------
# deterministic parameter initialization (shapes match the PyTorch module)
# ----------------------------------------------------------------------------
def init_params(key, d_model, nhead, num_layers, num_classes, max_pos=10000):
    keys = jax.random.split(key, 8 + num_layers)

    def w(k, shape, scale=0.05):
        return (scale * jax.random.normal(k, shape)).astype(jnp.float32)

    params = {
        'in_wT': w(keys[0], (1, d_model)),                 # input_proj.weight.T
        'in_b':  w(keys[1], (1, d_model), 0.02),           # input_proj.bias
        'pos':   w(keys[2], (max_pos, d_model), 0.02),     # pos_embedding.weight
        'wp':    w(keys[3], (1, d_model)),                 # attn_pool.weight
        'bp':    w(keys[4], (1, 1), 0.02),                 # attn_pool.bias
        'wcT':   w(keys[5], (d_model, num_classes)),       # classifier.weight.T
        'bc':    w(keys[6], (1, num_classes), 0.02),       # classifier.bias
    }
    layers = []
    for i in range(num_layers):
        lk = jax.random.split(keys[7 + i], 8)
        layers.append(dict(
            wqT=w(lk[0], (d_model, d_model)), bq=jnp.zeros((1, d_model), jnp.float32),
            wkT=w(lk[1], (d_model, d_model)), bk=jnp.zeros((1, d_model), jnp.float32),
            wvT=w(lk[2], (d_model, d_model)), bv=jnp.zeros((1, d_model), jnp.float32),
            woT=w(lk[3], (d_model, d_model)), bo=jnp.zeros((1, d_model), jnp.float32),
            g1=jnp.ones((1, d_model), jnp.float32), be1=jnp.zeros((1, d_model), jnp.float32),
            w1T=w(lk[4], (4 * d_model, d_model)).T.copy() if False else w(lk[4], (d_model, 4 * d_model)),
            bf1=w(lk[5], (1, 4 * d_model), 0.02),
            w2T=w(lk[6], (4 * d_model, d_model)), bf2=w(lk[7], (1, d_model), 0.02),
            g2=jnp.ones((1, d_model), jnp.float32), be2=jnp.zeros((1, d_model), jnp.float32),
        ))
    params['layers'] = layers
    return params


# ----------------------------------------------------------------------------
# main
# ----------------------------------------------------------------------------
if __name__ == "__main__":
    B, T, D, H, L, C = 2, 8, 32, 4, 2, 11   # small shapes for the demo
    key = jax.random.PRNGKey(0)
    kp, kx = jax.random.split(key)
    params = init_params(kp, d_model=D, nhead=H, num_layers=L, num_classes=C)

    x = jax.random.normal(kx, (B, T, 1), dtype=jnp.float32)
    lengths = jnp.array([T, 5], dtype=jnp.int32)
    mask = jnp.arange(T)[None, :] < lengths[:, None]     # True = valid token

    out = pallas_forward(x, mask, params, nhead=H)
    out = jax.block_until_ready(out)

    ref = reference_forward(x, mask, params, nhead=H)
    assert out.shape == (B, C), out.shape
    assert bool(jnp.all(jnp.isfinite(out)))
    # tolerance covers approx-reciprocal softmax + bf16 matmul operand rounding
    assert bool(jnp.allclose(out, ref, atol=2e-2, rtol=2e-2)), (out, ref)
    print("KERNEL_OK")
</pallas_src>

<mosaic_0001>
module attributes {stable_mosaic.version = 11 : i64} {
  func.func @kernel(%arg0: i32, %arg1: memref<2x8x1xf32, #tpu.memory_space<vmem>>, %arg2: memref<2x8xf32, #tpu.memory_space<vmem>>, %arg3: memref<16x32xf32, #tpu.memory_space<vmem>>, %arg4: memref<1x32xf32, #tpu.memory_space<vmem>>, %arg5: memref<2x32x96xbf16, #tpu.memory_space<vmem>>, %arg6: memref<2x1x96xf32, #tpu.memory_space<vmem>>, %arg7: memref<2x32x32xbf16, #tpu.memory_space<vmem>>, %arg8: memref<2x1x32xf32, #tpu.memory_space<vmem>>, %arg9: memref<2x1x32xf32, #tpu.memory_space<vmem>>, %arg10: memref<2x1x32xf32, #tpu.memory_space<vmem>>, %arg11: memref<2x32x128xbf16, #tpu.memory_space<vmem>>, %arg12: memref<2x1x128xf32, #tpu.memory_space<vmem>>, %arg13: memref<2x128x32xbf16, #tpu.memory_space<vmem>>, %arg14: memref<2x1x32xf32, #tpu.memory_space<vmem>>, %arg15: memref<2x1x32xf32, #tpu.memory_space<vmem>>, %arg16: memref<2x1x32xf32, #tpu.memory_space<vmem>>, %arg17: memref<1x32xf32, #tpu.memory_space<vmem>>, %arg18: memref<1x1xf32, #tpu.memory_space<vmem>>, %arg19: memref<32x11xf32, #tpu.memory_space<vmem>>, %arg20: memref<1x11xf32, #tpu.memory_space<vmem>>, %arg21: memref<2x11xf32, #tpu.memory_space<vmem>>) attributes {dimension_semantics = [#tpu.dimension_semantics<parallel>], iteration_bounds = array<i64: 1>, scalar_prefetch = 0 : i64, scratch_operands = 0 : i64, tpu.core_type = #tpu.core_type<tc>, window_params = [{transform_indices = @transform_0, window_bounds = array<i64: 2, 8, 1>}, {transform_indices = @transform_1, window_bounds = array<i64: 2, 8>}, {pipeline_mode = #tpu.pipeline_mode<synchronous>, transform_indices = @transform_2, window_bounds = array<i64: 16, 32>}, {pipeline_mode = #tpu.pipeline_mode<synchronous>, transform_indices = @transform_3, window_bounds = array<i64: 1, 32>}, {pipeline_mode = #tpu.pipeline_mode<synchronous>, transform_indices = @transform_4, window_bounds = array<i64: 2, 32, 96>}, {pipeline_mode = #tpu.pipeline_mode<synchronous>, transform_indices = @transform_5, window_bounds = array<i64: 2, 1, 96>}, {pipeline_mode = #tpu.pipeline_mode<synchronous>, transform_indices = @transform_6, window_bounds = array<i64: 2, 32, 32>}, {pipeline_mode = #tpu.pipeline_mode<synchronous>, transform_indices = @transform_7, window_bounds = array<i64: 2, 1, 32>}, {pipeline_mode = #tpu.pipeline_mode<synchronous>, transform_indices = @transform_8, window_bounds = array<i64: 2, 1, 32>}, {pipeline_mode = #tpu.pipeline_mode<synchronous>, transform_indices = @transform_9, window_bounds = array<i64: 2, 1, 32>}, {pipeline_mode = #tpu.pipeline_mode<synchronous>, transform_indices = @transform_10, window_bounds = array<i64: 2, 32, 128>}, {pipeline_mode = #tpu.pipeline_mode<synchronous>, transform_indices = @transform_11, window_bounds = array<i64: 2, 1, 128>}, {pipeline_mode = #tpu.pipeline_mode<synchronous>, transform_indices = @transform_12, window_bounds = array<i64: 2, 128, 32>}, {pipeline_mode = #tpu.pipeline_mode<synchronous>, transform_indices = @transform_13, window_bounds = array<i64: 2, 1, 32>}, {pipeline_mode = #tpu.pipeline_mode<synchronous>, transform_indices = @transform_14, window_bounds = array<i64: 2, 1, 32>}, {pipeline_mode = #tpu.pipeline_mode<synchronous>, transform_indices = @transform_15, window_bounds = array<i64: 2, 1, 32>}, {pipeline_mode = #tpu.pipeline_mode<synchronous>, transform_indices = @transform_16, window_bounds = array<i64: 1, 32>}, {pipeline_mode = #tpu.pipeline_mode<synchronous>, transform_indices = @transform_17, window_bounds = array<i64: 1, 1>}, {pipeline_mode = #tpu.pipeline_mode<synchronous>, transform_indices = @transform_18, window_bounds = array<i64: 32, 11>}, {pipeline_mode = #tpu.pipeline_mode<synchronous>, transform_indices = @transform_19, window_bounds = array<i64: 1, 11>}, {transform_indices = @transform_20, window_bounds = array<i64: 2, 11>}]} {
    %c0 = arith.constant 0 : index
    %c0_0 = arith.constant 0 : index
    %0 = vector.load %arg2[%c0, %c0_0] : memref<2x8xf32, #tpu.memory_space<vmem>>, vector<2x8xf32>
    %cst = arith.constant 1.000000e+00 : f32
    %1 = vector.broadcast %cst : f32 to vector<2x8xf32>
    %2 = arith.subf %0, %1 : vector<2x8xf32>
    %cst_1 = arith.constant 1.000000e+30 : f32
    %3 = vector.broadcast %cst_1 : f32 to vector<2x8xf32>
    %4 = arith.mulf %2, %3 : vector<2x8xf32>
    %5 = vector.extract_strided_slice %4 {offsets = [0, 0], sizes = [1, 8], strides = [1, 1]} : vector<2x8xf32> to vector<1x8xf32>
    %6 = vector.shape_cast %5 : vector<1x8xf32> to vector<1x8xf32>
    %7 = vector.broadcast %6 : vector<1x8xf32> to vector<8x8xf32>
    %8 = vector.extract_strided_slice %4 {offsets = [1, 0], sizes = [1, 8], strides = [1, 1]} : vector<2x8xf32> to vector<1x8xf32>
    %9 = vector.shape_cast %8 : vector<1x8xf32> to vector<1x8xf32>
    %10 = vector.broadcast %9 : vector<1x8xf32> to vector<8x8xf32>
    %c0_2 = arith.constant 0 : index
    %c0_3 = arith.constant 0 : index
    %c0_4 = arith.constant 0 : index
    %11 = vector.load %arg1[%c0_2, %c0_3, %c0_4] : memref<2x8x1xf32, #tpu.memory_space<vmem>>, vector<2x8x1xf32>
    %12 = vector.shape_cast %11 : vector<2x8x1xf32> to vector<16x1xf32>
    %c0_5 = arith.constant 0 : index
    %c0_6 = arith.constant 0 : index
    %13 = vector.load %arg4[%c0_5, %c0_6] : memref<1x32xf32, #tpu.memory_space<vmem>>, vector<1x32xf32>
    %14 = vector.broadcast %12 : vector<16x1xf32> to vector<16x32xf32>
    %15 = vector.broadcast %13 : vector<1x32xf32> to vector<16x32xf32>
    %16 = arith.mulf %14, %15 : vector<16x32xf32>
    %c0_7 = arith.constant 0 : index
    %c0_8 = arith.constant 0 : index
    %17 = vector.load %arg3[%c0_7, %c0_8] : memref<16x32xf32, #tpu.memory_space<vmem>>, vector<16x32xf32>
    %18 = arith.addf %16, %17 : vector<16x32xf32>
    %c0_9 = arith.constant 0 : index
    %c0_10 = arith.constant 0 : index
    %c0_11 = arith.constant 0 : index
    %19 = vector.load %arg5[%c0_9, %c0_10, %c0_11] : memref<2x32x96xbf16, #tpu.memory_space<vmem>>, vector<1x32x96xbf16>
    %20 = vector.shape_cast %19 : vector<1x32x96xbf16> to vector<32x96xbf16>
    %c0_12 = arith.constant 0 : index
    %c0_13 = arith.constant 0 : index
    %c0_14 = arith.constant 0 : index
    %21 = vector.load %arg7[%c0_12, %c0_13, %c0_14] : memref<2x32x32xbf16, #tpu.memory_space<vmem>>, vector<1x32x32xbf16>
    %22 = vector.shape_cast %21 : vector<1x32x32xbf16> to vector<32x32xbf16>
    %c0_15 = arith.constant 0 : index
    %c0_16 = arith.constant 0 : index
    %c0_17 = arith.constant 0 : index
    %23 = vector.load %arg11[%c0_15, %c0_16, %c0_17] : memref<2x32x128xbf16, #tpu.memory_space<vmem>>, vector<1x32x128xbf16>
    %24 = vector.shape_cast %23 : vector<1x32x128xbf16> to vector<32x128xbf16>
    %c0_18 = arith.constant 0 : index
    %c0_19 = arith.constant 0 : index
    %c0_20 = arith.constant 0 : index
    %25 = vector.load %arg13[%c0_18, %c0_19, %c0_20] : memref<2x128x32xbf16, #tpu.memory_space<vmem>>, vector<1x128x32xbf16>
    %26 = vector.shape_cast %25 : vector<1x128x32xbf16> to vector<128x32xbf16>
    %27 = arith.truncf %18 : vector<16x32xf32> to vector<16x32xbf16>
    %cst_21 = arith.constant dense<0.000000e+00> : vector<16x96xf32>
    %28 = tpu.matmul %27, %20, %cst_21 {dimension_numbers = #tpu.dot_dimension_numbers<[1], [0], [0], [1], [0, 0, 1, 1], [], []>} : vector<16x32xbf16>, vector<32x96xbf16>, vector<16x96xf32> -> vector<16x96xf32>
    %c0_22 = arith.constant 0 : index
    %c0_23 = arith.constant 0 : index
    %c0_24 = arith.constant 0 : index
    %29 = vector.load %arg6[%c0_22, %c0_23, %c0_24] : memref<2x1x96xf32, #tpu.memory_space<vmem>>, vector<1x1x96xf32>
    %30 = vector.shape_cast %29 : vector<1x1x96xf32> to vector<1x96xf32>
    %31 = vector.broadcast %30 : vector<1x96xf32> to vector<16x96xf32>
    %32 = arith.addf %28, %31 : vector<16x96xf32>
    %33 = vector.extract_strided_slice %32 {offsets = [0, 0], sizes = [8, 96], strides = [1, 1]} : vector<16x96xf32> to vector<8x96xf32>
    %34 = vector.extract_strided_slice %33 {offsets = [0, 0], sizes = [8, 8], strides = [1, 1]} : vector<8x96xf32> to vector<8x8xf32>
    %35 = arith.truncf %34 : vector<8x8xf32> to vector<8x8xbf16>
    %36 = vector.extract_strided_slice %33 {offsets = [0, 32], sizes = [8, 8], strides = [1, 1]} : vector<8x96xf32> to vector<8x8xf32>
    %37 = arith.truncf %36 : vector<8x8xf32> to vector<8x8xbf16>
    %38 = vector.extract_strided_slice %33 {offsets = [0, 64], sizes = [8, 8], strides = [1, 1]} : vector<8x96xf32> to vector<8x8xf32>
    %39 = arith.truncf %38 : vector<8x8xf32> to vector<8x8xbf16>
    %cst_25 = arith.constant dense<0.000000e+00> : vector<8x8xf32>
    %40 = tpu.matmul %35, %37, %cst_25 {dimension_numbers = #tpu.dot_dimension_numbers<[1], [1], [0], [0], [0, 0, 1, 0], [], []>} : vector<8x8xbf16>, vector<8x8xbf16>, vector<8x8xf32> -> vector<8x8xf32>
    %cst_26 = arith.constant 0.353553385 : f32
    %41 = vector.broadcast %cst_26 : f32 to vector<8x8xf32>
    %42 = arith.mulf %40, %41 : vector<8x8xf32>
    %43 = arith.addf %42, %7 : vector<8x8xf32>
    %cst_27 = arith.constant dense<0xFF800000> : vector<8xf32>
    %44 = vector.multi_reduction <maximumf>, %43, %cst_27 [1] : vector<8x8xf32> to vector<8xf32>
    %45 = vector.shape_cast %44 : vector<8xf32> to vector<8x1xf32>
    %46 = vector.broadcast %45 : vector<8x1xf32> to vector<8x8xf32>
    %47 = arith.subf %43, %46 : vector<8x8xf32>
    %48 = math.exp %47 : vector<8x8xf32>
    %cst_28 = arith.constant dense<0.000000e+00> : vector<8xf32>
    %49 = vector.multi_reduction <add>, %48, %cst_28 [1] : vector<8x8xf32> to vector<8xf32>
    %50 = vector.shape_cast %49 : vector<8xf32> to vector<8x1xf32>
    %51 = tpu.reciprocal %50 {approx = true} : vector<8x1xf32> -> vector<8x1xf32>
    %52 = vector.broadcast %51 : vector<8x1xf32> to vector<8x8xf32>
    %53 = arith.mulf %48, %52 : vector<8x8xf32>
    %54 = arith.truncf %53 : vector<8x8xf32> to vector<8x8xbf16>
    %cst_29 = arith.constant dense<0.000000e+00> : vector<8x8xf32>
    %55 = tpu.matmul %54, %39, %cst_29 {dimension_numbers = #tpu.dot_dimension_numbers<[1], [0], [0], [1], [0, 0, 1, 1], [], []>} : vector<8x8xbf16>, vector<8x8xbf16>, vector<8x8xf32> -> vector<8x8xf32>
    %56 = vector.extract_strided_slice %33 {offsets = [0, 8], sizes = [8, 8], strides = [1, 1]} : vector<8x96xf32> to vector<8x8xf32>
    %57 = arith.truncf %56 : vector<8x8xf32> to vector<8x8xbf16>
    %58 = vector.extract_strided_slice %33 {offsets = [0, 40], sizes = [8, 8], strides = [1, 1]} : vector<8x96xf32> to vector<8x8xf32>
    %59 = arith.truncf %58 : vector<8x8xf32> to vector<8x8xbf16>
    %60 = vector.extract_strided_slice %33 {offsets = [0, 72], sizes = [8, 8], strides = [1, 1]} : vector<8x96xf32> to vector<8x8xf32>
    %61 = arith.truncf %60 : vector<8x8xf32> to vector<8x8xbf16>
    %cst_30 = arith.constant dense<0.000000e+00> : vector<8x8xf32>
    %62 = tpu.matmul %57, %59, %cst_30 {dimension_numbers = #tpu.dot_dimension_numbers<[1], [1], [0], [0], [0, 0, 1, 0], [], []>} : vector<8x8xbf16>, vector<8x8xbf16>, vector<8x8xf32> -> vector<8x8xf32>
    %cst_31 = arith.constant 0.353553385 : f32
    %63 = vector.broadcast %cst_31 : f32 to vector<8x8xf32>
    %64 = arith.mulf %62, %63 : vector<8x8xf32>
    %65 = arith.addf %64, %7 : vector<8x8xf32>
    %cst_32 = arith.constant dense<0xFF800000> : vector<8xf32>
    %66 = vector.multi_reduction <maximumf>, %65, %cst_32 [1] : vector<8x8xf32> to vector<8xf32>
    %67 = vector.shape_cast %66 : vector<8xf32> to vector<8x1xf32>
    %68 = vector.broadcast %67 : vector<8x1xf32> to vector<8x8xf32>
    %69 = arith.subf %65, %68 : vector<8x8xf32>
    %70 = math.exp %69 : vector<8x8xf32>
    %cst_33 = arith.constant dense<0.000000e+00> : vector<8xf32>
    %71 = vector.multi_reduction <add>, %70, %cst_33 [1] : vector<8x8xf32> to vector<8xf32>
    %72 = vector.shape_cast %71 : vector<8xf32> to vector<8x1xf32>
    %73 = tpu.reciprocal %72 {approx = true} : vector<8x1xf32> -> vector<8x1xf32>
    %74 = vector.broadcast %73 : vector<8x1xf32> to vector<8x8xf32>
    %75 = arith.mulf %70, %74 : vector<8x8xf32>
    %76 = arith.truncf %75 : vector<8x8xf32> to vector<8x8xbf16>
    %cst_34 = arith.constant dense<0.000000e+00> : vector<8x8xf32>
    %77 = tpu.matmul %76, %61, %cst_34 {dimension_numbers = #tpu.dot_dimension_numbers<[1], [0], [0], [1], [0, 0, 1, 1], [], []>} : vector<8x8xbf16>, vector<8x8xbf16>, vector<8x8xf32> -> vector<8x8xf32>
    %78 = vector.extract_strided_slice %33 {offsets = [0, 16], sizes = [8, 8], strides = [1, 1]} : vector<8x96xf32> to vector<8x8xf32>
    %79 = arith.truncf %78 : vector<8x8xf32> to vector<8x8xbf16>
    %80 = vector.extract_strided_slice %33 {offsets = [0, 48], sizes = [8, 8], strides = [1, 1]} : vector<8x96xf32> to vector<8x8xf32>
    %81 = arith.truncf %80 : vector<8x8xf32> to vector<8x8xbf16>
    %82 = vector.extract_strided_slice %33 {offsets = [0, 80], sizes = [8, 8], strides = [1, 1]} : vector<8x96xf32> to vector<8x8xf32>
    %83 = arith.truncf %82 : vector<8x8xf32> to vector<8x8xbf16>
    %cst_35 = arith.constant dense<0.000000e+00> : vector<8x8xf32>
    %84 = tpu.matmul %79, %81, %cst_35 {dimension_numbers = #tpu.dot_dimension_numbers<[1], [1], [0], [0], [0, 0, 1, 0], [], []>} : vector<8x8xbf16>, vector<8x8xbf16>, vector<8x8xf32> -> vector<8x8xf32>
    %cst_36 = arith.constant 0.353553385 : f32
    %85 = vector.broadcast %cst_36 : f32 to vector<8x8xf32>
    %86 = arith.mulf %84, %85 : vector<8x8xf32>
    %87 = arith.addf %86, %7 : vector<8x8xf32>
    %cst_37 = arith.constant dense<0xFF800000> : vector<8xf32>
    %88 = vector.multi_reduction <maximumf>, %87, %cst_37 [1] : vector<8x8xf32> to vector<8xf32>
    %89 = vector.shape_cast %88 : vector<8xf32> to vector<8x1xf32>
    %90 = vector.broadcast %89 : vector<8x1xf32> to vector<8x8xf32>
    %91 = arith.subf %87, %90 : vector<8x8xf32>
    %92 = math.exp %91 : vector<8x8xf32>
    %cst_38 = arith.constant dense<0.000000e+00> : vector<8xf32>
    %93 = vector.multi_reduction <add>, %92, %cst_38 [1] : vector<8x8xf32> to vector<8xf32>
    %94 = vector.shape_cast %93 : vector<8xf32> to vector<8x1xf32>
    %95 = tpu.reciprocal %94 {approx = true} : vector<8x1xf32> -> vector<8x1xf32>
    %96 = vector.broadcast %95 : vector<8x1xf32> to vector<8x8xf32>
    %97 = arith.mulf %92, %96 : vector<8x8xf32>
    %98 = arith.truncf %97 : vector<8x8xf32> to vector<8x8xbf16>
    %cst_39 = arith.constant dense<0.000000e+00> : vector<8x8xf32>
    %99 = tpu.matmul %98, %83, %cst_39 {dimension_numbers = #tpu.dot_dimension_numbers<[1], [0], [0], [1], [0, 0, 1, 1], [], []>} : vector<8x8xbf16>, vector<8x8xbf16>, vector<8x8xf32> -> vector<8x8xf32>
    %100 = vector.extract_strided_slice %33 {offsets = [0, 24], sizes = [8, 8], strides = [1, 1]} : vector<8x96xf32> to vector<8x8xf32>
    %101 = arith.truncf %100 : vector<8x8xf32> to vector<8x8xbf16>
    %102 = vector.extract_strided_slice %33 {offsets = [0, 56], sizes = [8, 8], strides = [1, 1]} : vector<8x96xf32> to vector<8x8xf32>
    %103 = arith.truncf %102 : vector<8x8xf32> to vector<8x8xbf16>
    %104 = vector.extract_strided_slice %33 {offsets = [0, 88], sizes = [8, 8], strides = [1, 1]} : vector<8x96xf32> to vector<8x8xf32>
    %105 = arith.truncf %104 : vector<8x8xf32> to vector<8x8xbf16>
    %cst_40 = arith.constant dense<0.000000e+00> : vector<8x8xf32>
    %106 = tpu.matmul %101, %103, %cst_40 {dimension_numbers = #tpu.dot_dimension_numbers<[1], [1], [0], [0], [0, 0, 1, 0], [], []>} : vector<8x8xbf16>, vector<8x8xbf16>, vector<8x8xf32> -> vector<8x8xf32>
    %cst_41 = arith.constant 0.353553385 : f32
    %107 = vector.broadcast %cst_41 : f32 to vector<8x8xf32>
    %108 = arith.mulf %106, %107 : vector<8x8xf32>
    %109 = arith.addf %108, %7 : vector<8x8xf32>
    %cst_42 = arith.constant dense<0xFF800000> : vector<8xf32>
    %110 = vector.multi_reduction <maximumf>, %109, %cst_42 [1] : vector<8x8xf32> to vector<8xf32>
    %111 = vector.shape_cast %110 : vector<8xf32> to vector<8x1xf32>
    %112 = vector.broadcast %111 : vector<8x1xf32> to vector<8x8xf32>
    %113 = arith.subf %109, %112 : vector<8x8xf32>
    %114 = math.exp %113 : vector<8x8xf32>
    %cst_43 = arith.constant dense<0.000000e+00> : vector<8xf32>
    %115 = vector.multi_reduction <add>, %114, %cst_43 [1] : vector<8x8xf32> to vector<8xf32>
    %116 = vector.shape_cast %115 : vector<8xf32> to vector<8x1xf32>
    %117 = tpu.reciprocal %116 {approx = true} : vector<8x1xf32> -> vector<8x1xf32>
    %118 = vector.broadcast %117 : vector<8x1xf32> to vector<8x8xf32>
    %119 = arith.mulf %114, %118 : vector<8x8xf32>
    %120 = arith.truncf %119 : vector<8x8xf32> to vector<8x8xbf16>
    %cst_44 = arith.constant dense<0.000000e+00> : vector<8x8xf32>
    %121 = tpu.matmul %120, %105, %cst_44 {dimension_numbers = #tpu.dot_dimension_numbers<[1], [0], [0], [1], [0, 0, 1, 1], [], []>} : vector<8x8xbf16>, vector<8x8xbf16>, vector<8x8xf32> -> vector<8x8xf32>
    %122 = tpu.concatenate %55, %77, %99, %121 in 1 : vector<8x8xf32>, vector<8x8xf32>, vector<8x8xf32>, vector<8x8xf32> -> vector<8x32xf32>
    %123 = vector.extract_strided_slice %32 {offsets = [8, 0], sizes = [8, 96], strides = [1, 1]} : vector<16x96xf32> to vector<8x96xf32>
    %124 = vector.extract_strided_slice %123 {offsets = [0, 0], sizes = [8, 8], strides = [1, 1]} : vector<8x96xf32> to vector<8x8xf32>
    %125 = arith.truncf %124 : vector<8x8xf32> to vector<8x8xbf16>
    %126 = vector.extract_strided_slice %123 {offsets = [0, 32], sizes = [8, 8], strides = [1, 1]} : vector<8x96xf32> to vector<8x8xf32>
    %127 = arith.truncf %126 : vector<8x8xf32> to vector<8x8xbf16>
    %128 = vector.extract_strided_slice %123 {offsets = [0, 64], sizes = [8, 8], strides = [1, 1]} : vector<8x96xf32> to vector<8x8xf32>
    %129 = arith.truncf %128 : vector<8x8xf32> to vector<8x8xbf16>
    %cst_45 = arith.constant dense<0.000000e+00> : vector<8x8xf32>
    %130 = tpu.matmul %125, %127, %cst_45 {dimension_numbers = #tpu.dot_dimension_numbers<[1], [1], [0], [0], [0, 0, 1, 0], [], []>} : vector<8x8xbf16>, vector<8x8xbf16>, vector<8x8xf32> -> vector<8x8xf32>
    %cst_46 = arith.constant 0.353553385 : f32
    %131 = vector.broadcast %cst_46 : f32 to vector<8x8xf32>
    %132 = arith.mulf %130, %131 : vector<8x8xf32>
    %133 = arith.addf %132, %10 : vector<8x8xf32>
    %cst_47 = arith.constant dense<0xFF800000> : vector<8xf32>
    %134 = vector.multi_reduction <maximumf>, %133, %cst_47 [1] : vector<8x8xf32> to vector<8xf32>
    %135 = vector.shape_cast %134 : vector<8xf32> to vector<8x1xf32>
    %136 = vector.broadcast %135 : vector<8x1xf32> to vector<8x8xf32>
    %137 = arith.subf %133, %136 : vector<8x8xf32>
    %138 = math.exp %137 : vector<8x8xf32>
    %cst_48 = arith.constant dense<0.000000e+00> : vector<8xf32>
    %139 = vector.multi_reduction <add>, %138, %cst_48 [1] : vector<8x8xf32> to vector<8xf32>
    %140 = vector.shape_cast %139 : vector<8xf32> to vector<8x1xf32>
    %141 = tpu.reciprocal %140 {approx = true} : vector<8x1xf32> -> vector<8x1xf32>
    %142 = vector.broadcast %141 : vector<8x1xf32> to vector<8x8xf32>
    %143 = arith.mulf %138, %142 : vector<8x8xf32>
    %144 = arith.truncf %143 : vector<8x8xf32> to vector<8x8xbf16>
    %cst_49 = arith.constant dense<0.000000e+00> : vector<8x8xf32>
    %145 = tpu.matmul %144, %129, %cst_49 {dimension_numbers = #tpu.dot_dimension_numbers<[1], [0], [0], [1], [0, 0, 1, 1], [], []>} : vector<8x8xbf16>, vector<8x8xbf16>, vector<8x8xf32> -> vector<8x8xf32>
    %146 = vector.extract_strided_slice %123 {offsets = [0, 8], sizes = [8, 8], strides = [1, 1]} : vector<8x96xf32> to vector<8x8xf32>
    %147 = arith.truncf %146 : vector<8x8xf32> to vector<8x8xbf16>
    %148 = vector.extract_strided_slice %123 {offsets = [0, 40], sizes = [8, 8], strides = [1, 1]} : vector<8x96xf32> to vector<8x8xf32>
    %149 = arith.truncf %148 : vector<8x8xf32> to vector<8x8xbf16>
    %150 = vector.extract_strided_slice %123 {offsets = [0, 72], sizes = [8, 8], strides = [1, 1]} : vector<8x96xf32> to vector<8x8xf32>
    %151 = arith.truncf %150 : vector<8x8xf32> to vector<8x8xbf16>
    %cst_50 = arith.constant dense<0.000000e+00> : vector<8x8xf32>
    %152 = tpu.matmul %147, %149, %cst_50 {dimension_numbers = #tpu.dot_dimension_numbers<[1], [1], [0], [0], [0, 0, 1, 0], [], []>} : vector<8x8xbf16>, vector<8x8xbf16>, vector<8x8xf32> -> vector<8x8xf32>
    %cst_51 = arith.constant 0.353553385 : f32
    %153 = vector.broadcast %cst_51 : f32 to vector<8x8xf32>
    %154 = arith.mulf %152, %153 : vector<8x8xf32>
    %155 = arith.addf %154, %10 : vector<8x8xf32>
    %cst_52 = arith.constant dense<0xFF800000> : vector<8xf32>
    %156 = vector.multi_reduction <maximumf>, %155, %cst_52 [1] : vector<8x8xf32> to vector<8xf32>
    %157 = vector.shape_cast %156 : vector<8xf32> to vector<8x1xf32>
    %158 = vector.broadcast %157 : vector<8x1xf32> to vector<8x8xf32>
    %159 = arith.subf %155, %158 : vector<8x8xf32>
    %160 = math.exp %159 : vector<8x8xf32>
    %cst_53 = arith.constant dense<0.000000e+00> : vector<8xf32>
    %161 = vector.multi_reduction <add>, %160, %cst_53 [1] : vector<8x8xf32> to vector<8xf32>
    %162 = vector.shape_cast %161 : vector<8xf32> to vector<8x1xf32>
    %163 = tpu.reciprocal %162 {approx = true} : vector<8x1xf32> -> vector<8x1xf32>
    %164 = vector.broadcast %163 : vector<8x1xf32> to vector<8x8xf32>
    %165 = arith.mulf %160, %164 : vector<8x8xf32>
    %166 = arith.truncf %165 : vector<8x8xf32> to vector<8x8xbf16>
    %cst_54 = arith.constant dense<0.000000e+00> : vector<8x8xf32>
    %167 = tpu.matmul %166, %151, %cst_54 {dimension_numbers = #tpu.dot_dimension_numbers<[1], [0], [0], [1], [0, 0, 1, 1], [], []>} : vector<8x8xbf16>, vector<8x8xbf16>, vector<8x8xf32> -> vector<8x8xf32>
    %168 = vector.extract_strided_slice %123 {offsets = [0, 16], sizes = [8, 8], strides = [1, 1]} : vector<8x96xf32> to vector<8x8xf32>
    %169 = arith.truncf %168 : vector<8x8xf32> to vector<8x8xbf16>
    %170 = vector.extract_strided_slice %123 {offsets = [0, 48], sizes = [8, 8], strides = [1, 1]} : vector<8x96xf32> to vector<8x8xf32>
    %171 = arith.truncf %170 : vector<8x8xf32> to vector<8x8xbf16>
    %172 = vector.extract_strided_slice %123 {offsets = [0, 80], sizes = [8, 8], strides = [1, 1]} : vector<8x96xf32> to vector<8x8xf32>
    %173 = arith.truncf %172 : vector<8x8xf32> to vector<8x8xbf16>
    %cst_55 = arith.constant dense<0.000000e+00> : vector<8x8xf32>
    %174 = tpu.matmul %169, %171, %cst_55 {dimension_numbers = #tpu.dot_dimension_numbers<[1], [1], [0], [0], [0, 0, 1, 0], [], []>} : vector<8x8xbf16>, vector<8x8xbf16>, vector<8x8xf32> -> vector<8x8xf32>
    %cst_56 = arith.constant 0.353553385 : f32
    %175 = vector.broadcast %cst_56 : f32 to vector<8x8xf32>
    %176 = arith.mulf %174, %175 : vector<8x8xf32>
    %177 = arith.addf %176, %10 : vector<8x8xf32>
    %cst_57 = arith.constant dense<0xFF800000> : vector<8xf32>
    %178 = vector.multi_reduction <maximumf>, %177, %cst_57 [1] : vector<8x8xf32> to vector<8xf32>
    %179 = vector.shape_cast %178 : vector<8xf32> to vector<8x1xf32>
    %180 = vector.broadcast %179 : vector<8x1xf32> to vector<8x8xf32>
    %181 = arith.subf %177, %180 : vector<8x8xf32>
    %182 = math.exp %181 : vector<8x8xf32>
    %cst_58 = arith.constant dense<0.000000e+00> : vector<8xf32>
    %183 = vector.multi_reduction <add>, %182, %cst_58 [1] : vector<8x8xf32> to vector<8xf32>
    %184 = vector.shape_cast %183 : vector<8xf32> to vector<8x1xf32>
    %185 = tpu.reciprocal %184 {approx = true} : vector<8x1xf32> -> vector<8x1xf32>
    %186 = vector.broadcast %185 : vector<8x1xf32> to vector<8x8xf32>
    %187 = arith.mulf %182, %186 : vector<8x8xf32>
    %188 = arith.truncf %187 : vector<8x8xf32> to vector<8x8xbf16>
    %cst_59 = arith.constant dense<0.000000e+00> : vector<8x8xf32>
    %189 = tpu.matmul %188, %173, %cst_59 {dimension_numbers = #tpu.dot_dimension_numbers<[1], [0], [0], [1], [0, 0, 1, 1], [], []>} : vector<8x8xbf16>, vector<8x8xbf16>, vector<8x8xf32> -> vector<8x8xf32>
    %190 = vector.extract_strided_slice %123 {offsets = [0, 24], sizes = [8, 8], strides = [1, 1]} : vector<8x96xf32> to vector<8x8xf32>
    %191 = arith.truncf %190 : vector<8x8xf32> to vector<8x8xbf16>
    %192 = vector.extract_strided_slice %123 {offsets = [0, 56], sizes = [8, 8], strides = [1, 1]} : vector<8x96xf32> to vector<8x8xf32>
    %193 = arith.truncf %192 : vector<8x8xf32> to vector<8x8xbf16>
    %194 = vector.extract_strided_slice %123 {offsets = [0, 88], sizes = [8, 8], strides = [1, 1]} : vector<8x96xf32> to vector<8x8xf32>
    %195 = arith.truncf %194 : vector<8x8xf32> to vector<8x8xbf16>
    %cst_60 = arith.constant dense<0.000000e+00> : vector<8x8xf32>
    %196 = tpu.matmul %191, %193, %cst_60 {dimension_numbers = #tpu.dot_dimension_numbers<[1], [1], [0], [0], [0, 0, 1, 0], [], []>} : vector<8x8xbf16>, vector<8x8xbf16>, vector<8x8xf32> -> vector<8x8xf32>
    %cst_61 = arith.constant 0.353553385 : f32
    %197 = vector.broadcast %cst_61 : f32 to vector<8x8xf32>
    %198 = arith.mulf %196, %197 : vector<8x8xf32>
    %199 = arith.addf %198, %10 : vector<8x8xf32>
    %cst_62 = arith.constant dense<0xFF800000> : vector<8xf32>
    %200 = vector.multi_reduction <maximumf>, %199, %cst_62 [1] : vector<8x8xf32> to vector<8xf32>
    %201 = vector.shape_cast %200 : vector<8xf32> to vector<8x1xf32>
    %202 = vector.broadcast %201 : vector<8x1xf32> to vector<8x8xf32>
    %203 = arith.subf %199, %202 : vector<8x8xf32>
    %204 = math.exp %203 : vector<8x8xf32>
    %cst_63 = arith.constant dense<0.000000e+00> : vector<8xf32>
    %205 = vector.multi_reduction <add>, %204, %cst_63 [1] : vector<8x8xf32> to vector<8xf32>
    %206 = vector.shape_cast %205 : vector<8xf32> to vector<8x1xf32>
    %207 = tpu.reciprocal %206 {approx = true} : vector<8x1xf32> -> vector<8x1xf32>
    %208 = vector.broadcast %207 : vector<8x1xf32> to vector<8x8xf32>
    %209 = arith.mulf %204, %208 : vector<8x8xf32>
    %210 = arith.truncf %209 : vector<8x8xf32> to vector<8x8xbf16>
    %cst_64 = arith.constant dense<0.000000e+00> : vector<8x8xf32>
    %211 = tpu.matmul %210, %195, %cst_64 {dimension_numbers = #tpu.dot_dimension_numbers<[1], [0], [0], [1], [0, 0, 1, 1], [], []>} : vector<8x8xbf16>, vector<8x8xbf16>, vector<8x8xf32> -> vector<8x8xf32>
    %212 = tpu.concatenate %145, %167, %189, %211 in 1 : vector<8x8xf32>, vector<8x8xf32>, vector<8x8xf32>, vector<8x8xf32> -> vector<8x32xf32>
    %213 = tpu.concatenate %122, %212 in 0 : vector<8x32xf32>, vector<8x32xf32> -> vector<16x32xf32>
    %214 = arith.truncf %213 : vector<16x32xf32> to vector<16x32xbf16>
    %cst_65 = arith.constant dense<0.000000e+00> : vector<16x32xf32>
    %215 = tpu.matmul %214, %22, %cst_65 {dimension_numbers = #tpu.dot_dimension_numbers<[1], [0], [0], [1], [0, 0, 1, 1], [], []>} : vector<16x32xbf16>, vector<32x32xbf16>, vector<16x32xf32> -> vector<16x32xf32>
    %c0_66 = arith.constant 0 : index
    %c0_67 = arith.constant 0 : index
    %c0_68 = arith.constant 0 : index
    %216 = vector.load %arg8[%c0_66, %c0_67, %c0_68] : memref<2x1x32xf32, #tpu.memory_space<vmem>>, vector<1x1x32xf32>
    %217 = vector.shape_cast %216 : vector<1x1x32xf32> to vector<1x32xf32>
    %218 = vector.broadcast %217 : vector<1x32xf32> to vector<16x32xf32>
    %219 = arith.addf %215, %218 : vector<16x32xf32>
    %220 = arith.addf %18, %219 : vector<16x32xf32>
    %c0_69 = arith.constant 0 : index
    %c0_70 = arith.constant 0 : index
    %c0_71 = arith.constant 0 : index
    %221 = vector.load %arg9[%c0_69, %c0_70, %c0_71] : memref<2x1x32xf32, #tpu.memory_space<vmem>>, vector<1x1x32xf32>
    %222 = vector.shape_cast %221 : vector<1x1x32xf32> to vector<1x32xf32>
    %c0_72 = arith.constant 0 : index
    %c0_73 = arith.constant 0 : index
    %c0_74 = arith.constant 0 : index
    %223 = vector.load %arg10[%c0_72, %c0_73, %c0_74] : memref<2x1x32xf32, #tpu.memory_space<vmem>>, vector<1x1x32xf32>
    %224 = vector.shape_cast %223 : vector<1x1x32xf32> to vector<1x32xf32>
    %cst_75 = arith.constant dense<0.000000e+00> : vector<16xf32>
    %225 = vector.multi_reduction <add>, %220, %cst_75 [1] : vector<16x32xf32> to vector<16xf32>
    %226 = vector.shape_cast %225 : vector<16xf32> to vector<16x1xf32>
    %cst_76 = arith.constant 3.200000e+01 : f32
    %227 = vector.broadcast %cst_76 : f32 to vector<16x1xf32>
    %228 = arith.divf %226, %227 : vector<16x1xf32>
    %229 = vector.broadcast %228 : vector<16x1xf32> to vector<16x32xf32>
    %230 = arith.subf %220, %229 : vector<16x32xf32>
    %231 = arith.mulf %230, %230 : vector<16x32xf32>
    %cst_77 = arith.constant dense<0.000000e+00> : vector<16xf32>
    %232 = vector.multi_reduction <add>, %231, %cst_77 [1] : vector<16x32xf32> to vector<16xf32>
    %233 = vector.shape_cast %232 : vector<16xf32> to vector<16x1xf32>
    %cst_78 = arith.constant 3.200000e+01 : f32
    %234 = vector.broadcast %cst_78 : f32 to vector<16x1xf32>
    %235 = arith.divf %233, %234 : vector<16x1xf32>
    %cst_79 = arith.constant 9.99999974E-6 : f32
    %236 = vector.broadcast %cst_79 : f32 to vector<16x1xf32>
    %237 = arith.addf %235, %236 : vector<16x1xf32>
    %238 = math.rsqrt %237 : vector<16x1xf32>
    %239 = vector.broadcast %238 : vector<16x1xf32> to vector<16x32xf32>
    %240 = arith.mulf %230, %239 : vector<16x32xf32>
    %241 = vector.broadcast %222 : vector<1x32xf32> to vector<16x32xf32>
    %242 = arith.mulf %240, %241 : vector<16x32xf32>
    %243 = vector.broadcast %224 : vector<1x32xf32> to vector<16x32xf32>
    %244 = arith.addf %242, %243 : vector<16x32xf32>
    %245 = arith.truncf %244 : vector<16x32xf32> to vector<16x32xbf16>
    %cst_80 = arith.constant dense<0.000000e+00> : vector<16x128xf32>
    %246 = tpu.matmul %245, %24, %cst_80 {dimension_numbers = #tpu.dot_dimension_numbers<[1], [0], [0], [1], [0, 0, 1, 1], [], []>} : vector<16x32xbf16>, vector<32x128xbf16>, vector<16x128xf32> -> vector<16x128xf32>
    %c0_81 = arith.constant 0 : index
    %c0_82 = arith.constant 0 : index
    %c0_83 = arith.constant 0 : index
    %247 = vector.load %arg12[%c0_81, %c0_82, %c0_83] : memref<2x1x128xf32, #tpu.memory_space<vmem>>, vector<1x1x128xf32>
    %248 = vector.shape_cast %247 : vector<1x1x128xf32> to vector<1x128xf32>
    %249 = vector.broadcast %248 : vector<1x128xf32> to vector<16x128xf32>
    %250 = arith.addf %246, %249 : vector<16x128xf32>
    %cst_84 = arith.constant 0.000000e+00 : f32
    %251 = vector.broadcast %cst_84 : f32 to vector<16x128xf32>
    %252 = arith.maximumf %250, %251 : vector<16x128xf32>
    %253 = arith.truncf %252 : vector<16x128xf32> to vector<16x128xbf16>
    %cst_85 = arith.constant dense<0.000000e+00> : vector<16x32xf32>
    %254 = tpu.matmul %253, %26, %cst_85 {dimension_numbers = #tpu.dot_dimension_numbers<[1], [0], [0], [1], [0, 0, 1, 1], [], []>} : vector<16x128xbf16>, vector<128x32xbf16>, vector<16x32xf32> -> vector<16x32xf32>
    %c0_86 = arith.constant 0 : index
    %c0_87 = arith.constant 0 : index
    %c0_88 = arith.constant 0 : index
    %255 = vector.load %arg14[%c0_86, %c0_87, %c0_88] : memref<2x1x32xf32, #tpu.memory_space<vmem>>, vector<1x1x32xf32>
    %256 = vector.shape_cast %255 : vector<1x1x32xf32> to vector<1x32xf32>
    %257 = vector.broadcast %256 : vector<1x32xf32> to vector<16x32xf32>
    %258 = arith.addf %254, %257 : vector<16x32xf32>
    %259 = arith.addf %244, %258 : vector<16x32xf32>
    %c0_89 = arith.constant 0 : index
    %c0_90 = arith.constant 0 : index
    %c0_91 = arith.constant 0 : index
    %260 = vector.load %arg15[%c0_89, %c0_90, %c0_91] : memref<2x1x32xf32, #tpu.memory_space<vmem>>, vector<1x1x32xf32>
    %261 = vector.shape_cast %260 : vector<1x1x32xf32> to vector<1x32xf32>
    %c0_92 = arith.constant 0 : index
    %c0_93 = arith.constant 0 : index
    %c0_94 = arith.constant 0 : index
    %262 = vector.load %arg16[%c0_92, %c0_93, %c0_94] : memref<2x1x32xf32, #tpu.memory_space<vmem>>, vector<1x1x32xf32>
    %263 = vector.shape_cast %262 : vector<1x1x32xf32> to vector<1x32xf32>
    %cst_95 = arith.constant dense<0.000000e+00> : vector<16xf32>
    %264 = vector.multi_reduction <add>, %259, %cst_95 [1] : vector<16x32xf32> to vector<16xf32>
    %265 = vector.shape_cast %264 : vector<16xf32> to vector<16x1xf32>
    %cst_96 = arith.constant 3.200000e+01 : f32
    %266 = vector.broadcast %cst_96 : f32 to vector<16x1xf32>
    %267 = arith.divf %265, %266 : vector<16x1xf32>
    %268 = vector.broadcast %267 : vector<16x1xf32> to vector<16x32xf32>
    %269 = arith.subf %259, %268 : vector<16x32xf32>
    %270 = arith.mulf %269, %269 : vector<16x32xf32>
    %cst_97 = arith.constant dense<0.000000e+00> : vector<16xf32>
    %271 = vector.multi_reduction <add>, %270, %cst_97 [1] : vector<16x32xf32> to vector<16xf32>
    %272 = vector.shape_cast %271 : vector<16xf32> to vector<16x1xf32>
    %cst_98 = arith.constant 3.200000e+01 : f32
    %273 = vector.broadcast %cst_98 : f32 to vector<16x1xf32>
    %274 = arith.divf %272, %273 : vector<16x1xf32>
    %cst_99 = arith.constant 9.99999974E-6 : f32
    %275 = vector.broadcast %cst_99 : f32 to vector<16x1xf32>
    %276 = arith.addf %274, %275 : vector<16x1xf32>
    %277 = math.rsqrt %276 : vector<16x1xf32>
    %278 = vector.broadcast %277 : vector<16x1xf32> to vector<16x32xf32>
    %279 = arith.mulf %269, %278 : vector<16x32xf32>
    %280 = vector.broadcast %261 : vector<1x32xf32> to vector<16x32xf32>
    %281 = arith.mulf %279, %280 : vector<16x32xf32>
    %282 = vector.broadcast %263 : vector<1x32xf32> to vector<16x32xf32>
    %283 = arith.addf %281, %282 : vector<16x32xf32>
    %c1 = arith.constant 1 : index
    %c0_100 = arith.constant 0 : index
    %c0_101 = arith.constant 0 : index
    %284 = vector.load %arg5[%c1, %c0_100, %c0_101] : memref<2x32x96xbf16, #tpu.memory_space<vmem>>, vector<1x32x96xbf16>
    %285 = vector.shape_cast %284 : vector<1x32x96xbf16> to vector<32x96xbf16>
    %c1_102 = arith.constant 1 : index
    %c0_103 = arith.constant 0 : index
    %c0_104 = arith.constant 0 : index
    %286 = vector.load %arg7[%c1_102, %c0_103, %c0_104] : memref<2x32x32xbf16, #tpu.memory_space<vmem>>, vector<1x32x32xbf16>
    %287 = vector.shape_cast %286 : vector<1x32x32xbf16> to vector<32x32xbf16>
    %c1_105 = arith.constant 1 : index
    %c0_106 = arith.constant 0 : index
    %c0_107 = arith.constant 0 : index
    %288 = vector.load %arg11[%c1_105, %c0_106, %c0_107] : memref<2x32x128xbf16, #tpu.memory_space<vmem>>, vector<1x32x128xbf16>
    %289 = vector.shape_cast %288 : vector<1x32x128xbf16> to vector<32x128xbf16>
    %c1_108 = arith.constant 1 : index
    %c0_109 = arith.constant 0 : index
    %c0_110 = arith.constant 0 : index
    %290 = vector.load %arg13[%c1_108, %c0_109, %c0_110] : memref<2x128x32xbf16, #tpu.memory_space<vmem>>, vector<1x128x32xbf16>
    %291 = vector.shape_cast %290 : vector<1x128x32xbf16> to vector<128x32xbf16>
    %292 = arith.truncf %283 : vector<16x32xf32> to vector<16x32xbf16>
    %cst_111 = arith.constant dense<0.000000e+00> : vector<16x96xf32>
    %293 = tpu.matmul %292, %285, %cst_111 {dimension_numbers = #tpu.dot_dimension_numbers<[1], [0], [0], [1], [0, 0, 1, 1], [], []>} : vector<16x32xbf16>, vector<32x96xbf16>, vector<16x96xf32> -> vector<16x96xf32>
    %c1_112 = arith.constant 1 : index
    %c0_113 = arith.constant 0 : index
    %c0_114 = arith.constant 0 : index
    %294 = vector.load %arg6[%c1_112, %c0_113, %c0_114] : memref<2x1x96xf32, #tpu.memory_space<vmem>>, vector<1x1x96xf32>
    %295 = vector.shape_cast %294 : vector<1x1x96xf32> to vector<1x96xf32>
    %296 = vector.broadcast %295 : vector<1x96xf32> to vector<16x96xf32>
    %297 = arith.addf %293, %296 : vector<16x96xf32>
    %298 = vector.extract_strided_slice %297 {offsets = [0, 0], sizes = [8, 96], strides = [1, 1]} : vector<16x96xf32> to vector<8x96xf32>
    %299 = vector.extract_strided_slice %298 {offsets = [0, 0], sizes = [8, 8], strides = [1, 1]} : vector<8x96xf32> to vector<8x8xf32>
    %300 = arith.truncf %299 : vector<8x8xf32> to vector<8x8xbf16>
    %301 = vector.extract_strided_slice %298 {offsets = [0, 32], sizes = [8, 8], strides = [1, 1]} : vector<8x96xf32> to vector<8x8xf32>
    %302 = arith.truncf %301 : vector<8x8xf32> to vector<8x8xbf16>
    %303 = vector.extract_strided_slice %298 {offsets = [0, 64], sizes = [8, 8], strides = [1, 1]} : vector<8x96xf32> to vector<8x8xf32>
    %304 = arith.truncf %303 : vector<8x8xf32> to vector<8x8xbf16>
    %cst_115 = arith.constant dense<0.000000e+00> : vector<8x8xf32>
    %305 = tpu.matmul %300, %302, %cst_115 {dimension_numbers = #tpu.dot_dimension_numbers<[1], [1], [0], [0], [0, 0, 1, 0], [], []>} : vector<8x8xbf16>, vector<8x8xbf16>, vector<8x8xf32> -> vector<8x8xf32>
    %cst_116 = arith.constant 0.353553385 : f32
    %306 = vector.broadcast %cst_116 : f32 to vector<8x8xf32>
    %307 = arith.mulf %305, %306 : vector<8x8xf32>
    %308 = arith.addf %307, %7 : vector<8x8xf32>
    %cst_117 = arith.constant dense<0xFF800000> : vector<8xf32>
    %309 = vector.multi_reduction <maximumf>, %308, %cst_117 [1] : vector<8x8xf32> to vector<8xf32>
    %310 = vector.shape_cast %309 : vector<8xf32> to vector<8x1xf32>
    %311 = vector.broadcast %310 : vector<8x1xf32> to vector<8x8xf32>
    %312 = arith.subf %308, %311 : vector<8x8xf32>
    %313 = math.exp %312 : vector<8x8xf32>
    %cst_118 = arith.constant dense<0.000000e+00> : vector<8xf32>
    %314 = vector.multi_reduction <add>, %313, %cst_118 [1] : vector<8x8xf32> to vector<8xf32>
    %315 = vector.shape_cast %314 : vector<8xf32> to vector<8x1xf32>
    %316 = tpu.reciprocal %315 {approx = true} : vector<8x1xf32> -> vector<8x1xf32>
    %317 = vector.broadcast %316 : vector<8x1xf32> to vector<8x8xf32>
    %318 = arith.mulf %313, %317 : vector<8x8xf32>
    %319 = arith.truncf %318 : vector<8x8xf32> to vector<8x8xbf16>
    %cst_119 = arith.constant dense<0.000000e+00> : vector<8x8xf32>
    %320 = tpu.matmul %319, %304, %cst_119 {dimension_numbers = #tpu.dot_dimension_numbers<[1], [0], [0], [1], [0, 0, 1, 1], [], []>} : vector<8x8xbf16>, vector<8x8xbf16>, vector<8x8xf32> -> vector<8x8xf32>
    %321 = vector.extract_strided_slice %298 {offsets = [0, 8], sizes = [8, 8], strides = [1, 1]} : vector<8x96xf32> to vector<8x8xf32>
    %322 = arith.truncf %321 : vector<8x8xf32> to vector<8x8xbf16>
    %323 = vector.extract_strided_slice %298 {offsets = [0, 40], sizes = [8, 8], strides = [1, 1]} : vector<8x96xf32> to vector<8x8xf32>
    %324 = arith.truncf %323 : vector<8x8xf32> to vector<8x8xbf16>
    %325 = vector.extract_strided_slice %298 {offsets = [0, 72], sizes = [8, 8], strides = [1, 1]} : vector<8x96xf32> to vector<8x8xf32>
    %326 = arith.truncf %325 : vector<8x8xf32> to vector<8x8xbf16>
    %cst_120 = arith.constant dense<0.000000e+00> : vector<8x8xf32>
    %327 = tpu.matmul %322, %324, %cst_120 {dimension_numbers = #tpu.dot_dimension_numbers<[1], [1], [0], [0], [0, 0, 1, 0], [], []>} : vector<8x8xbf16>, vector<8x8xbf16>, vector<8x8xf32> -> vector<8x8xf32>
    %cst_121 = arith.constant 0.353553385 : f32
    %328 = vector.broadcast %cst_121 : f32 to vector<8x8xf32>
    %329 = arith.mulf %327, %328 : vector<8x8xf32>
    %330 = arith.addf %329, %7 : vector<8x8xf32>
    %cst_122 = arith.constant dense<0xFF800000> : vector<8xf32>
    %331 = vector.multi_reduction <maximumf>, %330, %cst_122 [1] : vector<8x8xf32> to vector<8xf32>
    %332 = vector.shape_cast %331 : vector<8xf32> to vector<8x1xf32>
    %333 = vector.broadcast %332 : vector<8x1xf32> to vector<8x8xf32>
    %334 = arith.subf %330, %333 : vector<8x8xf32>
    %335 = math.exp %334 : vector<8x8xf32>
    %cst_123 = arith.constant dense<0.000000e+00> : vector<8xf32>
    %336 = vector.multi_reduction <add>, %335, %cst_123 [1] : vector<8x8xf32> to vector<8xf32>
    %337 = vector.shape_cast %336 : vector<8xf32> to vector<8x1xf32>
    %338 = tpu.reciprocal %337 {approx = true} : vector<8x1xf32> -> vector<8x1xf32>
    %339 = vector.broadcast %338 : vector<8x1xf32> to vector<8x8xf32>
    %340 = arith.mulf %335, %339 : vector<8x8xf32>
    %341 = arith.truncf %340 : vector<8x8xf32> to vector<8x8xbf16>
    %cst_124 = arith.constant dense<0.000000e+00> : vector<8x8xf32>
    %342 = tpu.matmul %341, %326, %cst_124 {dimension_numbers = #tpu.dot_dimension_numbers<[1], [0], [0], [1], [0, 0, 1, 1], [], []>} : vector<8x8xbf16>, vector<8x8xbf16>, vector<8x8xf32> -> vector<8x8xf32>
    %343 = vector.extract_strided_slice %298 {offsets = [0, 16], sizes = [8, 8], strides = [1, 1]} : vector<8x96xf32> to vector<8x8xf32>
    %344 = arith.truncf %343 : vector<8x8xf32> to vector<8x8xbf16>
    %345 = vector.extract_strided_slice %298 {offsets = [0, 48], sizes = [8, 8], strides = [1, 1]} : vector<8x96xf32> to vector<8x8xf32>
    %346 = arith.truncf %345 : vector<8x8xf32> to vector<8x8xbf16>
    %347 = vector.extract_strided_slice %298 {offsets = [0, 80], sizes = [8, 8], strides = [1, 1]} : vector<8x96xf32> to vector<8x8xf32>
    %348 = arith.truncf %347 : vector<8x8xf32> to vector<8x8xbf16>
    %cst_125 = arith.constant dense<0.000000e+00> : vector<8x8xf32>
    %349 = tpu.matmul %344, %346, %cst_125 {dimension_numbers = #tpu.dot_dimension_numbers<[1], [1], [0], [0], [0, 0, 1, 0], [], []>} : vector<8x8xbf16>, vector<8x8xbf16>, vector<8x8xf32> -> vector<8x8xf32>
    %cst_126 = arith.constant 0.353553385 : f32
    %350 = vector.broadcast %cst_126 : f32 to vector<8x8xf32>
    %351 = arith.mulf %349, %350 : vector<8x8xf32>
    %352 = arith.addf %351, %7 : vector<8x8xf32>
    %cst_127 = arith.constant dense<0xFF800000> : vector<8xf32>
    %353 = vector.multi_reduction <maximumf>, %352, %cst_127 [1] : vector<8x8xf32> to vector<8xf32>
    %354 = vector.shape_cast %353 : vector<8xf32> to vector<8x1xf32>
    %355 = vector.broadcast %354 : vector<8x1xf32> to vector<8x8xf32>
    %356 = arith.subf %352, %355 : vector<8x8xf32>
    %357 = math.exp %356 : vector<8x8xf32>
    %cst_128 = arith.constant dense<0.000000e+00> : vector<8xf32>
    %358 = vector.multi_reduction <add>, %357, %cst_128 [1] : vector<8x8xf32> to vector<8xf32>
    %359 = vector.shape_cast %358 : vector<8xf32> to vector<8x1xf32>
    %360 = tpu.reciprocal %359 {approx = true} : vector<8x1xf32> -> vector<8x1xf32>
    %361 = vector.broadcast %360 : vector<8x1xf32> to vector<8x8xf32>
    %362 = arith.mulf %357, %361 : vector<8x8xf32>
    %363 = arith.truncf %362 : vector<8x8xf32> to vector<8x8xbf16>
    %cst_129 = arith.constant dense<0.000000e+00> : vector<8x8xf32>
    %364 = tpu.matmul %363, %348, %cst_129 {dimension_numbers = #tpu.dot_dimension_numbers<[1], [0], [0], [1], [0, 0, 1, 1], [], []>} : vector<8x8xbf16>, vector<8x8xbf16>, vector<8x8xf32> -> vector<8x8xf32>
    %365 = vector.extract_strided_slice %298 {offsets = [0, 24], sizes = [8, 8], strides = [1, 1]} : vector<8x96xf32> to vector<8x8xf32>
    %366 = arith.truncf %365 : vector<8x8xf32> to vector<8x8xbf16>
    %367 = vector.extract_strided_slice %298 {offsets = [0, 56], sizes = [8, 8], strides = [1, 1]} : vector<8x96xf32> to vector<8x8xf32>
    %368 = arith.truncf %367 : vector<8x8xf32> to vector<8x8xbf16>
    %369 = vector.extract_strided_slice %298 {offsets = [0, 88], sizes = [8, 8], strides = [1, 1]} : vector<8x96xf32> to vector<8x8xf32>
    %370 = arith.truncf %369 : vector<8x8xf32> to vector<8x8xbf16>
    %cst_130 = arith.constant dense<0.000000e+00> : vector<8x8xf32>
    %371 = tpu.matmul %366, %368, %cst_130 {dimension_numbers = #tpu.dot_dimension_numbers<[1], [1], [0], [0], [0, 0, 1, 0], [], []>} : vector<8x8xbf16>, vector<8x8xbf16>, vector<8x8xf32> -> vector<8x8xf32>
    %cst_131 = arith.constant 0.353553385 : f32
    %372 = vector.broadcast %cst_131 : f32 to vector<8x8xf32>
    %373 = arith.mulf %371, %372 : vector<8x8xf32>
    %374 = arith.addf %373, %7 : vector<8x8xf32>
    %cst_132 = arith.constant dense<0xFF800000> : vector<8xf32>
    %375 = vector.multi_reduction <maximumf>, %374, %cst_132 [1] : vector<8x8xf32> to vector<8xf32>
    %376 = vector.shape_cast %375 : vector<8xf32> to vector<8x1xf32>
    %377 = vector.broadcast %376 : vector<8x1xf32> to vector<8x8xf32>
    %378 = arith.subf %374, %377 : vector<8x8xf32>
    %379 = math.exp %378 : vector<8x8xf32>
    %cst_133 = arith.constant dense<0.000000e+00> : vector<8xf32>
    %380 = vector.multi_reduction <add>, %379, %cst_133 [1] : vector<8x8xf32> to vector<8xf32>
    %381 = vector.shape_cast %380 : vector<8xf32> to vector<8x1xf32>
    %382 = tpu.reciprocal %381 {approx = true} : vector<8x1xf32> -> vector<8x1xf32>
    %383 = vector.broadcast %382 : vector<8x1xf32> to vector<8x8xf32>
    %384 = arith.mulf %379, %383 : vector<8x8xf32>
    %385 = arith.truncf %384 : vector<8x8xf32> to vector<8x8xbf16>
    %cst_134 = arith.constant dense<0.000000e+00> : vector<8x8xf32>
    %386 = tpu.matmul %385, %370, %cst_134 {dimension_numbers = #tpu.dot_dimension_numbers<[1], [0], [0], [1], [0, 0, 1, 1], [], []>} : vector<8x8xbf16>, vector<8x8xbf16>, vector<8x8xf32> -> vector<8x8xf32>
    %387 = tpu.concatenate %320, %342, %364, %386 in 1 : vector<8x8xf32>, vector<8x8xf32>, vector<8x8xf32>, vector<8x8xf32> -> vector<8x32xf32>
    %388 = vector.extract_strided_slice %297 {offsets = [8, 0], sizes = [8, 96], strides = [1, 1]} : vector<16x96xf32> to vector<8x96xf32>
    %389 = vector.extract_strided_slice %388 {offsets = [0, 0], sizes = [8, 8], strides = [1, 1]} : vector<8x96xf32> to vector<8x8xf32>
    %390 = arith.truncf %389 : vector<8x8xf32> to vector<8x8xbf16>
    %391 = vector.extract_strided_slice %388 {offsets = [0, 32], sizes = [8, 8], strides = [1, 1]} : vector<8x96xf32> to vector<8x8xf32>
    %392 = arith.truncf %391 : vector<8x8xf32> to vector<8x8xbf16>
    %393 = vector.extract_strided_slice %388 {offsets = [0, 64], sizes = [8, 8], strides = [1, 1]} : vector<8x96xf32> to vector<8x8xf32>
    %394 = arith.truncf %393 : vector<8x8xf32> to vector<8x8xbf16>
    %cst_135 = arith.constant dense<0.000000e+00> : vector<8x8xf32>
    %395 = tpu.matmul %390, %392, %cst_135 {dimension_numbers = #tpu.dot_dimension_numbers<[1], [1], [0], [0], [0, 0, 1, 0], [], []>} : vector<8x8xbf16>, vector<8x8xbf16>, vector<8x8xf32> -> vector<8x8xf32>
    %cst_136 = arith.constant 0.353553385 : f32
    %396 = vector.broadcast %cst_136 : f32 to vector<8x8xf32>
    %397 = arith.mulf %395, %396 : vector<8x8xf32>
    %398 = arith.addf %397, %10 : vector<8x8xf32>
    %cst_137 = arith.constant dense<0xFF800000> : vector<8xf32>
    %399 = vector.multi_reduction <maximumf>, %398, %cst_137 [1] : vector<8x8xf32> to vector<8xf32>
    %400 = vector.shape_cast %399 : vector<8xf32> to vector<8x1xf32>
    %401 = vector.broadcast %400 : vector<8x1xf32> to vector<8x8xf32>
    %402 = arith.subf %398, %401 : vector<8x8xf32>
    %403 = math.exp %402 : vector<8x8xf32>
    %cst_138 = arith.constant dense<0.000000e+00> : vector<8xf32>
    %404 = vector.multi_reduction <add>, %403, %cst_138 [1] : vector<8x8xf32> to vector<8xf32>
    %405 = vector.shape_cast %404 : vector<8xf32> to vector<8x1xf32>
    %406 = tpu.reciprocal %405 {approx = true} : vector<8x1xf32> -> vector<8x1xf32>
    %407 = vector.broadcast %406 : vector<8x1xf32> to vector<8x8xf32>
    %408 = arith.mulf %403, %407 : vector<8x8xf32>
    %409 = arith.truncf %408 : vector<8x8xf32> to vector<8x8xbf16>
    %cst_139 = arith.constant dense<0.000000e+00> : vector<8x8xf32>
    %410 = tpu.matmul %409, %394, %cst_139 {dimension_numbers = #tpu.dot_dimension_numbers<[1], [0], [0], [1], [0, 0, 1, 1], [], []>} : vector<8x8xbf16>, vector<8x8xbf16>, vector<8x8xf32> -> vector<8x8xf32>
    %411 = vector.extract_strided_slice %388 {offsets = [0, 8], sizes = [8, 8], strides = [1, 1]} : vector<8x96xf32> to vector<8x8xf32>
    %412 = arith.truncf %411 : vector<8x8xf32> to vector<8x8xbf16>
    %413 = vector.extract_strided_slice %388 {offsets = [0, 40], sizes = [8, 8], strides = [1, 1]} : vector<8x96xf32> to vector<8x8xf32>
    %414 = arith.truncf %413 : vector<8x8xf32> to vector<8x8xbf16>
    %415 = vector.extract_strided_slice %388 {offsets = [0, 72], sizes = [8, 8], strides = [1, 1]} : vector<8x96xf32> to vector<8x8xf32>
    %416 = arith.truncf %415 : vector<8x8xf32> to vector<8x8xbf16>
    %cst_140 = arith.constant dense<0.000000e+00> : vector<8x8xf32>
    %417 = tpu.matmul %412, %414, %cst_140 {dimension_numbers = #tpu.dot_dimension_numbers<[1], [1], [0], [0], [0, 0, 1, 0], [], []>} : vector<8x8xbf16>, vector<8x8xbf16>, vector<8x8xf32> -> vector<8x8xf32>
    %cst_141 = arith.constant 0.353553385 : f32
    %418 = vector.broadcast %cst_141 : f32 to vector<8x8xf32>
    %419 = arith.mulf %417, %418 : vector<8x8xf32>
    %420 = arith.addf %419, %10 : vector<8x8xf32>
    %cst_142 = arith.constant dense<0xFF800000> : vector<8xf32>
    %421 = vector.multi_reduction <maximumf>, %420, %cst_142 [1] : vector<8x8xf32> to vector<8xf32>
    %422 = vector.shape_cast %421 : vector<8xf32> to vector<8x1xf32>
    %423 = vector.broadcast %422 : vector<8x1xf32> to vector<8x8xf32>
    %424 = arith.subf %420, %423 : vector<8x8xf32>
    %425 = math.exp %424 : vector<8x8xf32>
    %cst_143 = arith.constant dense<0.000000e+00> : vector<8xf32>
    %426 = vector.multi_reduction <add>, %425, %cst_143 [1] : vector<8x8xf32> to vector<8xf32>
    %427 = vector.shape_cast %426 : vector<8xf32> to vector<8x1xf32>
    %428 = tpu.reciprocal %427 {approx = true} : vector<8x1xf32> -> vector<8x1xf32>
    %429 = vector.broadcast %428 : vector<8x1xf32> to vector<8x8xf32>
    %430 = arith.mulf %425, %429 : vector<8x8xf32>
    %431 = arith.truncf %430 : vector<8x8xf32> to vector<8x8xbf16>
    %cst_144 = arith.constant dense<0.000000e+00> : vector<8x8xf32>
    %432 = tpu.matmul %431, %416, %cst_144 {dimension_numbers = #tpu.dot_dimension_numbers<[1], [0], [0], [1], [0, 0, 1, 1], [], []>} : vector<8x8xbf16>, vector<8x8xbf16>, vector<8x8xf32> -> vector<8x8xf32>
    %433 = vector.extract_strided_slice %388 {offsets = [0, 16], sizes = [8, 8], strides = [1, 1]} : vector<8x96xf32> to vector<8x8xf32>
    %434 = arith.truncf %433 : vector<8x8xf32> to vector<8x8xbf16>
    %435 = vector.extract_strided_slice %388 {offsets = [0, 48], sizes = [8, 8], strides = [1, 1]} : vector<8x96xf32> to vector<8x8xf32>
    %436 = arith.truncf %435 : vector<8x8xf32> to vector<8x8xbf16>
    %437 = vector.extract_strided_slice %388 {offsets = [0, 80], sizes = [8, 8], strides = [1, 1]} : vector<8x96xf32> to vector<8x8xf32>
    %438 = arith.truncf %437 : vector<8x8xf32> to vector<8x8xbf16>
    %cst_145 = arith.constant dense<0.000000e+00> : vector<8x8xf32>
    %439 = tpu.matmul %434, %436, %cst_145 {dimension_numbers = #tpu.dot_dimension_numbers<[1], [1], [0], [0], [0, 0, 1, 0], [], []>} : vector<8x8xbf16>, vector<8x8xbf16>, vector<8x8xf32> -> vector<8x8xf32>
    %cst_146 = arith.constant 0.353553385 : f32
    %440 = vector.broadcast %cst_146 : f32 to vector<8x8xf32>
    %441 = arith.mulf %439, %440 : vector<8x8xf32>
    %442 = arith.addf %441, %10 : vector<8x8xf32>
    %cst_147 = arith.constant dense<0xFF800000> : vector<8xf32>
    %443 = vector.multi_reduction <maximumf>, %442, %cst_147 [1] : vector<8x8xf32> to vector<8xf32>
    %444 = vector.shape_cast %443 : vector<8xf32> to vector<8x1xf32>
    %445 = vector.broadcast %444 : vector<8x1xf32> to vector<8x8xf32>
    %446 = arith.subf %442, %445 : vector<8x8xf32>
    %447 = math.exp %446 : vector<8x8xf32>
    %cst_148 = arith.constant dense<0.000000e+00> : vector<8xf32>
    %448 = vector.multi_reduction <add>, %447, %cst_148 [1] : vector<8x8xf32> to vector<8xf32>
    %449 = vector.shape_cast %448 : vector<8xf32> to vector<8x1xf32>
    %450 = tpu.reciprocal %449 {approx = true} : vector<8x1xf32> -> vector<8x1xf32>
    %451 = vector.broadcast %450 : vector<8x1xf32> to vector<8x8xf32>
    %452 = arith.mulf %447, %451 : vector<8x8xf32>
    %453 = arith.truncf %452 : vector<8x8xf32> to vector<8x8xbf16>
    %cst_149 = arith.constant dense<0.000000e+00> : vector<8x8xf32>
    %454 = tpu.matmul %453, %438, %cst_149 {dimension_numbers = #tpu.dot_dimension_numbers<[1], [0], [0], [1], [0, 0, 1, 1], [], []>} : vector<8x8xbf16>, vector<8x8xbf16>, vector<8x8xf32> -> vector<8x8xf32>
    %455 = vector.extract_strided_slice %388 {offsets = [0, 24], sizes = [8, 8], strides = [1, 1]} : vector<8x96xf32> to vector<8x8xf32>
    %456 = arith.truncf %455 : vector<8x8xf32> to vector<8x8xbf16>
    %457 = vector.extract_strided_slice %388 {offsets = [0, 56], sizes = [8, 8], strides = [1, 1]} : vector<8x96xf32> to vector<8x8xf32>
    %458 = arith.truncf %457 : vector<8x8xf32> to vector<8x8xbf16>
    %459 = vector.extract_strided_slice %388 {offsets = [0, 88], sizes = [8, 8], strides = [1, 1]} : vector<8x96xf32> to vector<8x8xf32>
    %460 = arith.truncf %459 : vector<8x8xf32> to vector<8x8xbf16>
    %cst_150 = arith.constant dense<0.000000e+00> : vector<8x8xf32>
    %461 = tpu.matmul %456, %458, %cst_150 {dimension_numbers = #tpu.dot_dimension_numbers<[1], [1], [0], [0], [0, 0, 1, 0], [], []>} : vector<8x8xbf16>, vector<8x8xbf16>, vector<8x8xf32> -> vector<8x8xf32>
    %cst_151 = arith.constant 0.353553385 : f32
    %462 = vector.broadcast %cst_151 : f32 to vector<8x8xf32>
    %463 = arith.mulf %461, %462 : vector<8x8xf32>
    %464 = arith.addf %463, %10 : vector<8x8xf32>
    %cst_152 = arith.constant dense<0xFF800000> : vector<8xf32>
    %465 = vector.multi_reduction <maximumf>, %464, %cst_152 [1] : vector<8x8xf32> to vector<8xf32>
    %466 = vector.shape_cast %465 : vector<8xf32> to vector<8x1xf32>
    %467 = vector.broadcast %466 : vector<8x1xf32> to vector<8x8xf32>
    %468 = arith.subf %464, %467 : vector<8x8xf32>
    %469 = math.exp %468 : vector<8x8xf32>
    %cst_153 = arith.constant dense<0.000000e+00> : vector<8xf32>
    %470 = vector.multi_reduction <add>, %469, %cst_153 [1] : vector<8x8xf32> to vector<8xf32>
    %471 = vector.shape_cast %470 : vector<8xf32> to vector<8x1xf32>
    %472 = tpu.reciprocal %471 {approx = true} : vector<8x1xf32> -> vector<8x1xf32>
    %473 = vector.broadcast %472 : vector<8x1xf32> to vector<8x8xf32>
    %474 = arith.mulf %469, %473 : vector<8x8xf32>
    %475 = arith.truncf %474 : vector<8x8xf32> to vector<8x8xbf16>
    %cst_154 = arith.constant dense<0.000000e+00> : vector<8x8xf32>
    %476 = tpu.matmul %475, %460, %cst_154 {dimension_numbers = #tpu.dot_dimension_numbers<[1], [0], [0], [1], [0, 0, 1, 1], [], []>} : vector<8x8xbf16>, vector<8x8xbf16>, vector<8x8xf32> -> vector<8x8xf32>
    %477 = tpu.concatenate %410, %432, %454, %476 in 1 : vector<8x8xf32>, vector<8x8xf32>, vector<8x8xf32>, vector<8x8xf32> -> vector<8x32xf32>
    %478 = tpu.concatenate %387, %477 in 0 : vector<8x32xf32>, vector<8x32xf32> -> vector<16x32xf32>
    %479 = arith.truncf %478 : vector<16x32xf32> to vector<16x32xbf16>
    %cst_155 = arith.constant dense<0.000000e+00> : vector<16x32xf32>
    %480 = tpu.matmul %479, %287, %cst_155 {dimension_numbers = #tpu.dot_dimension_numbers<[1], [0], [0], [1], [0, 0, 1, 1], [], []>} : vector<16x32xbf16>, vector<32x32xbf16>, vector<16x32xf32> -> vector<16x32xf32>
    %c1_156 = arith.constant 1 : index
    %c0_157 = arith.constant 0 : index
    %c0_158 = arith.constant 0 : index
    %481 = vector.load %arg8[%c1_156, %c0_157, %c0_158] : memref<2x1x32xf32, #tpu.memory_space<vmem>>, vector<1x1x32xf32>
    %482 = vector.shape_cast %481 : vector<1x1x32xf32> to vector<1x32xf32>
    %483 = vector.broadcast %482 : vector<1x32xf32> to vector<16x32xf32>
    %484 = arith.addf %480, %483 : vector<16x32xf32>
    %485 = arith.addf %283, %484 : vector<16x32xf32>
    %c1_159 = arith.constant 1 : index
    %c0_160 = arith.constant 0 : index
    %c0_161 = arith.constant 0 : index
    %486 = vector.load %arg9[%c1_159, %c0_160, %c0_161] : memref<2x1x32xf32, #tpu.memory_space<vmem>>, vector<1x1x32xf32>
    %487 = vector.shape_cast %486 : vector<1x1x32xf32> to vector<1x32xf32>
    %c1_162 = arith.constant 1 : index
    %c0_163 = arith.constant 0 : index
    %c0_164 = arith.constant 0 : index
    %488 = vector.load %arg10[%c1_162, %c0_163, %c0_164] : memref<2x1x32xf32, #tpu.memory_space<vmem>>, vector<1x1x32xf32>
    %489 = vector.shape_cast %488 : vector<1x1x32xf32> to vector<1x32xf32>
    %cst_165 = arith.constant dense<0.000000e+00> : vector<16xf32>
    %490 = vector.multi_reduction <add>, %485, %cst_165 [1] : vector<16x32xf32> to vector<16xf32>
    %491 = vector.shape_cast %490 : vector<16xf32> to vector<16x1xf32>
    %cst_166 = arith.constant 3.200000e+01 : f32
    %492 = vector.broadcast %cst_166 : f32 to vector<16x1xf32>
    %493 = arith.divf %491, %492 : vector<16x1xf32>
    %494 = vector.broadcast %493 : vector<16x1xf32> to vector<16x32xf32>
    %495 = arith.subf %485, %494 : vector<16x32xf32>
    %496 = arith.mulf %495, %495 : vector<16x32xf32>
    %cst_167 = arith.constant dense<0.000000e+00> : vector<16xf32>
    %497 = vector.multi_reduction <add>, %496, %cst_167 [1] : vector<16x32xf32> to vector<16xf32>
    %498 = vector.shape_cast %497 : vector<16xf32> to vector<16x1xf32>
    %cst_168 = arith.constant 3.200000e+01 : f32
    %499 = vector.broadcast %cst_168 : f32 to vector<16x1xf32>
    %500 = arith.divf %498, %499 : vector<16x1xf32>
    %cst_169 = arith.constant 9.99999974E-6 : f32
    %501 = vector.broadcast %cst_169 : f32 to vector<16x1xf32>
    %502 = arith.addf %500, %501 : vector<16x1xf32>
    %503 = math.rsqrt %502 : vector<16x1xf32>
    %504 = vector.broadcast %503 : vector<16x1xf32> to vector<16x32xf32>
    %505 = arith.mulf %495, %504 : vector<16x32xf32>
    %506 = vector.broadcast %487 : vector<1x32xf32> to vector<16x32xf32>
    %507 = arith.mulf %505, %506 : vector<16x32xf32>
    %508 = vector.broadcast %489 : vector<1x32xf32> to vector<16x32xf32>
    %509 = arith.addf %507, %508 : vector<16x32xf32>
    %510 = arith.truncf %509 : vector<16x32xf32> to vector<16x32xbf16>
    %cst_170 = arith.constant dense<0.000000e+00> : vector<16x128xf32>
    %511 = tpu.matmul %510, %289, %cst_170 {dimension_numbers = #tpu.dot_dimension_numbers<[1], [0], [0], [1], [0, 0, 1, 1], [], []>} : vector<16x32xbf16>, vector<32x128xbf16>, vector<16x128xf32> -> vector<16x128xf32>
    %c1_171 = arith.constant 1 : index
    %c0_172 = arith.constant 0 : index
    %c0_173 = arith.constant 0 : index
    %512 = vector.load %arg12[%c1_171, %c0_172, %c0_173] : memref<2x1x128xf32, #tpu.memory_space<vmem>>, vector<1x1x128xf32>
    %513 = vector.shape_cast %512 : vector<1x1x128xf32> to vector<1x128xf32>
    %514 = vector.broadcast %513 : vector<1x128xf32> to vector<16x128xf32>
    %515 = arith.addf %511, %514 : vector<16x128xf32>
    %cst_174 = arith.constant 0.000000e+00 : f32
    %516 = vector.broadcast %cst_174 : f32 to vector<16x128xf32>
    %517 = arith.maximumf %515, %516 : vector<16x128xf32>
    %518 = arith.truncf %517 : vector<16x128xf32> to vector<16x128xbf16>
    %cst_175 = arith.constant dense<0.000000e+00> : vector<16x32xf32>
    %519 = tpu.matmul %518, %291, %cst_175 {dimension_numbers = #tpu.dot_dimension_numbers<[1], [0], [0], [1], [0, 0, 1, 1], [], []>} : vector<16x128xbf16>, vector<128x32xbf16>, vector<16x32xf32> -> vector<16x32xf32>
    %c1_176 = arith.constant 1 : index
    %c0_177 = arith.constant 0 : index
    %c0_178 = arith.constant 0 : index
    %520 = vector.load %arg14[%c1_176, %c0_177, %c0_178] : memref<2x1x32xf32, #tpu.memory_space<vmem>>, vector<1x1x32xf32>
    %521 = vector.shape_cast %520 : vector<1x1x32xf32> to vector<1x32xf32>
    %522 = vector.broadcast %521 : vector<1x32xf32> to vector<16x32xf32>
    %523 = arith.addf %519, %522 : vector<16x32xf32>
    %524 = arith.addf %509, %523 : vector<16x32xf32>
    %c1_179 = arith.constant 1 : index
    %c0_180 = arith.constant 0 : index
    %c0_181 = arith.constant 0 : index
    %525 = vector.load %arg15[%c1_179, %c0_180, %c0_181] : memref<2x1x32xf32, #tpu.memory_space<vmem>>, vector<1x1x32xf32>
    %526 = vector.shape_cast %525 : vector<1x1x32xf32> to vector<1x32xf32>
    %c1_182 = arith.constant 1 : index
    %c0_183 = arith.constant 0 : index
    %c0_184 = arith.constant 0 : index
    %527 = vector.load %arg16[%c1_182, %c0_183, %c0_184] : memref<2x1x32xf32, #tpu.memory_space<vmem>>, vector<1x1x32xf32>
    %528 = vector.shape_cast %527 : vector<1x1x32xf32> to vector<1x32xf32>
    %cst_185 = arith.constant dense<0.000000e+00> : vector<16xf32>
    %529 = vector.multi_reduction <add>, %524, %cst_185 [1] : vector<16x32xf32> to vector<16xf32>
    %530 = vector.shape_cast %529 : vector<16xf32> to vector<16x1xf32>
    %cst_186 = arith.constant 3.200000e+01 : f32
    %531 = vector.broadcast %cst_186 : f32 to vector<16x1xf32>
    %532 = arith.divf %530, %531 : vector<16x1xf32>
    %533 = vector.broadcast %532 : vector<16x1xf32> to vector<16x32xf32>
    %534 = arith.subf %524, %533 : vector<16x32xf32>
    %535 = arith.mulf %534, %534 : vector<16x32xf32>
    %cst_187 = arith.constant dense<0.000000e+00> : vector<16xf32>
    %536 = vector.multi_reduction <add>, %535, %cst_187 [1] : vector<16x32xf32> to vector<16xf32>
    %537 = vector.shape_cast %536 : vector<16xf32> to vector<16x1xf32>
    %cst_188 = arith.constant 3.200000e+01 : f32
    %538 = vector.broadcast %cst_188 : f32 to vector<16x1xf32>
    %539 = arith.divf %537, %538 : vector<16x1xf32>
    %cst_189 = arith.constant 9.99999974E-6 : f32
    %540 = vector.broadcast %cst_189 : f32 to vector<16x1xf32>
    %541 = arith.addf %539, %540 : vector<16x1xf32>
    %542 = math.rsqrt %541 : vector<16x1xf32>
    %543 = vector.broadcast %542 : vector<16x1xf32> to vector<16x32xf32>
    %544 = arith.mulf %534, %543 : vector<16x32xf32>
    %545 = vector.broadcast %526 : vector<1x32xf32> to vector<16x32xf32>
    %546 = arith.mulf %544, %545 : vector<16x32xf32>
    %547 = vector.broadcast %528 : vector<1x32xf32> to vector<16x32xf32>
    %548 = arith.addf %546, %547 : vector<16x32xf32>
    %549 = vector.extract_strided_slice %548 {offsets = [0, 0], sizes = [8, 32], strides = [1, 1]} : vector<16x32xf32> to vector<8x32xf32>
    %c0_190 = arith.constant 0 : index
    %c0_191 = arith.constant 0 : index
    %550 = vector.load %arg17[%c0_190, %c0_191] : memref<1x32xf32, #tpu.memory_space<vmem>>, vector<1x32xf32>
    %cst_192 = arith.constant dense<0.000000e+00> : vector<1x8xf32>
    %551 = tpu.matmul %550, %549, %cst_192 {dimension_numbers = #tpu.dot_dimension_numbers<[1], [1], [0], [0], [0, 0, 1, 0], [], []>} : vector<1x32xf32>, vector<8x32xf32>, vector<1x8xf32> -> vector<1x8xf32>
    %c0_193 = arith.constant 0 : index
    %c0_194 = arith.constant 0 : index
    %552 = vector.load %arg18[%c0_193, %c0_194] : memref<1x1xf32, #tpu.memory_space<vmem>>, vector<1x1xf32>
    %553 = vector.broadcast %552 : vector<1x1xf32> to vector<1x8xf32>
    %554 = arith.addf %551, %553 : vector<1x8xf32>
    %555 = vector.extract_strided_slice %4 {offsets = [0, 0], sizes = [1, 8], strides = [1, 1]} : vector<2x8xf32> to vector<1x8xf32>
    %556 = arith.addf %554, %555 : vector<1x8xf32>
    %cst_195 = arith.constant dense<0xFF800000> : vector<1xf32>
    %557 = vector.multi_reduction <maximumf>, %556, %cst_195 [1] : vector<1x8xf32> to vector<1xf32>
    %558 = vector.shape_cast %557 : vector<1xf32> to vector<1x1xf32>
    %559 = vector.broadcast %558 : vector<1x1xf32> to vector<1x8xf32>
    %560 = arith.subf %556, %559 : vector<1x8xf32>
    %561 = math.exp %560 : vector<1x8xf32>
    %cst_196 = arith.constant dense<0.000000e+00> : vector<1xf32>
    %562 = vector.multi_reduction <add>, %561, %cst_196 [1] : vector<1x8xf32> to vector<1xf32>
    %563 = vector.shape_cast %562 : vector<1xf32> to vector<1x1xf32>
    %564 = tpu.reciprocal %563 {approx = true} : vector<1x1xf32> -> vector<1x1xf32>
    %565 = vector.broadcast %564 : vector<1x1xf32> to vector<1x8xf32>
    %566 = arith.mulf %561, %565 : vector<1x8xf32>
    %cst_197 = arith.constant dense<0.000000e+00> : vector<1x32xf32>
    %567 = tpu.matmul %566, %549, %cst_197 {dimension_numbers = #tpu.dot_dimension_numbers<[1], [0], [0], [1], [0, 0, 1, 1], [], []>} : vector<1x8xf32>, vector<8x32xf32>, vector<1x32xf32> -> vector<1x32xf32>
    %568 = vector.extract_strided_slice %548 {offsets = [8, 0], sizes = [8, 32], strides = [1, 1]} : vector<16x32xf32> to vector<8x32xf32>
    %c0_198 = arith.constant 0 : index
    %c0_199 = arith.constant 0 : index
    %569 = vector.load %arg17[%c0_198, %c0_199] : memref<1x32xf32, #tpu.memory_space<vmem>>, vector<1x32xf32>
    %cst_200 = arith.constant dense<0.000000e+00> : vector<1x8xf32>
    %570 = tpu.matmul %569, %568, %cst_200 {dimension_numbers = #tpu.dot_dimension_numbers<[1], [1], [0], [0], [0, 0, 1, 0], [], []>} : vector<1x32xf32>, vector<8x32xf32>, vector<1x8xf32> -> vector<1x8xf32>
    %c0_201 = arith.constant 0 : index
    %c0_202 = arith.constant 0 : index
    %571 = vector.load %arg18[%c0_201, %c0_202] : memref<1x1xf32, #tpu.memory_space<vmem>>, vector<1x1xf32>
    %572 = vector.broadcast %571 : vector<1x1xf32> to vector<1x8xf32>
    %573 = arith.addf %570, %572 : vector<1x8xf32>
    %574 = vector.extract_strided_slice %4 {offsets = [1, 0], sizes = [1, 8], strides = [1, 1]} : vector<2x8xf32> to vector<1x8xf32>
    %575 = arith.addf %573, %574 : vector<1x8xf32>
    %cst_203 = arith.constant dense<0xFF800000> : vector<1xf32>
    %576 = vector.multi_reduction <maximumf>, %575, %cst_203 [1] : vector<1x8xf32> to vector<1xf32>
    %577 = vector.shape_cast %576 : vector<1xf32> to vector<1x1xf32>
    %578 = vector.broadcast %577 : vector<1x1xf32> to vector<1x8xf32>
    %579 = arith.subf %575, %578 : vector<1x8xf32>
    %580 = math.exp %579 : vector<1x8xf32>
    %cst_204 = arith.constant dense<0.000000e+00> : vector<1xf32>
    %581 = vector.multi_reduction <add>, %580, %cst_204 [1] : vector<1x8xf32> to vector<1xf32>
    %582 = vector.shape_cast %581 : vector<1xf32> to vector<1x1xf32>
    %583 = tpu.reciprocal %582 {approx = true} : vector<1x1xf32> -> vector<1x1xf32>
    %584 = vector.broadcast %583 : vector<1x1xf32> to vector<1x8xf32>
    %585 = arith.mulf %580, %584 : vector<1x8xf32>
    %cst_205 = arith.constant dense<0.000000e+00> : vector<1x32xf32>
    %586 = tpu.matmul %585, %568, %cst_205 {dimension_numbers = #tpu.dot_dimension_numbers<[1], [0], [0], [1], [0, 0, 1, 1], [], []>} : vector<1x8xf32>, vector<8x32xf32>, vector<1x32xf32> -> vector<1x32xf32>
    %587 = tpu.concatenate %567, %586 in 0 : vector<1x32xf32>, vector<1x32xf32> -> vector<2x32xf32>
    %c0_206 = arith.constant 0 : index
    %c0_207 = arith.constant 0 : index
    %588 = vector.load %arg19[%c0_206, %c0_207] : memref<32x11xf32, #tpu.memory_space<vmem>>, vector<32x11xf32>
    %cst_208 = arith.constant dense<0.000000e+00> : vector<2x11xf32>
    %589 = tpu.matmul %587, %588, %cst_208 {dimension_numbers = #tpu.dot_dimension_numbers<[1], [0], [0], [1], [0, 0, 1, 1], [], []>} : vector<2x32xf32>, vector<32x11xf32>, vector<2x11xf32> -> vector<2x11xf32>
    %c0_209 = arith.constant 0 : index
    %c0_210 = arith.constant 0 : index
    %590 = vector.load %arg20[%c0_209, %c0_210] : memref<1x11xf32, #tpu.memory_space<vmem>>, vector<1x11xf32>
    %591 = vector.broadcast %590 : vector<1x11xf32> to vector<2x11xf32>
    %592 = arith.addf %589, %591 : vector<2x11xf32>
    %c0_211 = arith.constant 0 : index
    %c0_212 = arith.constant 0 : index
    %593 = vector.load %arg21[%c0_211, %c0_212] : memref<2x11xf32, #tpu.memory_space<vmem>>, vector<2x11xf32>
    tpu.vector_store %arg21[%c0_211, %c0_212], %592 {strides = array<i32>} : memref<2x11xf32, #tpu.memory_space<vmem>>, vector<2x11xf32>,
    return
  }
  func.func @transform_0(%arg0: i32) -> (i32, i32, i32) {
    %c0_i32 = arith.constant 0 : i32
    %c0_i32_0 = arith.constant 0 : i32
    %c0_i32_1 = arith.constant 0 : i32
    return %arg0, %c0_i32, %c0_i32_0 : i32, i32, i32
  }
  func.func @transform_1(%arg0: i32) -> (i32, i32) {
    %c0_i32 = arith.constant 0 : i32
    %c0_i32_0 = arith.constant 0 : i32
    return %arg0, %c0_i32 : i32, i32
  }
  func.func @transform_2(%arg0: i32) -> (i32, i32) {
    %c0_i32 = arith.constant 0 : i32
    %c0_i32_0 = arith.constant 0 : i32
    %c0_i32_1 = arith.constant 0 : i32
    return %c0_i32, %c0_i32_0 : i32, i32
  }
  func.func @transform_3(%arg0: i32) -> (i32, i32) {
    %c0_i32 = arith.constant 0 : i32
    %c0_i32_0 = arith.constant 0 : i32
    %c0_i32_1 = arith.constant 0 : i32
    return %c0_i32, %c0_i32_0 : i32, i32
  }
  func.func @transform_4(%arg0: i32) -> (i32, i32, i32) {
    %c0_i32 = arith.constant 0 : i32
    %c0_i32_0 = arith.constant 0 : i32
    %c0_i32_1 = arith.constant 0 : i32
    %c0_i32_2 = arith.constant 0 : i32
    return %c0_i32, %c0_i32_0, %c0_i32_1 : i32, i32, i32
  }
  func.func @transform_5(%arg0: i32) -> (i32, i32, i32) {
    %c0_i32 = arith.constant 0 : i32
    %c0_i32_0 = arith.constant 0 : i32
    %c0_i32_1 = arith.constant 0 : i32
    %c0_i32_2 = arith.constant 0 : i32
    return %c0_i32, %c0_i32_0, %c0_i32_1 : i32, i32, i32
  }
  func.func @transform_6(%arg0: i32) -> (i32, i32, i32) {
    %c0_i32 = arith.constant 0 : i32
    %c0_i32_0 = arith.constant 0 : i32
    %c0_i32_1 = arith.constant 0 : i32
    %c0_i32_2 = arith.constant 0 : i32
    return %c0_i32, %c0_i32_0, %c0_i32_1 : i32, i32, i32
  }
  func.func @transform_7(%arg0: i32) -> (i32, i32, i32) {
    %c0_i32 = arith.constant 0 : i32
    %c0_i32_0 = arith.constant 0 : i32
    %c0_i32_1 = arith.constant 0 : i32
    %c0_i32_2 = arith.constant 0 : i32
    return %c0_i32, %c0_i32_0, %c0_i32_1 : i32, i32, i32
  }
  func.func @transform_8(%arg0: i32) -> (i32, i32, i32) {
    %c0_i32 = arith.constant 0 : i32
    %c0_i32_0 = arith.constant 0 : i32
    %c0_i32_1 = arith.constant 0 : i32
    %c0_i32_2 = arith.constant 0 : i32
    return %c0_i32, %c0_i32_0, %c0_i32_1 : i32, i32, i32
  }
  func.func @transform_9(%arg0: i32) -> (i32, i32, i32) {
    %c0_i32 = arith.constant 0 : i32
    %c0_i32_0 = arith.constant 0 : i32
    %c0_i32_1 = arith.constant 0 : i32
    %c0_i32_2 = arith.constant 0 : i32
    return %c0_i32, %c0_i32_0, %c0_i32_1 : i32, i32, i32
  }
  func.func @transform_10(%arg0: i32) -> (i32, i32, i32) {
    %c0_i32 = arith.constant 0 : i32
    %c0_i32_0 = arith.constant 0 : i32
    %c0_i32_1 = arith.constant 0 : i32
    %c0_i32_2 = arith.constant 0 : i32
    return %c0_i32, %c0_i32_0, %c0_i32_1 : i32, i32, i32
  }
  func.func @transform_11(%arg0: i32) -> (i32, i32, i32) {
    %c0_i32 = arith.constant 0 : i32
    %c0_i32_0 = arith.constant 0 : i32
    %c0_i32_1 = arith.constant 0 : i32
    %c0_i32_2 = arith.constant 0 : i32
    return %c0_i32, %c0_i32_0, %c0_i32_1 : i32, i32, i32
  }
  func.func @transform_12(%arg0: i32) -> (i32, i32, i32) {
    %c0_i32 = arith.constant 0 : i32
    %c0_i32_0 = arith.constant 0 : i32
    %c0_i32_1 = arith.constant 0 : i32
    %c0_i32_2 = arith.constant 0 : i32
    return %c0_i32, %c0_i32_0, %c0_i32_1 : i32, i32, i32
  }
  func.func @transform_13(%arg0: i32) -> (i32, i32, i32) {
    %c0_i32 = arith.constant 0 : i32
    %c0_i32_0 = arith.constant 0 : i32
    %c0_i32_1 = arith.constant 0 : i32
    %c0_i32_2 = arith.constant 0 : i32
    return %c0_i32, %c0_i32_0, %c0_i32_1 : i32, i32, i32
  }
  func.func @transform_14(%arg0: i32) -> (i32, i32, i32) {
    %c0_i32 = arith.constant 0 : i32
    %c0_i32_0 = arith.constant 0 : i32
    %c0_i32_1 = arith.constant 0 : i32
    %c0_i32_2 = arith.constant 0 : i32
    return %c0_i32, %c0_i32_0, %c0_i32_1 : i32, i32, i32
  }
  func.func @transform_15(%arg0: i32) -> (i32, i32, i32) {
    %c0_i32 = arith.constant 0 : i32
    %c0_i32_0 = arith.constant 0 : i32
    %c0_i32_1 = arith.constant 0 : i32
    %c0_i32_2 = arith.constant 0 : i32
    return %c0_i32, %c0_i32_0, %c0_i32_1 : i32, i32, i32
  }
  func.func @transform_16(%arg0: i32) -> (i32, i32) {
    %c0_i32 = arith.constant 0 : i32
    %c0_i32_0 = arith.constant 0 : i32
    %c0_i32_1 = arith.constant 0 : i32
    return %c0_i32, %c0_i32_0 : i32, i32
  }
  func.func @transform_17(%arg0: i32) -> (i32, i32) {
    %c0_i32 = arith.constant 0 : i32
    %c0_i32_0 = arith.constant 0 : i32
    %c0_i32_1 = arith.constant 0 : i32
    return %c0_i32, %c0_i32_0 : i32, i32
  }
  func.func @transform_18(%arg0: i32) -> (i32, i32) {
    %c0_i32 = arith.constant 0 : i32
    %c0_i32_0 = arith.constant 0 : i32
    %c0_i32_1 = arith.constant 0 : i32
    return %c0_i32, %c0_i32_0 : i32, i32
  }
  func.func @transform_19(%arg0: i32) -> (i32, i32) {
    %c0_i32 = arith.constant 0 : i32
    %c0_i32_0 = arith.constant 0 : i32
    %c0_i32_1 = arith.constant 0 : i32
    return %c0_i32, %c0_i32_0 : i32, i32
  }
  func.func @transform_20(%arg0: i32) -> (i32, i32) {
    %c0_i32 = arith.constant 0 : i32
    %c0_i32_0 = arith.constant 0 : i32
    return %arg0, %c0_i32 : i32, i32
  }
}

</mosaic_0001>

<bundles_post_ra>
// kernel: tpu_custom_call.1
= control target key start
LH: loop header
LB: loop body
LE: loop exit
PB: predicated region body
PF: predicated region fallthrough
CT: control target
= control target key end

     0   :  { %s2972_s0 = inlined_call_operand.vmem [shape: f32[2,8,1], index: 0, kind: input, shape index: {}]   ;;  %s2973_s1 = inlined_call_operand.vmem [shape: f32[2,8], index: 1, kind: input, shape index: {}]   ;;  %s2974_s2 = inlined_call_operand.vmem [shape: f32[16,32], index: 2, kind: input, shape index: {}]   ;;  %s2975_s3 = inlined_call_operand.vmem [shape: f32[1,32], index: 3, kind: input, shape index: {}]   ;;  %s2976_s4 = inlined_call_operand.vmem [shape: bf16[2,32,96], index: 4, kind: input, shape index: {}]   ;;  %s2977_s5 = inlined_call_operand.vmem [shape: f32[2,1,96], index: 5, kind: input, shape index: {}]   ;;  %s2978_s6 = inlined_call_operand.vmem [shape: bf16[2,32,32], index: 6, kind: input, shape index: {}]   ;;  %s2979_s7 = inlined_call_operand.vmem [shape: f32[2,1,32], index: 7, kind: input, shape index: {}]   ;;  %s2980_s8 = inlined_call_operand.vmem [shape: f32[2,1,32], index: 8, kind: input, shape index: {}]   ;;  %s2981_s9 = inlined_call_operand.vmem [shape: f32[2,1,32], index: 9, kind: input, shape index: {}]   ;;  %s2982_s10 = inlined_call_operand.vmem [shape: bf16[2,32,128], index: 10, kind: input, shape index: {}]   ;;  %s2983_s11 = inlined_call_operand.vmem [shape: f32[2,1,128], index: 11, kind: input, shape index: {}]   ;;  %s2984_s12 = inlined_call_operand.vmem [shape: bf16[2,128,32], index: 12, kind: input, shape index: {}]   ;;  %s2985_s13 = inlined_call_operand.vmem [shape: f32[2,1,32], index: 13, kind: input, shape index: {}]   ;;  %s2986_s14 = inlined_call_operand.vmem [shape: f32[2,1,32], index: 14, kind: input, shape index: {}]   ;;  %s2987_s15 = inlined_call_operand.vmem [shape: f32[2,1,32], index: 15, kind: input, shape index: {}]   ;;  %s2988_s16 = inlined_call_operand.vmem [shape: f32[1,32], index: 16, kind: input, shape index: {}]   ;;  %s2989_s17 = inlined_call_operand.<no memory space> [shape: f32[1,1], index: 17, kind: input, shape index: {}]   ;;  %s2990_s18 = inlined_call_operand.vmem [shape: f32[32,11], index: 18, kind: input, shape index: {}]   ;;  %s2991_s19 = inlined_call_operand.vmem [shape: f32[1,11], index: 19, kind: input, shape index: {}]   ;;  %s2992_s20 = inlined_call_operand.hbm [shape: f32[2,11], index: 20, kind: output, shape index: {}]  }
   0x1   :  { %3009 = sst [smem:[#allocation6_spill]] %s2972_s0  ;;  %v25_v0 = vstv %s2989_s17 }
   0x2   :  { %3010 = sst [smem:[#allocation7_spill]] %s2973_s1  ;;  %26 = vst [vmem:[#allocation2] sm:$0x1] %v25_v0 }
   0x3   :  { %3011 = sst [smem:[#allocation8_spill]] %s2974_s2 }
   0x4   :  { %3012 = sst [smem:[#allocation9_spill]] %s2975_s3 }
   0x5   :  { %3013 = sst [smem:[#allocation10_spill]] %s2976_s4 }
   0x6   :  { %s3014_s2 = sld [smem:[#allocation6_spill]]  ;;  %v2328_v2 = vmov 0  }
   0x7   :  { %2162 = vset.pattern.permute.xlu0 %v2328_v2  ;;  %2193 = vset.pattern.permute.xlu1 %v2328_v2 }
   0xc   :  { %v74_v1 = vld [vmem:[%s3014_s2] sm:$0xff]  ;;  %v75_v3 = vld [vmem:[%s3014_s2 + $0x8] sm:$0xff] }
   0xd   :  { %79 = vperm.xlu0 %2162, %v74_v1  }
   0xe   :  { %27 = vsyncpa [#allocation4], 0  ;;  %s3015_s28 = sld [smem:[#allocation10_spill]]  ;;  %vm141_vm0 = vcmask 261120   ;;  %v2195_v16 = vld [vmem:[%s2977_s5] ss:$0 sm:$0xff] }
   0xf   :  { %s3016_s0 = sld [smem:[#allocation9_spill]]  ;;  %s3005_s3 = smov 88   ;;  %vm163_vm1 = vcmask 64512   ;;  %vm202_vm2 = vcmask 1043456   ;;  %vm406_vm3 = vcmask 130048   ;;  %vm408_vm4 = vcmask 195584  }
  0x10   :  { %s3017_s22 = sld [smem:[#allocation8_spill]]  ;;  %s2330_s26 = smov 96  }
  0x11   :  { %s2331_s27 = smov 120   ;;  %s2332_s17 = smov 72  }
  0x12   :  { %s2333_s4 = smov 80   ;;  %s2334_s29 = smov 112  }
  0x13   :  { %s3018_s21 = sld [smem:[#allocation7_spill]]  ;;  %s2335_s1 = smov 64  }
  0x14   :  { %v2118_v4 = vld [vmem:[%s3015_s28 + $0x8] sm:$0xff]  ;;  %v2117_v5 = vld [vmem:[%s3015_s28] sm:$0xff]  ;;  %s3000_s23 = smov 48   ;;  %s2996_s24 = smov 40  }
  0x15   :  { %84 = vperm.xlu0 %2162, %v75_v3   ;;  %151 = vmatpush.bf16.msra.mxu0 %v2118_v4  ;;  %v2194_v7 = vld [vmem:[%s3016_s0] ss:$0 sm:$0xff]  ;;  %s2998_s2 = smov 56   ;;  %s3002_s25 = smov 16  }
  0x16   :  { %v92_v9 = vld [vmem:[%s3017_s22] sm:$0xff]  ;;  %v93_v10 = vld [vmem:[%s3017_s22 + $0x8] sm:$0xff]  ;;  %s3007_s22 = smov 104   ;;  %s3004_s30 = smov 8  }
  0x17   :  { %s3003_s0 = smov 24  }
  0x19   :  { %152 = vmatpush.bf16.msra.mxu0 %v2117_v5  ;;  %v69_v31 = vld [vmem:[%s3018_s21] sm:$0x3]  ;;  %s2344_s21 = smov [#allocation3]  }
  0x1a   :  { %v1923_v32 = vadd.f32 -1.0, %v69_v31 }
  0x1c   :  { %v2514_v33 = vmul.f32 1e+30, %v1923_v32 }
  0x1e   :  { %v2517_v34 = vperm.slane %v2514_v33, 0  ;;  %v2553_v2 = vperm.slane %v2514_v33, 1 }
  0x7f   :  { %v80_v6 = vpop.permute.xlu0 %79 }
  0x80   :  { %v90_v8 = vmul.f32 %v2194_v7, %v80_v6 }
  0x82   :  { %v2474_v13 = vadd.f32 %v92_v9, %v90_v8 }
  0x87   :  { %v85_v11 = vpop.permute.xlu0 %84 }
  0x88   :  { %v91_v12 = vmul.f32 %v2194_v7, %v85_v11 }
  0x8a   :  { %v2476_v14 = vadd.f32 %v93_v10, %v91_v12 }
  0x8c   :  { %v124_v15 = vpack.c.bf16 %v2476_v14, %v2474_v13 }
  0x8e   :  { %1932 = vmatmul.msk.bf16.vlgmr.msra.gmra.mxu0 %vm141_vm0, %v124_v15 }
 0x10b   :  { %v154_v17 = vpop.f32.mrf.mxu0 }
 0x10c   :  { %v155_v18 = vadd.f32 %v2195_v16, %v154_v17 }
 0x10e   :  { %v2484_v19 = vpack.c.bf16 %v155_v18, %v155_v18 }
 0x110   :  { %221 = vrot.lane.b32.xlu0 %v2484_v19, %s3005_s3  ;;  %161 = vrot.lane.b32.xlu1 %v2484_v19, %s2330_s26 }
 0x113   :  { %v156_v20 = vpop.f32.mrf.mxu0 }
 0x114   :  { %v157_v21 = vadd.f32 %v2195_v16, %v156_v20 }
 0x116   :  { %v2498_v22 = vpack.c.bf16 %v157_v21, %v157_v21 }
 0x118   :  { %219 = vrot.lane.b32.xlu0 %v2484_v19, %s2331_s27 }
 0x120   :  { %337 = vrot.lane.b32.xlu0 %v2484_v19, %s2332_s17 }
 0x128   :  { %279 = vrot.lane.b32.xlu0 %v2484_v19, %s2333_s4 }
 0x130   :  { %277 = vrot.lane.b32.xlu0 %v2484_v19, %s2334_s29 }
 0x138   :  { %586 = vrot.lane.b32.xlu0 %v2498_v22, %s2332_s17 }
 0x140   :  { %528 = vrot.lane.b32.xlu0 %v2498_v22, %s2333_s4 }
 0x182   :  { %v222_v23 = vpop.permute.xlu0 %221  ;;  %v162_v24 = vpop.permute.xlu1 %161 }
 0x183   :  { %v168_v25 = vsel %vm163_vm1, %v162_v24, 0  ;;  %v227_v60 = vsel %vm163_vm1, %v222_v23, 0 }
 0x184   :  { %177 = vmatpush.bf16.xpose.msra.mxu1 %v168_v25 }
 0x18a   :  { %v2505_v26 = vpop.permute.xlu0 %219 }
 0x18b   :  { %1933 = vmatmul.msk.bf16.vlgmr.msra.gmra.mxu1 %vm163_vm1, %v2484_v19 }
 0x192   :  { %v338_v27 = vpop.permute.xlu0 %337 }
 0x193   :  { %v343_v62 = vsel %vm163_vm1, %v338_v27, 0 }
 0x19a   :  { %v280_v28 = vpop.permute.xlu0 %279 }
 0x19b   :  { %v285_v29 = vsel %vm163_vm1, %v280_v28, 0 }
 0x19c   :  { %294 = vmatpush.bf16.xpose.msrb.mxu0 %v285_v29 }
 0x1a2   :  { %v278_v30 = vpop.permute.xlu0 %277 }
 0x1a3   :  { %1937 = vmatmul.msk.bf16.vlgmr.msrb.gmra.mxu0 %vm163_vm1, %v278_v30 }
 0x1aa   :  { %v587_v50 = vpop.permute.xlu0 %586 }
 0x1ab   :  { %v592_v10 = vsel %vm163_vm1, %v587_v50, 0 }
 0x1b2   :  { %v529_v51 = vpop.permute.xlu0 %528 }
 0x1b3   :  { %v534_v54 = vsel %vm163_vm1, %v529_v51, 0 }
 0x208   :  { %v179_v35 = vpop.f32.mrf.mxu1 }
 0x209   :  { %v183_v36 = vmul.f32 0.35355338, %v179_v35 }
 0x20b   :  { %v184_v37 = vadd.f32 %v183_v36, %v2517_v34 }
 0x20d   :  { %v185_v38 = vsel %vm163_vm1, %v184_v37, -inf }
 0x20e   :  { %186 = vmax.xlane.f32.xlu1 %v185_v38 }
 0x210   :  { %v181_v39 = vpop.f32.mrf.mxu1 }
 0x220   :  { %v296_v40 = vpop.f32.mrf.mxu0 }
 0x221   :  { %v300_v42 = vmul.f32 0.35355338, %v296_v40 }
 0x223   :  { %v2524_v43 = vadd.f32 %v300_v42, %v2517_v34 }
 0x225   :  { %v302_v44 = vsel %vm163_vm1, %v2524_v43, -inf }
 0x227   :  { %412 = vrot.lane.b32.xlu1 %v2498_v22, %s2330_s26 }
 0x228   :  { %v298_v41 = vpop.f32.mrf.mxu0 }
 0x251   :  { %303 = vmax.xlane.f32.xlu1 %v302_v44 }
 0x281   :  { %v187_v45 = vpop.xlane.xlu1 %186 }
 0x282   :  { %v188_v46 = vsub.f32 %v184_v37, %v187_v45 }
 0x284   :  { %v189_v47 = vmul.f32 1.442695, %v188_v46 }
 0x286   :  { %2212 = vpow2.f32 %v189_v47 }
 0x28c   :  { %v2213_v48 = vpop.eup %2212 }
 0x28d   :  { %v191_v49 = vsel %vm163_vm1, %v2213_v48, 0.0 }
 0x28e   :  { %192 = vadd.xlane.f32.xlu2 %v191_v49 }
 0x299   :  { %v413_v52 = vpop.permute.xlu1 %412 }
 0x29a   :  { %v418_v53 = vsel %vm163_vm1, %v413_v52, 0 }
 0x29b   :  { %427 = vmatpush.bf16.xpose.msra.mxu0 %v418_v53 }
 0x2a2   :  { %1941 = vmatmul.msk.bf16.vlgmr.msra.gmra.mxu0 %vm163_vm1, %v2498_v22 }
 0x2a3   :  { %543 = vmatpush.bf16.xpose.msrb.mxu0 %v534_v54 }
 0x2a6   :  { %197 = vrot.lane.b32.xlu2 %v2484_v19, %s2335_s1 }
 0x2ae   :  { %335 = vrot.lane.b32.xlu2 %v2484_v19, %s3007_s22 }
 0x2b6   :  { %470 = vrot.lane.b32.xlu2 %v2498_v22, %s3005_s3  ;;  %s3026_s3 = smov 16  }
 0x2be   :  { %468 = vrot.lane.b32.xlu2 %v2498_v22, %s2331_s27 }
 0x2c4   :  { %v304_v20 = vpop.xlane.xlu1 %303 }
 0x2c6   :  { %584 = vrot.lane.b32.xlu2 %v2498_v22, %s3007_s22 }
 0x2ce   :  { %526 = vrot.lane.b32.xlu2 %v2498_v22, %s2334_s29 }
 0x301   :  { %v193_v55 = vpop.xlane.xlu2 %192 }
 0x302   :  { %2214 = vrcp.f32 %v193_v55 }
 0x308   :  { %v2215_v56 = vpop.eup %2214 }
 0x309   :  { %v198_v57 = vpop.permute.xlu2 %197  ;;  %v195_v58 = vmul.f32 %v2215_v56, %v2213_v48 }
 0x30a   :  { %v204_v59 = vsel %vm202_vm2, %v198_v57, 0 }
 0x30b   :  { %213 = vmatpush.bf16.msra.mxu3 %v204_v59  ;;  %v196_v61 = vpack.c.bf16 %v195_v58, %v195_v58 }
 0x30e   :  { %1934 = vmatmul.msk.bf16.vlgmr.msra.gmra.mxu3 %vm163_vm1, %v196_v61 }
 0x30f   :  { %236 = vmatpush.bf16.xpose.msrb.mxu3 %v227_v60 }
 0x311   :  { %v336_v63 = vpop.permute.xlu2 %335 }
 0x317   :  { %352 = vmatpush.bf16.xpose.msra.mxu3 %v343_v62 }
 0x319   :  { %v471_v0 = vpop.permute.xlu2 %470 }
 0x31a   :  { %v476_v1 = vsel %vm163_vm1, %v471_v0, 0 }
 0x31e   :  { %1935 = vmatmul.msk.bf16.vlgmr.msrb.gmra.mxu3 %vm163_vm1, %v2505_v26  ;;  %v305_v26 = vsub.f32 %v2524_v43, %v304_v20 }
 0x31f   :  { %485 = vmatpush.bf16.xpose.msrb.mxu3 %v476_v1  ;;  %v429_v3 = vpop.f32.mrf.mxu0 }
 0x320   :  { %v433_v4 = vmul.f32 0.35355338, %v429_v3  ;;  %v306_v31 = vmul.f32 1.442695, %v305_v26 }
 0x321   :  { %v469_v5 = vpop.permute.xlu2 %468 }
 0x322   :  { %v434_v6 = vadd.f32 %v433_v4, %v2553_v2  ;;  %2216 = vpow2.f32 %v306_v31 }
 0x324   :  { %v435_v7 = vsel %vm163_vm1, %v434_v6, -inf }
 0x325   :  { %436 = vmax.xlane.f32.xlu0 %v435_v7 }
 0x327   :  { %v431_v8 = vpop.f32.mrf.mxu0 }
 0x328   :  { %v2217_v38 = vpop.eup %2216 }
 0x329   :  { %v585_v9 = vpop.permute.xlu2 %584  ;;  %v308_v41 = vsel %vm163_vm1, %v2217_v38, 0.0 }
 0x32e   :  { %1939 = vmatmul.msk.bf16.vlgmr.msra.gmra.mxu3 %vm163_vm1, %v336_v63 }
 0x32f   :  { %601 = vmatpush.bf16.xpose.msra.mxu3 %v592_v10 }
 0x331   :  { %v527_v11 = vpop.permute.xlu2 %526 }
 0x332   :  { %1945 = vmatmul.msk.bf16.vlgmr.msrb.gmra.mxu0 %vm163_vm1, %v527_v11 }
 0x33e   :  { %1943 = vmatmul.msk.bf16.vlgmr.msrb.gmra.mxu3 %vm163_vm1, %v469_v5 }
 0x34e   :  { %1947 = vmatmul.msk.bf16.vlgmr.msra.gmra.mxu3 %vm163_vm1, %v585_v9 }
 0x391   :  { %v2562_v12 = vpop.f32.mrf.mxu3 }
 0x398   :  { %v437_v50 = vpop.xlane.xlu0 %436 }
 0x399   :  { %v217_v15 = vpop.f32.mrf.mxu3  ;;  %v438_v51 = vsub.f32 %v434_v6, %v437_v50 }
 0x39b   :  { %v439_v52 = vmul.f32 1.442695, %v438_v51 }
 0x39d   :  { %2218 = vpow2.f32 %v439_v52 }
 0x3a1   :  { %v238_v16 = vpop.f32.mrf.mxu3 }
 0x3a2   :  { %v242_v27 = vmul.f32 0.35355338, %v238_v16 }
 0x3a3   :  { %v2590_v53 = vpop.eup %2218 }
 0x3a4   :  { %v243_v35 = vadd.f32 %v242_v27, %v2517_v34  ;;  %v441_v54 = vsel %vm163_vm1, %v2590_v53, 0.0 }
 0x3a6   :  { %v244_v37 = vsel %vm163_vm1, %v243_v35, -inf }
 0x3a9   :  { %v240_v17 = vpop.f32.mrf.mxu3 }
 0x3af   :  { %v545_v18 = vpop.f32.mrf.mxu0 }
 0x3b0   :  { %v549_v21 = vmul.f32 0.35355338, %v545_v18 }
 0x3b1   :  { %v354_v23 = vpop.f32.mrf.mxu3 }
 0x3b2   :  { %v358_v24 = vmul.f32 0.35355338, %v354_v23  ;;  %v2565_v25 = vadd.f32 %v549_v21, %v2553_v2 }
 0x3b4   :  { %v551_v28 = vsel %vm163_vm1, %v2565_v25, -inf  ;;  %v359_v29 = vadd.f32 %v358_v24, %v2517_v34 }
 0x3b5   :  { %552 = vmax.xlane.f32.xlu0 %v551_v28 }
 0x3b6   :  { %v360_v30 = vsel %vm163_vm1, %v359_v29, -inf }
 0x3b7   :  { %361 = vmax.xlane.f32.xlu2 %v360_v30  ;;  %v547_v32 = vpop.f32.mrf.mxu0 }
 0x3b9   :  { %v356_v36 = vpop.f32.mrf.mxu3 }
 0x3bd   :  { %245 = vmax.xlane.f32.xlu0 %v244_v37 }
 0x3c1   :  { %v487_v39 = vpop.f32.mrf.mxu3 }
 0x3c2   :  { %v491_v40 = vmul.f32 0.35355338, %v487_v39 }
 0x3c4   :  { %v492_v42 = vadd.f32 %v491_v40, %v2553_v2 }
 0x3c5   :  { %309 = vadd.xlane.f32.xlu0 %v308_v41 }
 0x3c6   :  { %v493_v43 = vsel %vm163_vm1, %v492_v42, -inf }
 0x3c7   :  { %494 = vmax.xlane.f32.xlu2 %v493_v43 }
 0x3c9   :  { %v489_v44 = vpop.f32.mrf.mxu3 }
 0x3d1   :  { %v603_v45 = vpop.f32.mrf.mxu3 }
 0x3d2   :  { %v607_v46 = vmul.f32 0.35355338, %v603_v45 }
 0x3d4   :  { %v2578_v47 = vadd.f32 %v607_v46, %v2553_v2 }
 0x3d6   :  { %v609_v48 = vsel %vm163_vm1, %v2578_v47, -inf }
 0x3d7   :  { %610 = vmax.xlane.f32.xlu1 %v609_v48 }
 0x3d9   :  { %v605_v49 = vpop.f32.mrf.mxu3  ;;  %314 = vrot.lane.b32.xlu0 %v2484_v19, %s3000_s23 }
 0x3df   :  { %372 = vrot.lane.b32.xlu2 %v2484_v19, %s2996_s24 }
 0x3e7   :  { %505 = vrot.lane.b32.xlu2 %v2498_v22, %s2998_s2 }
 0x3f0   :  { %256 = vrot.lane.b32.xlu1 %v2484_v19, %s2998_s2 }
 0x403   :  { %442 = vadd.xlane.f32.xlu0 %v441_v54 }
 0x417   :  { %621 = vrot.lane.b32.xlu0 %v2498_v22, %s2996_s24 }
 0x428   :  { %v553_v55 = vpop.xlane.xlu0 %552 }
 0x429   :  { %v554_v1 = vsub.f32 %v2565_v25, %v553_v55 }
 0x42a   :  { %v362_v56 = vpop.xlane.xlu2 %361 }
 0x42b   :  { %v363_v59 = vsub.f32 %v359_v29, %v362_v56  ;;  %v555_v6 = vmul.f32 1.442695, %v554_v1 }
 0x42d   :  { %v364_v19 = vmul.f32 1.442695, %v363_v59 }
 0x430   :  { %v246_v57 = vpop.xlane.xlu0 %245 }
 0x431   :  { %v247_v58 = vsub.f32 %v243_v35, %v246_v57 }
 0x433   :  { %v248_v60 = vmul.f32 1.442695, %v247_v58 }
 0x435   :  { %2220 = vpow2.f32 %v248_v60 }
 0x436   :  { %2222 = vpow2.f32 %v364_v19 }
 0x438   :  { %v310_v4 = vpop.xlane.xlu0 %309 }
 0x43a   :  { %v495_v61 = vpop.xlane.xlu2 %494 }
 0x43b   :  { %v2221_v62 = vpop.eup %2220  ;;  %v496_v63 = vsub.f32 %v492_v42, %v495_v61 }
 0x43c   :  { %v250_v0 = vsel %vm163_vm1, %v2221_v62, 0.0  ;;  %v2223_v5 = vpop.eup %2222 }
 0x43d   :  { %v497_v3 = vmul.f32 1.442695, %v496_v63  ;;  %251 = vadd.xlane.f32.xlu2 %v250_v0  ;;  %v366_v7 = vsel %vm163_vm1, %v2223_v5, 0.0 }
 0x43f   :  { %2224 = vpow2.f32 %v497_v3 }
 0x440   :  { %2226 = vrcp.f32 %v310_v4 }
 0x441   :  { %2228 = vpow2.f32 %v555_v6 }
 0x442   :  { %v373_v23 = vpop.permute.xlu2 %372 }
 0x443   :  { %v378_v26 = vsel %vm202_vm2, %v373_v23, 0  ;;  %v2119_v23 = vld [vmem:[%s2978_s6] sm:$0xff] }
 0x445   :  { %v2599_v8 = vpop.eup %2224  ;;  %367 = vadd.xlane.f32.xlu2 %v366_v7 }
 0x446   :  { %v499_v9 = vsel %vm163_vm1, %v2599_v8, 0.0  ;;  %v2227_v10 = vpop.eup %2226 }
 0x447   :  { %500 = vadd.xlane.f32.xlu1 %v499_v9  ;;  %v312_v11 = vmul.f32 %v2227_v10, %v2217_v38  ;;  %v2229_v15 = vpop.eup %2228 }
 0x448   :  { %v557_v18 = vsel %vm163_vm1, %v2229_v15, 0.0 }
 0x449   :  { %v313_v20 = vpack.c.bf16 %v312_v11, %v312_v11 }
 0x44a   :  { %v611_v21 = vpop.xlane.xlu1 %610  ;;  %v506_v31 = vpop.permute.xlu2 %505 }
 0x44b   :  { %v315_v16 = vpop.permute.xlu0 %314  ;;  %v612_v27 = vsub.f32 %v2578_v47, %v611_v21  ;;  %v2120_v21 = vld [vmem:[%s2978_s6 + $0x8] sm:$0xff] }
 0x44c   :  { %v320_v17 = vsel %vm202_vm2, %v315_v16, 0  ;;  %683 = vmatpush.bf16.msra.mxu0 %v2120_v21 }
 0x44d   :  { %329 = vmatpush.bf16.msrb.mxu1 %v320_v17  ;;  %v613_v28 = vmul.f32 1.442695, %v612_v27 }
 0x44f   :  { %558 = vadd.xlane.f32.xlu1 %v557_v18  ;;  %2230 = vpow2.f32 %v613_v28 }
 0x450   :  { %1938 = vmatmul.msk.bf16.vlgmr.msrb.gmra.mxu1 %vm163_vm1, %v313_v20  ;;  %684 = vmatpush.bf16.msra.mxu0 %v2119_v23 }
 0x455   :  { %v2231_v29 = vpop.eup %2230 }
 0x456   :  { %v615_v30 = vsel %vm163_vm1, %v2231_v29, 0.0 }
 0x45d   :  { %447 = vrot.lane.b32.xlu2 %v2498_v22, %s2335_s1 }
 0x462   :  { %v257_v24 = vpop.permute.xlu1 %256 }
 0x463   :  { %v262_v25 = vsel %vm202_vm2, %v257_v24, 0 }
 0x464   :  { %271 = vmatpush.bf16.msra.mxu2 %v262_v25 }
 0x468   :  { %387 = vmatpush.bf16.msrb.mxu2 %v378_v26  ;;  %563 = vrot.lane.b32.xlu1 %v2498_v22, %s3000_s23  ;;  %v511_v22 = vsel %vm202_vm2, %v506_v31, 0  ;;  %s1914_s23 = sshll.u32 %s2992_s20, 4  ;;  %s1915_s23 = int_to_ptr.hbm [resolvable:$true] %s1914_s23 }
 0x476   :  { %v443_v35 = vpop.xlane.xlu0 %442 }
 0x486   :  { %616 = vadd.xlane.f32.xlu2 %v615_v30 }
 0x489   :  { %v622_v48 = vpop.permute.xlu0 %621 }
 0x48a   :  { %v627_v50 = vsel %vm202_vm2, %v622_v48, 0 }
 0x4b0   :  { %v252_v32 = vpop.xlane.xlu2 %251 }
 0x4b1   :  { %2232 = vrcp.f32 %v252_v32 }
 0x4b2   :  { %2234 = vrcp.f32 %v443_v35 }
 0x4b7   :  { %v2233_v36 = vpop.eup %2232 }
 0x4b8   :  { %v368_v37 = vpop.xlane.xlu2 %367  ;;  %v254_v38 = vmul.f32 %v2233_v36, %v2221_v62  ;;  %v2235_v40 = vpop.eup %2234 }
 0x4b9   :  { %2236 = vrcp.f32 %v368_v37  ;;  %v445_v41 = vmul.f32 %v2235_v40, %v2590_v53 }
 0x4ba   :  { %v255_v39 = vpack.c.bf16 %v254_v38, %v254_v38  ;;  %v501_v46 = vpop.xlane.xlu1 %500 }
 0x4bb   :  { %v446_v45 = vpack.c.bf16 %v445_v41, %v445_v41  ;;  %2238 = vrcp.f32 %v501_v46  ;;  %v2196_v41 = vld [vmem:[%s2979_s7] ss:$0 sm:$0xff] }
 0x4bc   :  { %1936 = vmatmul.msk.bf16.vlgmr.msra.gmra.mxu2 %vm163_vm1, %v255_v39 }
 0x4bd   :  { %520 = vmatpush.bf16.msra.mxu2 %v511_v22 }
 0x4bf   :  { %v2237_v44 = vpop.eup %2236 }
 0x4c0   :  { %v448_v42 = vpop.permute.xlu2 %447  ;;  %v370_v47 = vmul.f32 %v2237_v44, %v2223_v5 }
 0x4c1   :  { %v453_v43 = vsel %vm202_vm2, %v448_v42, 0  ;;  %v2239_v53 = vpop.eup %2238 }
 0x4c2   :  { %462 = vmatpush.bf16.msra.mxu1 %v453_v43  ;;  %v371_v49 = vpack.c.bf16 %v370_v47, %v370_v47  ;;  %v559_v51 = vpop.xlane.xlu1 %558  ;;  %v503_v56 = vmul.f32 %v2239_v53, %v2599_v8 }
 0x4c3   :  { %2240 = vrcp.f32 %v559_v51 }
 0x4c4   :  { %v504_v58 = vpack.c.bf16 %v503_v56, %v503_v56 }
 0x4c5   :  { %1942 = vmatmul.msk.bf16.vlgmr.msra.gmra.mxu1 %vm163_vm1, %v446_v45 }
 0x4c9   :  { %v2241_v55 = vpop.eup %2240 }
 0x4ca   :  { %v561_v57 = vmul.f32 %v2241_v55, %v2229_v15 }
 0x4cc   :  { %1940 = vmatmul.msk.bf16.vlgmr.msrb.gmra.mxu2 %vm163_vm1, %v371_v49  ;;  %v562_v19 = vpack.c.bf16 %v561_v57, %v561_v57  ;;  %v2343_v49 = vmov 32.0  }
 0x4cd   :  { %636 = vmatpush.bf16.msrb.mxu2 %v627_v50  ;;  %v331_v52 = vpop.f32.mrf.mxu1 }
 0x4d5   :  { %v333_v54 = vpop.f32.mrf.mxu1 }
 0x4da   :  { %v564_v59 = vpop.permute.xlu1 %563 }
 0x4db   :  { %v569_v60 = vsel %vm202_vm2, %v564_v59, 0 }
 0x4dc   :  { %1944 = vmatmul.msk.bf16.vlgmr.msra.gmra.mxu2 %vm163_vm1, %v504_v58  ;;  %578 = vmatpush.bf16.msrb.mxu1 %v569_v60 }
 0x4df   :  { %1946 = vmatmul.msk.bf16.vlgmr.msrb.gmra.mxu1 %vm163_vm1, %v562_v19 }
 0x4f9   :  { %v617_v61 = vpop.xlane.xlu2 %616 }
 0x4fa   :  { %2242 = vrcp.f32 %v617_v61 }
 0x4fb   :  { %2244 = vrcp.f32 %v2343_v49 }
 0x500   :  { %v2243_v62 = vpop.eup %2242 }
 0x501   :  { %v619_v63 = vmul.f32 %v2243_v62, %v2231_v29  ;;  %v2245_v50 = vpop.eup %2244 }
 0x502   :  { %v702_v51 = vmul.f32 32.0, %v2245_v50  ;;  %vm706_vm5 = vweird.f32 %v2245_v50 }
 0x503   :  { %v620_v0 = vpack.c.bf16 %v619_v63, %v619_v63  ;;  %v2122_v63 = vld [vmem:[%s2982_s10 + $0x8] sm:$0xff] }
 0x504   :  { %782 = vmatpush.bf16.msra.mxu1 %v2122_v63 }
 0x505   :  { %1948 = vmatmul.msk.bf16.vlgmr.msrb.gmra.mxu2 %vm163_vm1, %v620_v0 }
 0x53f   :  { %v273_v1 = vpop.f32.mrf.mxu2 }
 0x542   :  { %v464_v3 = vpop.f32.mrf.mxu1 }
 0x547   :  { %v275_v4 = vpop.f32.mrf.mxu2 }
 0x548   :  { %v2121_v4 = vld [vmem:[%s2982_s10] sm:$0xff] }
 0x549   :  { %783 = vmatpush.bf16.msra.mxu1 %v2121_v4 }
 0x54a   :  { %v466_v5 = vpop.f32.mrf.mxu1 }
 0x54b   :  { %v2130_v5 = vld [vmem:[%s2984_s12 + $0x38] sm:$0xff] }
 0x54c   :  { %845 = vmatpush.bf16.msrb.mxu3 %v2130_v5 }
 0x54f   :  { %v389_v6 = vpop.f32.mrf.mxu2 }
 0x557   :  { %v391_v7 = vpop.f32.mrf.mxu2 }
 0x55c   :  { %v580_v8 = vpop.f32.mrf.mxu1 }
 0x55d   :  { %v2168_v9 = vpack.i.bf16 %v580_v8, %v331_v52  ;;  %v703_v52 = vsub.f32 1.0, %v702_v51  ;;  %v2129_v8 = vld [vmem:[%s2984_s12 + $0x30] sm:$0xff] }
 0x55e   :  { %846 = vmatpush.bf16.msrb.mxu3 %v2129_v8 }
 0x55f   :  { %v522_v10 = vpop.f32.mrf.mxu2  ;;  %2169 = vrot.lane.b32.xlu0 %v2168_v9, %s3002_s25  ;;  %v704_v53 = vmul.f32 %v2245_v50, %v703_v52  ;;  %v2200_v52 = vld [vmem:[%s2985_s13] ss:$0 sm:$0xff] }
 0x560   :  { %v2163_v11 = vpack.i.bf16 %v522_v10, %v273_v1 }
 0x561   :  { %v705_v54 = vadd.f32 %v2245_v50, %v704_v53 }
 0x562   :  { %2164 = vrot.lane.b32.xlu2 %v2163_v11, %s3004_s30 }
 0x563   :  { %v2650_v55 = vsel %vm706_vm5, %v2245_v50, %v705_v54 }
 0x564   :  { %v582_v15 = vpop.f32.mrf.mxu1 }
 0x565   :  { %v2128_v15 = vld [vmem:[%s2984_s12 + $0x28] sm:$0xff] }
 0x566   :  { %847 = vmatpush.bf16.msrb.mxu3 %v2128_v15 }
 0x567   :  { %v524_v16 = vpop.f32.mrf.mxu2 }
 0x588   :  { %v638_v17 = vpop.f32.mrf.mxu2 }
 0x589   :  { %v2173_v18 = vpack.i.bf16 %v638_v17, %v389_v6 }
 0x58b   :  { %2174 = vrot.lane.b32.xlu1 %v2173_v18, %s3003_s0  ;;  %v2127_v18 = vld [vmem:[%s2984_s12 + $0x20] sm:$0xff] }
 0x58c   :  { %848 = vmatpush.bf16.msrb.mxu3 %v2127_v18 }
 0x590   :  { %v640_v20 = vpop.f32.mrf.mxu2 }
 0x5bc   :  { %v2165_v24 = vpop.permute.xlu2 %2164 }
 0x5bd   :  { %v2167_v26 = vunpack.i.h.bf16 %v2165_v24  ;;  %v2166_v27 = vunpack.i.l.bf16 %v2165_v24 }
 0x5bf   :  { %v654_v31 = vsel %vm163_vm1, %v464_v3, %v2167_v26  ;;  %v405_v32 = vsel %vm163_vm1, %v2562_v12, %v2166_v27 }
 0x5d1   :  { %v2170_v25 = vpop.permute.xlu0 %2169 }
 0x5d2   :  { %v2172_v28 = vunpack.i.h.bf16 %v2170_v25  ;;  %v2171_v29 = vunpack.i.l.bf16 %v2170_v25 }
 0x5d4   :  { %v655_v37 = vsel %vm406_vm3, %v654_v31, %v2172_v28  ;;  %v407_v38 = vsel %vm406_vm3, %v405_v32, %v2171_v29  ;;  %v2197_v29 = vld [vmem:[%s2980_s8] ss:$0 sm:$0xff] }
 0x5fd   :  { %v2175_v30 = vpop.permute.xlu1 %2174 }
 0x5fe   :  { %v2177_v35 = vunpack.i.h.bf16 %v2175_v30  ;;  %v2176_v36 = vunpack.i.l.bf16 %v2175_v30 }
 0x600   :  { %v656_v39 = vsel %vm408_vm4, %v655_v37, %v2177_v35  ;;  %v409_v40 = vsel %vm408_vm4, %v407_v38, %v2176_v36  ;;  %v2198_v35 = vld [vmem:[%s2981_s9] ss:$0 sm:$0xff] }
 0x601   :  { %v657_v22 = vpack.c.bf16 %v656_v39, %v409_v40 }
 0x603   :  { %1957 = vmatmul.msk.bf16.vlgmr.msra.gmra.mxu0 %vm141_vm0, %v657_v22 }
 0x680   :  { %v686_v42 = vpop.f32.mrf.mxu0 }
 0x681   :  { %v687_v43 = vadd.f32 %v2196_v41, %v686_v42  ;;  %v2125_v42 = vld [vmem:[%s2984_s12 + $0x10] sm:$0xff] }
 0x683   :  { %v691_v12 = vadd.f32 %v687_v43, %v2474_v13  ;;  %v2124_v43 = vld [vmem:[%s2984_s12 + $0x8] sm:$0xff] }
 0x685   :  { %v695_v44 = vsel %vm141_vm0, %v691_v12, 0.0 }
 0x686   :  { %696 = vadd.xlane.f32.xlu0 %v695_v44 }
 0x688   :  { %v688_v45 = vpop.f32.mrf.mxu0 }
 0x689   :  { %v689_v46 = vadd.f32 %v2196_v41, %v688_v45  ;;  %v2126_v41 = vld [vmem:[%s2984_s12 + $0x18] sm:$0xff]  ;;  %v2199_v45 = vld [vmem:[%s2983_s11] ss:$0 sm:$0xff] }
 0x68a   :  { %849 = vmatpush.bf16.msrb.mxu3 %v2126_v41 }
 0x68b   :  { %v692_v47 = vadd.f32 %v689_v46, %v2476_v14 }
 0x68d   :  { %v698_v48 = vsel %vm141_vm0, %v692_v47, 0.0 }
 0x68e   :  { %699 = vadd.xlane.f32.xlu1 %v698_v48  ;;  %850 = vmatpush.bf16.msrb.mxu3 %v2125_v42 }
 0x692   :  { %851 = vmatpush.bf16.msrb.mxu3 %v2124_v43  ;;  %v2203_v43 = vld [vmem:[%s2977_s5 + $0x1] ss:$0 sm:$0xff]  ;;  %s3019_s5 = smov 104  }
 0x6f9   :  { %v697_v13 = vpop.xlane.xlu0 %696 }
 0x6fa   :  { %v708_v56 = vmul.f32 %v2650_v55, %v697_v13 }
 0x6fc   :  { %v710_v57 = vsub.f32 %v691_v12, %v708_v56  ;;  %v2123_v12 = vld [vmem:[%s2984_s12] sm:$0xff] }
 0x6fd   :  { %852 = vmatpush.bf16.msrb.mxu3 %v2123_v12 }
 0x6fe   :  { %v712_v58 = vmul.f32 %v710_v57, %v710_v57 }
 0x700   :  { %v714_v14 = vsel %vm141_vm0, %v712_v58, 0.0 }
 0x701   :  { %v700_v59 = vpop.xlane.xlu1 %699  ;;  %715 = vadd.xlane.f32.xlu2 %v714_v14 }
 0x702   :  { %v709_v60 = vmul.f32 %v2650_v55, %v700_v59 }
 0x704   :  { %v711_v19 = vsub.f32 %v692_v47, %v709_v60 }
 0x706   :  { %v713_v61 = vmul.f32 %v711_v19, %v711_v19 }
 0x708   :  { %v717_v62 = vsel %vm141_vm0, %v713_v61, 0.0 }
 0x709   :  { %718 = vadd.xlane.f32.xlu0 %v717_v62 }
 0x774   :  { %v716_v0 = vpop.xlane.xlu2 %715 }
 0x775   :  { %v720_v1 = vmul.f32 %v716_v0, %v2650_v55 }
 0x777   :  { %v722_v3 = vadd.f32 1e-05, %v720_v1 }
 0x779   :  { %2246 = vrsqrt.f32 %v722_v3  ;;  %vm730_vm7 = vweird.f32 %v722_v3 }
 0x77c   :  { %v719_v6 = vpop.xlane.xlu0 %718 }
 0x77d   :  { %v721_v7 = vmul.f32 %v719_v6, %v2650_v55  ;;  %v2132_v6 = vld [vmem:[%s3015_s28 + $0x18] sm:$0xff] }
 0x77e   :  { %976 = vmatpush.bf16.msra.mxu2 %v2132_v6 }
 0x77f   :  { %v2247_v9 = vpop.eup %2246  ;;  %v723_v10 = vadd.f32 1e-05, %v721_v7 }
 0x780   :  { %v725_v11 = vmul.f32 %v2247_v9, %v722_v3  ;;  %vm731_vm6 = vweird.f32 %v2247_v9 }
 0x781   :  { %2248 = vrsqrt.f32 %v723_v10  ;;  %vm732_vm8 = vmor %vm730_vm7, %vm731_vm6  ;;  %vm740_vm10 = vweird.f32 %v723_v10 }
 0x782   :  { %v726_v16 = vmul.f32 %v2247_v9, %v725_v11 }
 0x784   :  { %v727_v17 = vmul.f32 0.5, %v726_v16 }
 0x786   :  { %v728_v20 = vsub.f32 1.5, %v727_v17 }
 0x787   :  { %v2249_v21 = vpop.eup %2248 }
 0x788   :  { %v729_v23 = vmul.f32 %v2247_v9, %v728_v20  ;;  %v735_v24 = vmul.f32 %v2249_v21, %v723_v10  ;;  %vm741_vm9 = vweird.f32 %v2249_v21  ;;  %v2131_v10 = vld [vmem:[%s3015_s28 + $0x10] sm:$0xff]  ;;  %s1912_s28 = sshll.u32 %s2344_s21, 4  ;;  %s1913_s28 = int_to_ptr.vmem [resolvable:$true] %s1912_s28 }
 0x789   :  { %vm742_vm11 = vmor %vm740_vm10, %vm741_vm9  ;;  %977 = vmatpush.bf16.msra.mxu2 %v2131_v10 }
 0x78a   :  { %v736_v25 = vmul.f32 %v2249_v21, %v735_v24  ;;  %v733_v26 = vsel %vm732_vm8, %v2247_v9, %v729_v23 }
 0x78b   :  { %v744_v30 = vmul.f32 %v733_v26, %v710_v57 }
 0x78c   :  { %v737_v27 = vmul.f32 0.5, %v736_v25 }
 0x78d   :  { %v749_v36 = vmul.f32 %v2197_v29, %v744_v30 }
 0x78e   :  { %v738_v28 = vsub.f32 1.5, %v737_v27 }
 0x78f   :  { %v754_v39 = vadd.f32 %v2198_v35, %v749_v36 }
 0x790   :  { %v739_v31 = vmul.f32 %v2249_v21, %v738_v28 }
 0x792   :  { %v743_v32 = vsel %vm742_vm11, %v2249_v21, %v739_v31  ;;  %v2201_v31 = vld [vmem:[%s2986_s14] ss:$0 sm:$0xff] }
 0x793   :  { %v745_v37 = vmul.f32 %v743_v32, %v711_v19 }
 0x795   :  { %v750_v38 = vmul.f32 %v2197_v29, %v745_v37  ;;  %v2202_v37 = vld [vmem:[%s2987_s15] ss:$0 sm:$0xff] }
 0x797   :  { %v755_v40 = vadd.f32 %v2198_v35, %v750_v38 }
 0x799   :  { %v756_v22 = vpack.c.bf16 %v755_v40, %v754_v39 }
 0x79b   :  { %1966 = vmatmul.msk.bf16.vlgmr.msra.gmra.mxu1 %vm141_vm0, %v756_v22 }
 0x818   :  { %v785_v44 = vpop.f32.mrf.mxu1 }
 0x819   :  { %v786_v46 = vadd.f32 %v2199_v45, %v785_v44 }
 0x81b   :  { %v790_v49 = vmax.f32 %v786_v46, 0.0 }
 0x820   :  { %v787_v47 = vpop.f32.mrf.mxu1 }
 0x821   :  { %v788_v48 = vadd.f32 %v2199_v45, %v787_v47 }
 0x823   :  { %v791_v50 = vmax.f32 %v788_v48, 0.0 }
 0x825   :  { %v792_v51 = vpack.c.bf16 %v791_v50, %v790_v49 }
 0x827   :  { %853 = vmatmul.bf16.vlgmr.msrb.gmra.mxu3 %v792_v51 }
 0x8aa   :  { %v854_v53 = vpop.f32.mrf.mxu3 }
 0x8ab   :  { %v855_v54 = vadd.f32 %v2200_v52, %v854_v53 }
 0x8ad   :  { %v859_v13 = vadd.f32 %v855_v54, %v754_v39 }
 0x8af   :  { %v863_v56 = vsel %vm141_vm0, %v859_v13, 0.0 }
 0x8b0   :  { %864 = vadd.xlane.f32.xlu1 %v863_v56 }
 0x8b2   :  { %v856_v57 = vpop.f32.mrf.mxu3 }
 0x8b3   :  { %v857_v58 = vadd.f32 %v2200_v52, %v856_v57 }
 0x8b5   :  { %v860_v14 = vadd.f32 %v857_v58, %v755_v40 }
 0x8b7   :  { %v866_v59 = vsel %vm141_vm0, %v860_v14, 0.0 }
 0x8b8   :  { %867 = vadd.xlane.f32.xlu0 %v866_v59 }
 0x923   :  { %v865_v60 = vpop.xlane.xlu1 %864 }
 0x924   :  { %v869_v19 = vmul.f32 %v865_v60, %v2650_v55 }
 0x926   :  { %v871_v61 = vsub.f32 %v859_v13, %v869_v19 }
 0x928   :  { %v873_v62 = vmul.f32 %v871_v61, %v871_v61 }
 0x92a   :  { %v875_v63 = vsel %vm141_vm0, %v873_v62, 0.0 }
 0x92b   :  { %v868_v0 = vpop.xlane.xlu0 %867  ;;  %876 = vadd.xlane.f32.xlu1 %v875_v63 }
 0x92c   :  { %v870_v1 = vmul.f32 %v868_v0, %v2650_v55 }
 0x92e   :  { %v872_v3 = vsub.f32 %v860_v14, %v870_v1 }
 0x930   :  { %v874_v4 = vmul.f32 %v872_v3, %v872_v3 }
 0x932   :  { %v878_v5 = vsel %vm141_vm0, %v874_v4, 0.0 }
 0x933   :  { %879 = vadd.xlane.f32.xlu2 %v878_v5 }
 0x99e   :  { %v877_v7 = vpop.xlane.xlu1 %876 }
 0x99f   :  { %v881_v8 = vmul.f32 %v877_v7, %v2650_v55 }
 0x9a1   :  { %v883_v9 = vadd.f32 1e-05, %v881_v8 }
 0x9a3   :  { %2250 = vrsqrt.f32 %v883_v9  ;;  %vm891_vm13 = vweird.f32 %v883_v9 }
 0x9a6   :  { %v880_v11 = vpop.xlane.xlu2 %879 }
 0x9a7   :  { %v882_v15 = vmul.f32 %v880_v11, %v2650_v55 }
 0x9a9   :  { %v2251_v16 = vpop.eup %2250  ;;  %v884_v17 = vadd.f32 1e-05, %v882_v15 }
 0x9aa   :  { %v886_v18 = vmul.f32 %v2251_v16, %v883_v9  ;;  %vm892_vm12 = vweird.f32 %v2251_v16 }
 0x9ab   :  { %2252 = vrsqrt.f32 %v884_v17  ;;  %vm893_vm14 = vmor %vm891_vm13, %vm892_vm12  ;;  %vm901_vm5 = vweird.f32 %v884_v17 }
 0x9ac   :  { %v887_v20 = vmul.f32 %v2251_v16, %v886_v18 }
 0x9ae   :  { %v888_v21 = vmul.f32 0.5, %v887_v20 }
 0x9b0   :  { %v889_v23 = vsub.f32 1.5, %v888_v21 }
 0x9b1   :  { %v2253_v24 = vpop.eup %2252 }
 0x9b2   :  { %v890_v25 = vmul.f32 %v2251_v16, %v889_v23  ;;  %v896_v26 = vmul.f32 %v2253_v24, %v884_v17  ;;  %vm902_vm15 = vweird.f32 %v2253_v24 }
 0x9b3   :  { %vm903_vm6 = vmor %vm901_vm5, %vm902_vm15  ;;  %vm1773_vm5 = vcmask 57344  }
 0x9b4   :  { %v897_v27 = vmul.f32 %v2253_v24, %v896_v26  ;;  %v894_v28 = vsel %vm893_vm14, %v2251_v16, %v890_v25 }
 0x9b5   :  { %v905_v32 = vmul.f32 %v894_v28, %v871_v61 }
 0x9b6   :  { %v898_v29 = vmul.f32 0.5, %v897_v27 }
 0x9b7   :  { %v910_v38 = vmul.f32 %v2201_v31, %v905_v32 }
 0x9b8   :  { %v899_v30 = vsub.f32 1.5, %v898_v29 }
 0x9b9   :  { %v2721_v22 = vadd.f32 %v2202_v37, %v910_v38 }
 0x9ba   :  { %v900_v35 = vmul.f32 %v2253_v24, %v899_v30 }
 0x9bc   :  { %v904_v36 = vsel %vm903_vm6, %v2253_v24, %v900_v35  ;;  %vm1905_vm6 = vcmask 82944  }
 0x9bd   :  { %v906_v39 = vmul.f32 %v904_v36, %v872_v3 }
 0x9bf   :  { %v911_v40 = vmul.f32 %v2201_v31, %v906_v39 }
 0x9c1   :  { %v2723_v41 = vadd.f32 %v2202_v37, %v911_v40 }
 0x9c3   :  { %v949_v42 = vpack.c.bf16 %v2723_v41, %v2721_v22 }
 0x9c5   :  { %2036 = vmatmul.msk.bf16.vlgmr.msra.gmra.mxu2 %vm141_vm0, %v949_v42 }
 0xa48   :  { %v979_v12 = vpop.f32.mrf.mxu2 }
 0xa49   :  { %v980_v44 = vadd.f32 %v2203_v43, %v979_v12 }
 0xa4b   :  { %v2731_v45 = vpack.c.bf16 %v980_v44, %v980_v44 }
 0xa4d   :  { %1021 = vrot.lane.b32.xlu2 %v2731_v45, %s2335_s1  ;;  %986 = vrot.lane.b32.xlu0 %v2731_v45, %s2330_s26 }
 0xa50   :  { %v981_v46 = vpop.f32.mrf.mxu2 }
 0xa51   :  { %v982_v47 = vadd.f32 %v2203_v43, %v981_v46 }
 0xa53   :  { %v2745_v48 = vpack.c.bf16 %v982_v47, %v982_v47 }
 0xa55   :  { %1100 = vrot.lane.b32.xlu2 %v2731_v45, %s2334_s29  ;;  %1042 = vrot.lane.b32.xlu0 %v2731_v45, %s2331_s27 }
 0xa5d   :  { %1102 = vrot.lane.b32.xlu0 %v2731_v45, %s2333_s4 }
 0xa65   :  { %1160 = vrot.lane.b32.xlu0 %v2731_v45, %s2332_s17 }
 0xa6d   :  { %1233 = vrot.lane.b32.xlu0 %v2745_v48, %s2330_s26  ;;  %s3020_s26 = smov 88  }
 0xa75   :  { %1349 = vrot.lane.b32.xlu0 %v2745_v48, %s2333_s4  ;;  %s3023_s4 = smov 40  }
 0xa7d   :  { %1405 = vrot.lane.b32.xlu0 %v2745_v48, %s3019_s5 }
 0xaa7   :  { %v1022_v49 = vpop.permute.xlu2 %1021 }
 0xaa8   :  { %v1027_v50 = vsel %vm202_vm2, %v1022_v49, 0 }
 0xaa9   :  { %1036 = vmatpush.bf16.msrb.mxu1 %v1027_v50 }
 0xaaf   :  { %v1101_v6 = vpop.permute.xlu2 %1100 }
 0xabf   :  { %v987_v51 = vpop.permute.xlu0 %986 }
 0xac0   :  { %v992_v52 = vsel %vm163_vm1, %v987_v51, 0 }
 0xac1   :  { %1001 = vmatpush.bf16.xpose.msrb.mxu0 %v992_v52 }
 0xac7   :  { %v1043_v53 = vpop.permute.xlu0 %1042 }
 0xac8   :  { %2037 = vmatmul.msk.bf16.vlgmr.msrb.gmra.mxu0 %vm163_vm1, %v2731_v45 }
 0xacf   :  { %v1103_v54 = vpop.permute.xlu0 %1102 }
 0xad0   :  { %v1108_v13 = vsel %vm163_vm1, %v1103_v54, 0 }
 0xad1   :  { %1117 = vmatpush.bf16.xpose.msra.mxu1 %v1108_v13 }
 0xad7   :  { %v1161_v0 = vpop.permute.xlu0 %1160 }
 0xad8   :  { %v1166_v4 = vsel %vm163_vm1, %v1161_v0, 0 }
 0xadf   :  { %v1234_v11 = vpop.permute.xlu0 %1233 }
 0xae0   :  { %v1239_v17 = vsel %vm163_vm1, %v1234_v11, 0 }
 0xae7   :  { %v1350_v23 = vpop.permute.xlu0 %1349 }
 0xae8   :  { %v1355_v24 = vsel %vm163_vm1, %v1350_v23, 0 }
 0xaef   :  { %v1406_v25 = vpop.permute.xlu0 %1405 }
 0xb45   :  { %v1003_v56 = vpop.f32.mrf.mxu0 }
 0xb46   :  { %v1007_v57 = vmul.f32 0.35355338, %v1003_v56 }
 0xb48   :  { %v1008_v58 = vadd.f32 %v1007_v57, %v2517_v34 }
 0xb4a   :  { %v1009_v14 = vsel %vm163_vm1, %v1008_v58, -inf }
 0xb4b   :  { %1010 = vmax.xlane.f32.xlu1 %v1009_v14 }
 0xb4d   :  { %v1005_v59 = vpop.f32.mrf.mxu0 }
 0xb64   :  { %1044 = vrot.lane.b32.xlu1 %v2731_v45, %s3020_s26 }
 0xb6c   :  { %1158 = vrot.lane.b32.xlu1 %v2731_v45, %s3019_s5 }
 0xb74   :  { %1289 = vrot.lane.b32.xlu1 %v2745_v48, %s2331_s27  ;;  %s3021_s27 = smov 48  }
 0xb7c   :  { %1347 = vrot.lane.b32.xlu1 %v2745_v48, %s2334_s29  ;;  %s3024_s29 = smov 8  }
 0xbbe   :  { %v1011_v60 = vpop.xlane.xlu1 %1010 }
 0xbbf   :  { %v1012_v19 = vsub.f32 %v1008_v58, %v1011_v60 }
 0xbc1   :  { %v1013_v61 = vmul.f32 1.442695, %v1012_v19 }
 0xbc3   :  { %2254 = vpow2.f32 %v1013_v61 }
 0xbc9   :  { %v2255_v62 = vpop.eup %2254 }
 0xbca   :  { %v1015_v63 = vsel %vm163_vm1, %v2255_v62, 0.0 }
 0xbcb   :  { %1016 = vadd.xlane.f32.xlu2 %v1015_v63 }
 0xbd6   :  { %v1045_v1 = vpop.permute.xlu1 %1044 }
 0xbd7   :  { %v1050_v3 = vsel %vm163_vm1, %v1045_v1, 0 }
 0xbd8   :  { %1059 = vmatpush.bf16.xpose.msrb.mxu2 %v1050_v3 }
 0xbde   :  { %v1159_v5 = vpop.permute.xlu1 %1158 }
 0xbdf   :  { %2039 = vmatmul.msk.bf16.vlgmr.msrb.gmra.mxu2 %vm163_vm1, %v1043_v53 }
 0xbe0   :  { %1175 = vmatpush.bf16.xpose.msra.mxu2 %v1166_v4 }
 0xbe3   :  { %1291 = vrot.lane.b32.xlu2 %v2745_v48, %s3020_s26 }
 0xbe6   :  { %v1290_v18 = vpop.permute.xlu1 %1289 }
 0xbeb   :  { %1407 = vrot.lane.b32.xlu2 %v2745_v48, %s2332_s17  ;;  %s3022_s17 = smov 56  }
 0xbee   :  { %v1348_v37 = vpop.permute.xlu1 %1347 }
 0xbef   :  { %2043 = vmatmul.msk.bf16.vlgmr.msra.gmra.mxu2 %vm163_vm1, %v1159_v5 }
 0xc3e   :  { %v1017_v7 = vpop.xlane.xlu2 %1016 }
 0xc3f   :  { %2256 = vrcp.f32 %v1017_v7 }
 0xc45   :  { %v2257_v8 = vpop.eup %2256 }
 0xc46   :  { %v1019_v9 = vmul.f32 %v2257_v8, %v2255_v62  ;;  %v1292_v10 = vpop.permute.xlu2 %1291 }
 0xc47   :  { %v1297_v15 = vsel %vm163_vm1, %v1292_v10, 0 }
 0xc48   :  { %v1020_v16 = vpack.c.bf16 %v1019_v9, %v1019_v9  ;;  %1306 = vmatpush.bf16.xpose.msrb.mxu2 %v1297_v15 }
 0xc4a   :  { %2038 = vmatmul.msk.bf16.vlgmr.msrb.gmra.mxu1 %vm163_vm1, %v1020_v16 }
 0xc4b   :  { %1248 = vmatpush.bf16.xpose.msrb.mxu1 %v1239_v17 }
 0xc4e   :  { %v1408_v20 = vpop.permute.xlu2 %1407 }
 0xc4f   :  { %v1413_v21 = vsel %vm163_vm1, %v1408_v20, 0  ;;  %2047 = vmatmul.msk.bf16.vlgmr.msrb.gmra.mxu2 %vm163_vm1, %v1290_v18 }
 0xc50   :  { %1422 = vmatpush.bf16.xpose.msra.mxu2 %v1413_v21 }
 0xc5a   :  { %2041 = vmatmul.msk.bf16.vlgmr.msra.gmra.mxu1 %vm163_vm1, %v1101_v6 }
 0xc5b   :  { %1364 = vmatpush.bf16.xpose.msra.mxu1 %v1355_v24 }
 0xc5f   :  { %2051 = vmatmul.msk.bf16.vlgmr.msra.gmra.mxu2 %vm163_vm1, %v1406_v25 }
 0xc62   :  { %v1061_v26 = vpop.f32.mrf.mxu2 }
 0xc63   :  { %v1065_v27 = vmul.f32 0.35355338, %v1061_v26 }
 0xc65   :  { %v1066_v28 = vadd.f32 %v1065_v27, %v2517_v34 }
 0xc67   :  { %v1067_v29 = vsel %vm163_vm1, %v1066_v28, -inf }
 0xc68   :  { %1068 = vmax.xlane.f32.xlu2 %v1067_v29 }
 0xc6a   :  { %v1063_v30 = vpop.f32.mrf.mxu2  ;;  %2045 = vmatmul.msk.bf16.vlgmr.msrb.gmra.mxu1 %vm163_vm1, %v2745_v48 }
 0xc72   :  { %v1177_v31 = vpop.f32.mrf.mxu2 }
 0xc73   :  { %v1181_v32 = vmul.f32 0.35355338, %v1177_v31 }
 0xc75   :  { %v1182_v35 = vadd.f32 %v1181_v32, %v2517_v34 }
 0xc77   :  { %v1183_v36 = vsel %vm163_vm1, %v1182_v35, -inf }
 0xc78   :  { %1184 = vmax.xlane.f32.xlu0 %v1183_v36 }
 0xc7a   :  { %v1179_v38 = vpop.f32.mrf.mxu2  ;;  %2049 = vmatmul.msk.bf16.vlgmr.msra.gmra.mxu1 %vm163_vm1, %v1348_v37 }
 0xcc7   :  { %v2792_v39 = vpop.f32.mrf.mxu1 }
 0xccf   :  { %v1040_v40 = vpop.f32.mrf.mxu1 }
 0xcd2   :  { %v1308_v42 = vpop.f32.mrf.mxu2 }
 0xcd3   :  { %v1312_v43 = vmul.f32 0.35355338, %v1308_v42 }
 0xcd5   :  { %v1313_v12 = vadd.f32 %v1312_v43, %v2553_v2 }
 0xcd7   :  { %v1119_v44 = vpop.f32.mrf.mxu1  ;;  %v1314_v46 = vsel %vm163_vm1, %v1313_v12, -inf }
 0xcd8   :  { %1315 = vmax.xlane.f32.xlu1 %v1314_v46  ;;  %v1123_v57 = vmul.f32 0.35355338, %v1119_v44 }
 0xcda   :  { %v1310_v47 = vpop.f32.mrf.mxu2  ;;  %v1124_v62 = vadd.f32 %v1123_v57, %v2517_v34 }
 0xcdb   :  { %v1069_v49 = vpop.xlane.xlu2 %1068 }
 0xcdc   :  { %v1070_v50 = vsub.f32 %v1066_v28, %v1069_v49  ;;  %v1125_v4 = vsel %vm163_vm1, %v1124_v62, -inf }
 0xcde   :  { %v1071_v51 = vmul.f32 1.442695, %v1070_v50 }
 0xcdf   :  { %v1121_v52 = vpop.f32.mrf.mxu1 }
 0xce0   :  { %2258 = vpow2.f32 %v1071_v51 }
 0xce2   :  { %v1424_v53 = vpop.f32.mrf.mxu2 }
 0xce3   :  { %v1428_v54 = vmul.f32 0.35355338, %v1424_v53 }
 0xce5   :  { %v1429_v13 = vadd.f32 %v1428_v54, %v2553_v2 }
 0xce6   :  { %v2797_v56 = vpop.eup %2258 }
 0xce7   :  { %v1250_v58 = vpop.f32.mrf.mxu1  ;;  %v1073_v14 = vsel %vm163_vm1, %v2797_v56, 0.0  ;;  %v1430_v59 = vsel %vm163_vm1, %v1429_v13, -inf }
 0xce8   :  { %v1254_v60 = vmul.f32 0.35355338, %v1250_v58  ;;  %1074 = vadd.xlane.f32.xlu1 %v1073_v14  ;;  %1431 = vmax.xlane.f32.xlu2 %v1430_v59 }
 0xcea   :  { %v1426_v19 = vpop.f32.mrf.mxu2  ;;  %v1255_v63 = vadd.f32 %v1254_v60, %v2553_v2 }
 0xceb   :  { %v1185_v61 = vpop.xlane.xlu0 %1184 }
 0xcec   :  { %v1186_v0 = vsub.f32 %v1182_v35, %v1185_v61  ;;  %v1256_v5 = vsel %vm163_vm1, %v1255_v63, -inf }
 0xcee   :  { %v1187_v1 = vmul.f32 1.442695, %v1186_v0 }
 0xcef   :  { %v1252_v3 = vpop.f32.mrf.mxu1 }
 0xcf0   :  { %2260 = vpow2.f32 %v1187_v1  ;;  %1126 = vmax.xlane.f32.xlu1 %v1125_v4  ;;  %1257 = vmax.xlane.f32.xlu2 %v1256_v5 }
 0xcf6   :  { %v2806_v6 = vpop.eup %2260 }
 0xcf7   :  { %v1366_v7 = vpop.f32.mrf.mxu1  ;;  %v1189_v8 = vsel %vm163_vm1, %v2806_v6, 0.0 }
 0xcf8   :  { %v1370_v9 = vmul.f32 0.35355338, %v1366_v7  ;;  %1190 = vadd.xlane.f32.xlu1 %v1189_v8 }
 0xcfa   :  { %v1371_v34 = vadd.f32 %v1370_v9, %v2553_v2 }
 0xcfc   :  { %v1372_v10 = vsel %vm163_vm1, %v1371_v34, -inf }
 0xcfd   :  { %1373 = vmax.xlane.f32.xlu0 %v1372_v10 }
 0xcff   :  { %v1368_v11 = vpop.f32.mrf.mxu1 }
 0xd08   :  { %1137 = vrot.lane.b32.xlu2 %v2731_v45, %s3021_s27 }
 0xd11   :  { %1079 = vrot.lane.b32.xlu0 %v2731_v45, %s3022_s17  ;;  %1195 = vrot.lane.b32.xlu1 %v2731_v45, %s3023_s4 }
 0xd19   :  { %1268 = vrot.lane.b32.xlu1 %v2745_v48, %s2335_s1  ;;  %s3025_s1 = smov 24  }
 0xd21   :  { %1326 = vrot.lane.b32.xlu1 %v2745_v48, %s3022_s17 }
 0xd4b   :  { %v1316_v2 = vpop.xlane.xlu1 %1315 }
 0xd4c   :  { %v1317_v23 = vsub.f32 %v1313_v12, %v1316_v2 }
 0xd4e   :  { %v1318_v45 = vmul.f32 1.442695, %v1317_v23 }
 0xd5b   :  { %v1075_v15 = vpop.xlane.xlu1 %1074  ;;  %v1432_v16 = vpop.xlane.xlu2 %1431 }
 0xd5c   :  { %v1433_v26 = vsub.f32 %v1429_v13, %v1432_v16 }
 0xd5e   :  { %v1434_v27 = vmul.f32 1.442695, %v1433_v26 }
 0xd63   :  { %v1127_v17 = vpop.xlane.xlu1 %1126  ;;  %v1258_v18 = vpop.xlane.xlu2 %1257 }
 0xd64   :  { %v1128_v20 = vsub.f32 %v1124_v62, %v1127_v17  ;;  %v1259_v21 = vsub.f32 %v1255_v63, %v1258_v18 }
 0xd66   :  { %v1129_v24 = vmul.f32 1.442695, %v1128_v20  ;;  %v1260_v25 = vmul.f32 1.442695, %v1259_v21 }
 0xd68   :  { %2262 = vpow2.f32 %v1129_v24 }
 0xd69   :  { %2264 = vpow2.f32 %v1260_v25 }
 0xd6a   :  { %2266 = vpow2.f32 %v1318_v45 }
 0xd6b   :  { %v1138_v28 = vpop.permute.xlu2 %1137  ;;  %2268 = vpow2.f32 %v1434_v27  ;;  %v1191_v46 = vpop.xlane.xlu1 %1190 }
 0xd6c   :  { %v1143_v29 = vsel %vm202_vm2, %v1138_v28, 0 }
 0xd6d   :  { %1152 = vmatpush.bf16.msra.mxu3 %v1143_v29 }
 0xd6e   :  { %v2263_v30 = vpop.eup %2262 }
 0xd6f   :  { %v2823_v31 = vpop.eup %2264  ;;  %v1131_v32 = vsel %vm163_vm1, %v2263_v30, 0.0 }
 0xd70   :  { %1132 = vadd.xlane.f32.xlu2 %v1131_v32  ;;  %v1262_v35 = vsel %vm163_vm1, %v2823_v31, 0.0  ;;  %v1374_v36 = vpop.xlane.xlu0 %1373  ;;  %v2267_v40 = vpop.eup %2266 }
 0xd71   :  { %1263 = vadd.xlane.f32.xlu0 %v1262_v35  ;;  %v1375_v37 = vsub.f32 %v1371_v34, %v1374_v36  ;;  %v2269_v42 = vpop.eup %2268  ;;  %v1320_v43 = vsel %vm163_vm1, %v2267_v40, 0.0 }
 0xd72   :  { %v1436_v12 = vsel %vm163_vm1, %v2269_v42, 0.0 }
 0xd73   :  { %v1376_v38 = vmul.f32 1.442695, %v1375_v37 }
 0xd75   :  { %2270 = vpow2.f32 %v1376_v38 }
 0xd76   :  { %2272 = vrcp.f32 %v1075_v15 }
 0xd77   :  { %2274 = vrcp.f32 %v1191_v46 }
 0xd78   :  { %1321 = vadd.xlane.f32.xlu2 %v1320_v43 }
 0xd79   :  { %1437 = vadd.xlane.f32.xlu0 %v1436_v12  ;;  %v2134_v12 = vld [vmem:[%s2978_s6 + $0x18] sm:$0xff] }
 0xd7a   :  { %1505 = vmatpush.bf16.msrb.mxu1 %v2134_v12 }
 0xd7b   :  { %v2271_v44 = vpop.eup %2270 }
 0xd7c   :  { %v1378_v47 = vsel %vm163_vm1, %v2271_v44, 0.0  ;;  %v2273_v49 = vpop.eup %2272 }
 0xd7d   :  { %1379 = vadd.xlane.f32.xlu1 %v1378_v47  ;;  %v1077_v50 = vmul.f32 %v2273_v49, %v2797_v56  ;;  %v2275_v56 = vpop.eup %2274 }
 0xd7e   :  { %v1193_v14 = vmul.f32 %v2275_v56, %v2806_v6 }
 0xd7f   :  { %v1078_v13 = vpack.c.bf16 %v1077_v50, %v1077_v50 }
 0xd80   :  { %v1194_v19 = vpack.c.bf16 %v1193_v14, %v1193_v14 }
 0xd83   :  { %v1196_v51 = vpop.permute.xlu1 %1195  ;;  %v1080_v52 = vpop.permute.xlu0 %1079 }
 0xd84   :  { %v1201_v53 = vsel %vm202_vm2, %v1196_v51, 0  ;;  %v1085_v54 = vsel %vm202_vm2, %v1080_v52, 0 }
 0xd85   :  { %1094 = vmatpush.bf16.msra.mxu0 %v1085_v54 }
 0xd88   :  { %2040 = vmatmul.msk.bf16.vlgmr.msra.gmra.mxu0 %vm163_vm1, %v1078_v13 }
 0xd89   :  { %1210 = vmatpush.bf16.msrb.mxu0 %v1201_v53 }
 0xd8b   :  { %v1269_v57 = vpop.permute.xlu1 %1268 }
 0xd8c   :  { %v1274_v58 = vsel %vm202_vm2, %v1269_v57, 0 }
 0xd8d   :  { %1384 = vrot.lane.b32.xlu0 %v2745_v48, %s3021_s27  ;;  %1283 = vmatpush.bf16.msrb.mxu3 %v1274_v58 }
 0xd90   :  { %1442 = vrot.lane.b32.xlu2 %v2745_v48, %s3023_s4 }
 0xd93   :  { %v1327_v59 = vpop.permute.xlu1 %1326 }
 0xd94   :  { %v1332_v60 = vsel %vm202_vm2, %v1327_v59, 0 }
 0xd95   :  { %1341 = vmatpush.bf16.msra.mxu0 %v1332_v60 }
 0xd98   :  { %2044 = vmatmul.msk.bf16.vlgmr.msrb.gmra.mxu0 %vm163_vm1, %v1194_v19 }
 0xde3   :  { %v1133_v61 = vpop.xlane.xlu2 %1132 }
 0xde4   :  { %2276 = vrcp.f32 %v1133_v61  ;;  %v1264_v0 = vpop.xlane.xlu0 %1263  ;;  %v2204_v61 = vld [vmem:[%s2979_s7 + $0x1] ss:$0 sm:$0xff] }
 0xdea   :  { %v2277_v62 = vpop.eup %2276 }
 0xdeb   :  { %v1135_v63 = vmul.f32 %v2277_v62, %v2263_v30  ;;  %v1322_v1 = vpop.xlane.xlu2 %1321 }
 0xdec   :  { %2278 = vrcp.f32 %v1322_v1  ;;  %v1438_v8 = vpop.xlane.xlu0 %1437 }
 0xded   :  { %v1136_v3 = vpack.c.bf16 %v1135_v63, %v1135_v63  ;;  %2280 = vrcp.f32 %v1264_v0 }
 0xdee   :  { %2282 = vrcp.f32 %v1438_v8 }
 0xdef   :  { %2042 = vmatmul.msk.bf16.vlgmr.msra.gmra.mxu3 %vm163_vm1, %v1136_v3 }
 0xdf0   :  { %v1380_v11 = vpop.xlane.xlu1 %1379 }
 0xdf1   :  { %2284 = vrcp.f32 %v1380_v11 }
 0xdf2   :  { %v2279_v48 = vpop.eup %2278 }
 0xdf3   :  { %v1324_v4 = vmul.f32 %v2279_v48, %v2267_v40  ;;  %v1443_v5 = vpop.permute.xlu2 %1442  ;;  %v2281_v9 = vpop.eup %2280 }
 0xdf4   :  { %v1448_v6 = vsel %vm202_vm2, %v1443_v5, 0  ;;  %v1266_v34 = vmul.f32 %v2281_v9, %v2823_v31  ;;  %v2283_v2 = vpop.eup %2282 }
 0xdf5   :  { %v1325_v7 = vpack.c.bf16 %v1324_v4, %v1324_v4  ;;  %1457 = vmatpush.bf16.msrb.mxu0 %v1448_v6  ;;  %v1440_v17 = vmul.f32 %v2283_v2, %v2269_v42 }
 0xdf6   :  { %v1267_v10 = vpack.c.bf16 %v1266_v34, %v1266_v34 }
 0xdf7   :  { %2048 = vmatmul.msk.bf16.vlgmr.msra.gmra.mxu0 %vm163_vm1, %v1325_v7  ;;  %v1441_v18 = vpack.c.bf16 %v1440_v17, %v1440_v17  ;;  %v2285_v21 = vpop.eup %2284 }
 0xdf8   :  { %v1382_v23 = vmul.f32 %v2285_v21, %v2271_v44  ;;  %v2133_v44 = vld [vmem:[%s2978_s6 + $0x10] sm:$0xff] }
 0xdf9   :  { %1506 = vmatpush.bf16.msrb.mxu1 %v2133_v44 }
 0xdfa   :  { %v1383_v24 = vpack.c.bf16 %v1382_v23, %v1382_v23 }
 0xdff   :  { %v1385_v15 = vpop.permute.xlu0 %1384  ;;  %2046 = vmatmul.msk.bf16.vlgmr.msrb.gmra.mxu3 %vm163_vm1, %v1267_v10 }
 0xe00   :  { %v1390_v16 = vsel %vm202_vm2, %v1385_v15, 0 }
 0xe01   :  { %1399 = vmatpush.bf16.msra.mxu3 %v1390_v16 }
 0xe05   :  { %v1096_v20 = vpop.f32.mrf.mxu0 }
 0xe07   :  { %2052 = vmatmul.msk.bf16.vlgmr.msrb.gmra.mxu0 %vm163_vm1, %v1441_v18  ;;  %v2135_v18 = vld [vmem:[%s2982_s10 + $0x10] sm:$0xff] }
 0xe0d   :  { %v1098_v25 = vpop.f32.mrf.mxu0 }
 0xe0f   :  { %2050 = vmatmul.msk.bf16.vlgmr.msra.gmra.mxu3 %vm163_vm1, %v1383_v24  ;;  %v2143_v24 = vld [vmem:[%s2984_s12 + $0x70] sm:$0xff] }
 0xe15   :  { %v1212_v26 = vpop.f32.mrf.mxu0 }
 0xe1d   :  { %v1214_v45 = vpop.f32.mrf.mxu0 }
 0xe72   :  { %v1154_v27 = vpop.f32.mrf.mxu3 }
 0xe74   :  { %v1343_v28 = vpop.f32.mrf.mxu0 }
 0xe75   :  { %v2178_v29 = vpack.i.bf16 %v1343_v28, %v1096_v20  ;;  %v2144_v20 = vld [vmem:[%s2984_s12 + $0x78] sm:$0xff] }
 0xe76   :  { %1664 = vmatpush.bf16.msrb.mxu2 %v2144_v20 }
 0xe77   :  { %2179 = vrot.lane.b32.xlu0 %v2178_v29, %s3024_s29 }
 0xe7a   :  { %v1156_v30 = vpop.f32.mrf.mxu3  ;;  %1665 = vmatpush.bf16.msrb.mxu2 %v2143_v24  ;;  %v1739_v24 = vld [vmem:[#allocation2] sm:$0x1] }
 0xe7b   :  { %v2141_v30 = vld [vmem:[%s2984_s12 + $0x60] sm:$0xff] }
 0xe7c   :  { %v1345_v31 = vpop.f32.mrf.mxu0 }
 0xe82   :  { %v1285_v32 = vpop.f32.mrf.mxu3 }
 0xe84   :  { %v1459_v35 = vpop.f32.mrf.mxu0 }
 0xe85   :  { %v2188_v36 = vpack.i.bf16 %v1459_v35, %v1212_v26 }
 0xe87   :  { %2189 = vrot.lane.b32.xlu2 %v2188_v36, %s3025_s1 }
 0xe8a   :  { %v1287_v37 = vpop.f32.mrf.mxu3 }
 0xe8c   :  { %v1461_v38 = vpop.f32.mrf.mxu0 }
 0xe92   :  { %v1401_v40 = vpop.f32.mrf.mxu3 }
 0xe93   :  { %v2183_v42 = vpack.i.bf16 %v1401_v40, %v1154_v27  ;;  %v2142_v27 = vld [vmem:[%s2984_s12 + $0x68] sm:$0xff] }
 0xe94   :  { %1666 = vmatpush.bf16.msrb.mxu2 %v2142_v27 }
 0xe95   :  { %2184 = vrot.lane.b32.xlu1 %v2183_v42, %s3026_s3 }
 0xe98   :  { %1667 = vmatpush.bf16.msrb.mxu2 %v2141_v30 }
 0xe9a   :  { %v1403_v43 = vpop.f32.mrf.mxu3 }
 0xe9b   :  { %v2205_v43 = vld [vmem:[%s2980_s8 + $0x1] ss:$0 sm:$0xff] }
 0xee1   :  { %v2190_v50 = vpop.permute.xlu2 %2189 }
 0xee2   :  { %v2192_v54 = vunpack.i.h.bf16 %v2190_v50  ;;  %v2191_v13 = vunpack.i.l.bf16 %v2190_v50 }
 0xee9   :  { %v2180_v46 = vpop.permute.xlu0 %2179 }
 0xeea   :  { %v2182_v47 = vunpack.i.h.bf16 %v2180_v46  ;;  %v2181_v49 = vunpack.i.l.bf16 %v2180_v46 }
 0xeec   :  { %v1475_v57 = vsel %vm163_vm1, %v1285_v32, %v2182_v47  ;;  %v1228_v58 = vsel %vm163_vm1, %v2792_v39, %v2181_v49  ;;  %v2206_v47 = vld [vmem:[%s2981_s9 + $0x1] ss:$0 sm:$0xff] }
 0xf07   :  { %v2185_v51 = vpop.permute.xlu1 %2184 }
 0xf08   :  { %v2187_v52 = vunpack.i.h.bf16 %v2185_v51  ;;  %v2186_v53 = vunpack.i.l.bf16 %v2185_v51 }
 0xf0a   :  { %v1229_v56 = vsel %vm406_vm3, %v1228_v58, %v2186_v53  ;;  %v1476_v14 = vsel %vm406_vm3, %v1475_v57, %v2187_v52  ;;  %v2139_v57 = vld [vmem:[%s2984_s12 + $0x50] sm:$0xff]  ;;  %v2138_v58 = vld [vmem:[%s2984_s12 + $0x48] sm:$0xff] }
 0xf0b   :  { %v1230_v59 = vsel %vm408_vm4, %v1229_v56, %v2191_v13  ;;  %v1477_v60 = vsel %vm408_vm4, %v1476_v14, %v2192_v54  ;;  %v2140_v13 = vld [vmem:[%s2984_s12 + $0x58] sm:$0xff]  ;;  %v2137_v56 = vld [vmem:[%s2984_s12 + $0x40] sm:$0xff] }
 0xf0c   :  { %v1478_v19 = vpack.c.bf16 %v1477_v60, %v1230_v59  ;;  %1668 = vmatpush.bf16.msrb.mxu2 %v2140_v13  ;;  %v2207_v59 = vld [vmem:[%s2983_s11 + $0x1] ss:$0 sm:$0xff] }
 0xf0e   :  { %2062 = vmatmul.msk.bf16.vlgmr.msrb.gmra.mxu1 %vm141_vm0, %v1478_v19 }
 0xf10   :  { %1669 = vmatpush.bf16.msrb.mxu2 %v2139_v57 }
 0xf14   :  { %1670 = vmatpush.bf16.msrb.mxu2 %v2138_v58 }
 0xf18   :  { %1671 = vmatpush.bf16.msrb.mxu2 %v2137_v56 }
 0xf8b   :  { %v1508_v62 = vpop.f32.mrf.mxu1 }
 0xf8c   :  { %v1509_v63 = vadd.f32 %v2204_v61, %v1508_v62 }
 0xf8e   :  { %v1513_v0 = vadd.f32 %v1509_v63, %v2721_v22 }
 0xf90   :  { %v1519_v39 = vsel %vm141_vm0, %v1513_v0, 0.0 }
 0xf91   :  { %1520 = vadd.xlane.f32.xlu0 %v1519_v39  ;;  %v2208_v39 = vld [vmem:[%s2985_s13 + $0x1] ss:$0 sm:$0xff] }
 0xf93   :  { %v1510_v1 = vpop.f32.mrf.mxu1 }
 0xf94   :  { %v1511_v3 = vadd.f32 %v2204_v61, %v1510_v1 }
 0xf96   :  { %v1514_v48 = vadd.f32 %v1511_v3, %v2723_v41  ;;  %v2136_v41 = vld [vmem:[%s2982_s10 + $0x18] sm:$0xff] }
 0xf97   :  { %1600 = vmatpush.bf16.msrb.mxu3 %v2136_v41 }
 0xf98   :  { %v1522_v4 = vsel %vm141_vm0, %v1514_v48, 0.0 }
 0xf99   :  { %1523 = vadd.xlane.f32.xlu2 %v1522_v4 }
 0xf9b   :  { %1601 = vmatpush.bf16.msrb.mxu3 %v2135_v18 }
0x1004   :  { %v1521_v5 = vpop.xlane.xlu0 %1520 }
0x1005   :  { %v1525_v6 = vmul.f32 %v1521_v5, %v2650_v55 }
0x1007   :  { %v1527_v7 = vsub.f32 %v1513_v0, %v1525_v6 }
0x1009   :  { %v1529_v8 = vmul.f32 %v1527_v7, %v1527_v7 }
0x100b   :  { %v1531_v9 = vsel %vm141_vm0, %v1529_v8, 0.0 }
0x100c   :  { %v1524_v34 = vpop.xlane.xlu2 %1523  ;;  %1532 = vadd.xlane.f32.xlu1 %v1531_v9 }
0x100d   :  { %v1526_v22 = vmul.f32 %v1524_v34, %v2650_v55 }
0x100f   :  { %v1528_v10 = vsub.f32 %v1514_v48, %v1526_v22 }
0x1011   :  { %v1530_v11 = vmul.f32 %v1528_v10, %v1528_v10 }
0x1013   :  { %v1534_v2 = vsel %vm141_vm0, %v1530_v11, 0.0 }
0x1014   :  { %1535 = vadd.xlane.f32.xlu0 %v1534_v2 }
0x1025   :  { %1742 = vperm.xlu1 %2193, %v1739_v24  }
0x107f   :  { %v1533_v15 = vpop.xlane.xlu1 %1532 }
0x1080   :  { %v1537_v16 = vmul.f32 %v1533_v15, %v2650_v55 }
0x1082   :  { %v1539_v17 = vadd.f32 1e-05, %v1537_v16 }
0x1084   :  { %2286 = vrsqrt.f32 %v1539_v17  ;;  %vm1547_vm3 = vweird.f32 %v1539_v17 }
0x1087   :  { %v1536_v21 = vpop.xlane.xlu0 %1535 }
0x1088   :  { %v1538_v23 = vmul.f32 %v1536_v21, %v2650_v55 }
0x108a   :  { %v2287_v25 = vpop.eup %2286  ;;  %v1540_v26 = vadd.f32 1e-05, %v1538_v23 }
0x108b   :  { %v1542_v45 = vmul.f32 %v2287_v25, %v1539_v17  ;;  %vm1548_vm2 = vweird.f32 %v2287_v25 }
0x108c   :  { %2288 = vrsqrt.f32 %v1540_v26  ;;  %vm1549_vm4 = vmor %vm1547_vm3, %vm1548_vm2  ;;  %vm1557_vm8 = vweird.f32 %v1540_v26 }
0x108d   :  { %v1543_v28 = vmul.f32 %v2287_v25, %v1542_v45 }
0x108f   :  { %v1544_v29 = vmul.f32 0.5, %v1543_v28 }
0x1091   :  { %v1545_v31 = vsub.f32 1.5, %v1544_v29 }
0x1092   :  { %v2289_v32 = vpop.eup %2288 }
0x1093   :  { %v1546_v35 = vmul.f32 %v2287_v25, %v1545_v31  ;;  %v1552_v36 = vmul.f32 %v2289_v32, %v1540_v26  ;;  %vm1558_vm7 = vweird.f32 %v2289_v32 }
0x1094   :  { %vm1559_vm9 = vmor %vm1557_vm8, %vm1558_vm7 }
0x1095   :  { %v1553_v37 = vmul.f32 %v2289_v32, %v1552_v36  ;;  %v1550_v38 = vsel %vm1549_vm4, %v2287_v25, %v1546_v35  ;;  %v2209_v36 = vld [vmem:[%s2986_s14 + $0x1] ss:$0 sm:$0xff] }
0x1096   :  { %v1561_v12 = vmul.f32 %v1550_v38, %v1527_v7 }
0x1097   :  { %v1554_v40 = vmul.f32 0.5, %v1553_v37 }
0x1098   :  { %v1566_v49 = vmul.f32 %v2205_v43, %v1561_v12 }
0x1099   :  { %v1555_v42 = vsub.f32 1.5, %v1554_v40  ;;  %v2210_v40 = vld [vmem:[%s2987_s15 + $0x1] ss:$0 sm:$0xff] }
0x109a   :  { %v1571_v52 = vadd.f32 %v2206_v47, %v1566_v49 }
0x109b   :  { %v1556_v44 = vmul.f32 %v2289_v32, %v1555_v42 }
0x109d   :  { %v1560_v46 = vsel %vm1559_vm9, %v2289_v32, %v1556_v44 }
0x109e   :  { %v1562_v50 = vmul.f32 %v1560_v46, %v1528_v10 }
0x10a0   :  { %v1567_v51 = vmul.f32 %v2205_v43, %v1562_v50 }
0x10a2   :  { %v1572_v53 = vadd.f32 %v2206_v47, %v1567_v51  ;;  %v1738_v47 = vld [vmem:[%s2988_s16] sm:$0x1] }
0x10a4   :  { %v1573_v54 = vpack.c.bf16 %v1572_v53, %v1571_v52 }
0x10a6   :  { %2074 = vmatmul.msk.bf16.vlgmr.msrb.gmra.mxu3 %vm141_vm0, %v1573_v54 }
0x1129   :  { %v1603_v14 = vpop.f32.mrf.mxu3 }
0x112a   :  { %v1604_v60 = vadd.f32 %v2207_v59, %v1603_v14  ;;  %v1832_v14 = vrot.slane %v2514_v33, 1 }
0x112c   :  { %v1608_v62 = vmax.f32 %v1604_v60, 0.0 }
0x1131   :  { %v1605_v19 = vpop.f32.mrf.mxu3 }
0x1132   :  { %v1606_v61 = vadd.f32 %v2207_v59, %v1605_v19 }
0x1134   :  { %v1609_v63 = vmax.f32 %v1606_v61, 0.0 }
0x1136   :  { %v1610_v0 = vpack.c.bf16 %v1609_v63, %v1608_v62 }
0x1138   :  { %1672 = vmatmul.bf16.vlgmr.msrb.gmra.mxu2 %v1610_v0 }
0x11bb   :  { %v1673_v1 = vpop.f32.mrf.mxu2 }
0x11bc   :  { %v1674_v3 = vadd.f32 %v2208_v39, %v1673_v1 }
0x11be   :  { %v1678_v48 = vadd.f32 %v1674_v3, %v1571_v52 }
0x11c0   :  { %v1684_v4 = vsel %vm141_vm0, %v1678_v48, 0.0 }
0x11c1   :  { %1685 = vadd.xlane.f32.xlu0 %v1684_v4 }
0x11c3   :  { %v1675_v5 = vpop.f32.mrf.mxu2 }
0x11c4   :  { %v1676_v6 = vadd.f32 %v2208_v39, %v1675_v5 }
0x11c6   :  { %v1679_v7 = vadd.f32 %v1676_v6, %v1572_v53  ;;  %v1743_v53 = vpop.permute.xlu1 %1742 }
0x11c7   :  { %v1745_v54 = vperm.slane %v1743_v53, 0 }
0x11c8   :  { %v1687_v8 = vsel %vm141_vm0, %v1679_v7, 0.0 }
0x11c9   :  { %1688 = vadd.xlane.f32.xlu2 %v1687_v8 }
0x1234   :  { %v1686_v9 = vpop.xlane.xlu0 %1685 }
0x1235   :  { %v1690_v34 = vmul.f32 %v1686_v9, %v2650_v55 }
0x1237   :  { %v1692_v22 = vsub.f32 %v1678_v48, %v1690_v34 }
0x1239   :  { %v1694_v10 = vmul.f32 %v1692_v22, %v1692_v22 }
0x123b   :  { %v1696_v11 = vsel %vm141_vm0, %v1694_v10, 0.0  ;;  %v1877_v10 = vld [vmem:[%s2990_s18 + $0x18] sm:$0xff] }
0x123c   :  { %v1689_v2 = vpop.xlane.xlu2 %1688  ;;  %1697 = vadd.xlane.f32.xlu0 %v1696_v11  ;;  %v1876_v11 = vld [vmem:[%s2990_s18 + $0x10] sm:$0xff] }
0x123d   :  { %v1691_v41 = vmul.f32 %v1689_v2, %v2650_v55  ;;  %v1875_v2 = vld [vmem:[%s2990_s18 + $0x8] sm:$0xff] }
0x123f   :  { %v1693_v15 = vsub.f32 %v1679_v7, %v1691_v41  ;;  %v1874_v41 = vld [vmem:[%s2990_s18] sm:$0xff] }
0x1241   :  { %v1695_v16 = vmul.f32 %v1693_v15, %v1693_v15 }
0x1243   :  { %v1699_v17 = vsel %vm141_vm0, %v1695_v16, 0.0 }
0x1244   :  { %1700 = vadd.xlane.f32.xlu2 %v1699_v17 }
0x12af   :  { %v1698_v18 = vpop.xlane.xlu0 %1697 }
0x12b0   :  { %v1702_v20 = vmul.f32 %v1698_v18, %v2650_v55 }
0x12b2   :  { %v1704_v21 = vadd.f32 1e-05, %v1702_v20  ;;  %v2211_v20 = vld [vmem:[%s2991_s19] ss:$0 sm:$0xff] }
0x12b4   :  { %2290 = vrsqrt.f32 %v1704_v21  ;;  %vm1712_vm11 = vweird.f32 %v1704_v21 }
0x12b7   :  { %v1701_v23 = vpop.xlane.xlu2 %1700 }
0x12b8   :  { %v1703_v25 = vmul.f32 %v1701_v23, %v2650_v55 }
0x12ba   :  { %v2291_v26 = vpop.eup %2290  ;;  %v1705_v45 = vadd.f32 1e-05, %v1703_v25 }
0x12bb   :  { %v1707_v27 = vmul.f32 %v2291_v26, %v1704_v21  ;;  %vm1713_vm10 = vweird.f32 %v2291_v26 }
0x12bc   :  { %2292 = vrsqrt.f32 %v1705_v45  ;;  %vm1714_vm12 = vmor %vm1712_vm11, %vm1713_vm10  ;;  %vm1722_vm14 = vweird.f32 %v1705_v45 }
0x12bd   :  { %v1708_v28 = vmul.f32 %v2291_v26, %v1707_v27 }
0x12bf   :  { %v1709_v29 = vmul.f32 0.5, %v1708_v28 }
0x12c1   :  { %v1710_v30 = vsub.f32 1.5, %v1709_v29 }
0x12c2   :  { %v2293_v31 = vpop.eup %2292 }
0x12c3   :  { %v1711_v32 = vmul.f32 %v2291_v26, %v1710_v30  ;;  %v1717_v35 = vmul.f32 %v2293_v31, %v1705_v45  ;;  %vm1723_vm13 = vweird.f32 %v2293_v31 }
0x12c4   :  { %vm1724_vm15 = vmor %vm1722_vm14, %vm1723_vm13 }
0x12c5   :  { %v1715_v37 = vsel %vm1714_vm12, %v2291_v26, %v1711_v32  ;;  %v1718_v55 = vmul.f32 %v2293_v31, %v1717_v35 }
0x12c6   :  { %v1726_v38 = vmul.f32 %v1715_v37, %v1692_v22 }
0x12c7   :  { %v1719_v42 = vmul.f32 0.5, %v1718_v55 }
0x12c8   :  { %v1731_v43 = vmul.f32 %v2209_v36, %v1726_v38 }
0x12c9   :  { %v1720_v12 = vsub.f32 1.5, %v1719_v42 }
0x12ca   :  { %v1736_v44 = vadd.f32 %v2210_v40, %v1731_v43 }
0x12cb   :  { %v1721_v46 = vmul.f32 %v2293_v31, %v1720_v12 }
0x12cc   :  { %2110 = vmatpush.xpose.msk.msra.mxu0 %vm141_vm0, %v1736_v44  ;;  %1803 = vmatpush.msra.mxu1 %v1736_v44 }
0x12cd   :  { %v1725_v49 = vsel %vm1724_vm15, %v2293_v31, %v1721_v46 }
0x12ce   :  { %v1727_v50 = vmul.f32 %v1725_v49, %v1693_v15  ;;  %1897 = vmatpush.msrb.mxu1 %v1877_v10 }
0x12cf   :  { %2111 = vmatmul.msk.f32.vlgmr.msra.gmra.mxu0 %vm141_vm0, %v1738_v47 }
0x12d0   :  { %v1732_v51 = vmul.f32 %v2209_v36, %v1727_v50  ;;  %1898 = vmatpush.msrb.mxu1 %v1876_v11 }
0x12d2   :  { %v1737_v52 = vadd.f32 %v2210_v40, %v1732_v51  ;;  %1899 = vmatpush.msrb.mxu1 %v1875_v2 }
0x12d4   :  { %2113 = vmatpush.xpose.msk.msra.mxu3 %vm141_vm0, %v1737_v52  ;;  %1864 = vmatpush.msrb.mxu0 %v1737_v52 }
0x12d5   :  { %1900 = vmatpush.msrb.mxu1 %v1874_v41 }
0x12d7   :  { %2114 = vmatmul.msk.f32.vlgmr.msra.gmra.mxu3 %vm141_vm0, %v1738_v47 }
0x134c   :  { %v1769_v13 = vpop.f32.mrf.mxu0 }
0x134d   :  { %v1770_v57 = vadd.f32 %v1769_v13, %v1745_v54 }
0x134f   :  { %v1772_v58 = vadd.f32 %v1770_v57, %v2514_v33 }
0x1351   :  { %v1774_v56 = vsel %vm1773_vm5, %v1772_v58, -inf }
0x1352   :  { %1775 = vmax.xlane.f32.xlu0 %v1774_v56 }
0x135a   :  { %v1828_v59 = vpop.f32.mrf.mxu3 }
0x135b   :  { %v1829_v60 = vadd.f32 %v1828_v59, %v1745_v54 }
0x135d   :  { %v1834_v19 = vadd.f32 %v1832_v14, %v1829_v60 }
0x135f   :  { %v1835_v61 = vsel %vm1773_vm5, %v1834_v19, -inf }
0x1360   :  { %1836 = vmax.xlane.f32.xlu2 %v1835_v61 }
0x13c5   :  { %v1776_v62 = vpop.xlane.xlu0 %1775 }
0x13c6   :  { %v1777_v63 = vsub.f32 %v1772_v58, %v1776_v62 }
0x13c8   :  { %v1778_v0 = vmul.f32 1.442695, %v1777_v63 }
0x13ca   :  { %2294 = vpow2.f32 %v1778_v0 }
0x13d0   :  { %v2295_v39 = vpop.eup %2294 }
0x13d1   :  { %v1780_v1 = vsel %vm1773_vm5, %v2295_v39, 0.0 }
0x13d2   :  { %1781 = vadd.xlane.f32.xlu0 %v1780_v1 }
0x13d3   :  { %v1837_v3 = vpop.xlane.xlu2 %1836 }
0x13d4   :  { %v1838_v48 = vsub.f32 %v1834_v19, %v1837_v3 }
0x13d6   :  { %v1839_v4 = vmul.f32 1.442695, %v1838_v48 }
0x13d8   :  { %2296 = vpow2.f32 %v1839_v4 }
0x13de   :  { %v2297_v5 = vpop.eup %2296 }
0x13df   :  { %v1841_v33 = vsel %vm1773_vm5, %v2297_v5, 0.0 }
0x13e0   :  { %1842 = vadd.xlane.f32.xlu2 %v1841_v33 }
0x1445   :  { %v1782_v6 = vpop.xlane.xlu0 %1781 }
0x1446   :  { %2298 = vrcp.f32 %v1782_v6 }
0x144c   :  { %v2299_v7 = vpop.eup %2298 }
0x144d   :  { %v1784_v8 = vmul.f32 %v2299_v7, %v2295_v39 }
0x144f   :  { %2112 = vmatmul.msk.f32.vlgmr.msra.gmra.mxu1 %vm163_vm1, %v1784_v8 }
0x1453   :  { %v1843_v9 = vpop.xlane.xlu2 %1842 }
0x1454   :  { %2300 = vrcp.f32 %v1843_v9 }
0x145a   :  { %v2301_v34 = vpop.eup %2300 }
0x145b   :  { %v1845_v22 = vmul.f32 %v2301_v34, %v2297_v5 }
0x145d   :  { %2115 = vmatmul.msk.f32.vlgmr.msrb.gmra.mxu0 %vm163_vm1, %v1845_v22  ;;  %vm1872_vm1 = vcmask 1040384  }
0x14cc   :  { %v1805_v17 = vpop.f32.mrf.mxu1 }
0x14da   :  { %v1866_v15 = vpop.f32.mrf.mxu0 }
0x14db   :  { %v1870_v16 = vrot.slane %v1866_v15, 7 }
0x14dd   :  { %v1873_v18 = vsel %vm1872_vm1, %v1805_v17, %v1870_v16 }
0x14de   :  { %2116 = vmatmul.msk.f32.vlgmr.msrb.gmra.mxu1 %vm141_vm0, %v1873_v18 }
0x155b   :  { %v1902_v21 = vpop.f32.mrf.mxu1 }
0x155c   :  { %v1903_v23 = vadd.f32 %v2211_v20, %v1902_v21 }
0x155e   :  { %1906 = vst.msk [vmem:[#allocation3] sm:$0x3] %vm1905_vm6, %v1903_v23 }
0x155f   :  { %1917 = dma.vmem_to_hbm [thread:$0]  %s1913_s28, 32, %s1915_s23, [#allocation4]  }
0x1560   :  { %2326 = dma.done.wait [#allocation4], 32  }
0x1561   :  { %2327 = vsyncadd [#allocation4], 4294967264 }
0x1562   :  { %1922 = vsyncpa [#allocation4], 1 }

</bundles_post_ra>
